<compile_context>
chip_gen: v7x
topology: tpu7x:2x2x1
jax: 0.10.0
libtpu: 0.0.40
codegen_flags: <defaults>
</compile_context>

<pallas_src>
import jax
import jax.numpy as jnp
import numpy as np
from jax.experimental import pallas as pl
from jax.experimental.pallas import tpu as pltpu


def conv3x3_stencil_kernel(img_ref, msk_ref, w_ref, b_ref, o_ref, xpad_ref):
    # img_ref : (N, C_img, H, W)        VMEM
    # msk_ref : (N, 1,     H, W)        VMEM
    # w_ref   : (Cout*Cin*9,)           SMEM scalars, row-major over (co, ci, ky, kx)
    # b_ref   : (Cout,)                 SMEM scalars
    # o_ref   : (N, Cout, H, W)         VMEM
    # xpad_ref: (N, Cin, H+2, W+2) f32  VMEM scratch
    N, C_img, H, W = img_ref.shape
    Cin = xpad_ref.shape[1]
    Cout = o_ref.shape[1]

    # Fused torch.cat([images, masks], dim=1) + zero padding(1): zero the padded
    # scratch once, then write both inputs into its interior window.
    xpad_ref[...] = jnp.zeros_like(xpad_ref)
    xpad_ref[:, :C_img, 1:H + 1, 1:W + 1] = img_ref[...].astype(jnp.float32)
    xpad_ref[:, C_img:Cin, 1:H + 1, 1:W + 1] = msk_ref[...].astype(jnp.float32)

    # Bias-initialized accumulators: one (N, H, W) f32 array per output channel.
    accs = [jnp.full((N, H, W), b_ref[co], dtype=jnp.float32) for co in range(Cout)]

    # VPU stencil: no MXU, no im2col.  Each 3x3 tap is a single shifted-window load
    # of the padded scratch, shared by all Cout*Cin scalar-coefficient FMAs.
    for ky in range(3):
        for kx in range(3):
            t = ky * 3 + kx
            patch = xpad_ref[:, :, ky:ky + H, kx:kx + W]      # (N, Cin, H, W) f32
            for ci in range(Cin):
                pc = patch[:, ci]                             # (N, H, W): free slab select
                for co in range(Cout):
                    accs[co] = accs[co] + w_ref[(co * Cin + ci) * 9 + t] * pc

    for co in range(Cout):
        o_ref[:, co] = accs[co].astype(o_ref.dtype)


@jax.jit
def generator_forward(images_in, masks_in, z, c, weight, bias):
    """images_in: (N, C, H, W); masks_in: (N, 1, H, W); z, c unused by forward.
    weight: (Cout, Cin, 3, 3) PyTorch layout; bias: (Cout,). Returns (N, Cout, H, W)."""
    del z, c  # not used by the reference forward pass
    N, C_img, H, W = images_in.shape
    Cout, Cin, KH, KW = weight.shape
    assert (KH, KW) == (3, 3) and Cin == C_img + 1 and masks_in.shape == (N, 1, H, W)

    # (Cout, Cin, 3, 3) row-major -> flat scalar table for SMEM (free bitcast reshape).
    w_flat = weight.astype(jnp.float32).reshape(Cout * Cin * KH * KW)
    b_flat = bias.astype(jnp.float32)

    return pl.pallas_call(
        conv3x3_stencil_kernel,
        out_shape=jax.ShapeDtypeStruct((N, Cout, H, W), images_in.dtype),
        in_specs=[
            pl.BlockSpec(memory_space=pltpu.MemorySpace.VMEM),   # images (NCHW)
            pl.BlockSpec(memory_space=pltpu.MemorySpace.VMEM),   # masks  (NCHW)
            pl.BlockSpec(memory_space=pltpu.MemorySpace.SMEM),   # conv weights (scalars)
            pl.BlockSpec(memory_space=pltpu.MemorySpace.SMEM),   # conv bias (scalars)
        ],
        out_specs=pl.BlockSpec(memory_space=pltpu.MemorySpace.VMEM),
        scratch_shapes=[pltpu.VMEM((N, Cin, H + 2, W + 2), jnp.float32)],
    )(images_in, masks_in, w_flat, b_flat)


def reference_forward(images_in, masks_in, weight, bias):
    x = jnp.concatenate([images_in, masks_in], axis=1)
    out = jax.lax.conv_general_dilated(
        x, weight, window_strides=(1, 1), padding=((1, 1), (1, 1)),
        dimension_numbers=("NCHW", "OIHW", "NCHW"))
    return out + bias.reshape(1, -1, 1, 1)


if __name__ == "__main__":
    # Small shapes consistent with the module: batch=2, img_channels=3, res=16.
    N, C_img, H, W = 2, 3, 16, 16
    z_dim, c_dim = 32, 0
    Cin, Cout = C_img + 1, C_img

    key = jax.random.PRNGKey(0)
    k_img, k_msk, k_z, k_w, k_b = jax.random.split(key, 5)

    images_in = jax.random.normal(k_img, (N, C_img, H, W), dtype=jnp.float32)
    masks_in = jax.random.uniform(k_msk, (N, 1, H, W), dtype=jnp.float32)
    z = jax.random.normal(k_z, (N, z_dim), dtype=jnp.float32)
    c = jnp.zeros((N, c_dim), dtype=jnp.float32)

    # Deterministic parameter init (PyTorch Conv2d default: U(-1/sqrt(fan_in), 1/sqrt(fan_in))).
    fan_in = Cin * 3 * 3
    bound = 1.0 / np.sqrt(fan_in)
    weight = jax.random.uniform(k_w, (Cout, Cin, 3, 3), dtype=jnp.float32,
                                minval=-bound, maxval=bound)
    bias = jax.random.uniform(k_b, (Cout,), dtype=jnp.float32,
                              minval=-bound, maxval=bound)

    out = generator_forward(images_in, masks_in, z, c, weight, bias)
    out = jax.block_until_ready(out)

    ref = reference_forward(images_in, masks_in, weight, bias)
    assert out.shape == (N, Cout, H, W)
    np.testing.assert_allclose(np.asarray(out), np.asarray(ref), rtol=1e-5, atol=1e-5)

    print("KERNEL_OK")
</pallas_src>

<mosaic_0001>
module attributes {stable_mosaic.version = 11 : i64} {
  func.func @conv3x3_stencil_kernel(%arg0: memref<2x3x16x16xf32, #tpu.memory_space<vmem>>, %arg1: memref<2x1x16x16xf32, #tpu.memory_space<vmem>>, %arg2: memref<108xf32, #tpu.memory_space<smem>>, %arg3: memref<3xf32, #tpu.memory_space<smem>>, %arg4: memref<2x3x16x16xf32, #tpu.memory_space<vmem>>, %arg5: memref<2x4x18x18xf32, #tpu.memory_space<vmem>>) attributes {dimension_semantics = [], scalar_prefetch = 0 : i64, scratch_operands = 1 : i64, tpu.core_type = #tpu.core_type<tc>} {
    %cst = arith.constant 0.000000e+00 : f32
    %0 = vector.broadcast %cst : f32 to vector<2x4x18x18xf32>
    %c0 = arith.constant 0 : index
    %c0_0 = arith.constant 0 : index
    %c0_1 = arith.constant 0 : index
    %c0_2 = arith.constant 0 : index
    %1 = vector.load %arg5[%c0, %c0_0, %c0_1, %c0_2] : memref<2x4x18x18xf32, #tpu.memory_space<vmem>>, vector<2x4x18x18xf32>
    tpu.vector_store %arg5[%c0, %c0_0, %c0_1, %c0_2], %0 {strides = array<i32>} : memref<2x4x18x18xf32, #tpu.memory_space<vmem>>, vector<2x4x18x18xf32>,
    %c0_3 = arith.constant 0 : index
    %c0_4 = arith.constant 0 : index
    %c0_5 = arith.constant 0 : index
    %c0_6 = arith.constant 0 : index
    %2 = vector.load %arg0[%c0_3, %c0_4, %c0_5, %c0_6] : memref<2x3x16x16xf32, #tpu.memory_space<vmem>>, vector<2x3x16x16xf32>
    %c0_7 = arith.constant 0 : index
    %c0_8 = arith.constant 0 : index
    %c1 = arith.constant 1 : index
    %c1_9 = arith.constant 1 : index
    %3 = vector.load %arg5[%c0_7, %c0_8, %c1, %c1_9] : memref<2x4x18x18xf32, #tpu.memory_space<vmem>>, vector<2x3x16x16xf32>
    tpu.vector_store %arg5[%c0_7, %c0_8, %c1, %c1_9], %2 {strides = array<i32>} : memref<2x4x18x18xf32, #tpu.memory_space<vmem>>, vector<2x3x16x16xf32>,
    %c0_10 = arith.constant 0 : index
    %c0_11 = arith.constant 0 : index
    %c0_12 = arith.constant 0 : index
    %c0_13 = arith.constant 0 : index
    %4 = vector.load %arg1[%c0_10, %c0_11, %c0_12, %c0_13] : memref<2x1x16x16xf32, #tpu.memory_space<vmem>>, vector<2x1x16x16xf32>
    %c0_14 = arith.constant 0 : index
    %c3 = arith.constant 3 : index
    %c1_15 = arith.constant 1 : index
    %c1_16 = arith.constant 1 : index
    %5 = vector.load %arg5[%c0_14, %c3, %c1_15, %c1_16] : memref<2x4x18x18xf32, #tpu.memory_space<vmem>>, vector<2x1x16x16xf32>
    tpu.vector_store %arg5[%c0_14, %c3, %c1_15, %c1_16], %4 {strides = array<i32>} : memref<2x4x18x18xf32, #tpu.memory_space<vmem>>, vector<2x1x16x16xf32>,
    %c0_17 = arith.constant 0 : index
    %6 = memref.load %arg3[%c0_17] : memref<3xf32, #tpu.memory_space<smem>>
    %7 = vector.broadcast %6 : f32 to vector<2x16x16xf32>
    %c1_18 = arith.constant 1 : index
    %8 = memref.load %arg3[%c1_18] : memref<3xf32, #tpu.memory_space<smem>>
    %9 = vector.broadcast %8 : f32 to vector<2x16x16xf32>
    %c2 = arith.constant 2 : index
    %10 = memref.load %arg3[%c2] : memref<3xf32, #tpu.memory_space<smem>>
    %11 = vector.broadcast %10 : f32 to vector<2x16x16xf32>
    %c0_19 = arith.constant 0 : index
    %c0_20 = arith.constant 0 : index
    %c0_21 = arith.constant 0 : index
    %c0_22 = arith.constant 0 : index
    %12 = vector.load %arg5[%c0_19, %c0_20, %c0_21, %c0_22] : memref<2x4x18x18xf32, #tpu.memory_space<vmem>>, vector<2x4x16x16xf32>
    %13 = vector.extract_strided_slice %12 {offsets = [0, 0, 0, 0], sizes = [2, 1, 16, 16], strides = [1, 1, 1, 1]} : vector<2x4x16x16xf32> to vector<2x1x16x16xf32>
    %14 = vector.shape_cast %13 : vector<2x1x16x16xf32> to vector<2x16x16xf32>
    %c0_23 = arith.constant 0 : index
    %15 = memref.load %arg2[%c0_23] : memref<108xf32, #tpu.memory_space<smem>>
    %16 = vector.broadcast %15 : f32 to vector<2x16x16xf32>
    %17 = arith.mulf %16, %14 : vector<2x16x16xf32>
    %18 = arith.addf %7, %17 : vector<2x16x16xf32>
    %c36 = arith.constant 36 : index
    %19 = memref.load %arg2[%c36] : memref<108xf32, #tpu.memory_space<smem>>
    %20 = vector.broadcast %19 : f32 to vector<2x16x16xf32>
    %21 = arith.mulf %20, %14 : vector<2x16x16xf32>
    %22 = arith.addf %9, %21 : vector<2x16x16xf32>
    %c72 = arith.constant 72 : index
    %23 = memref.load %arg2[%c72] : memref<108xf32, #tpu.memory_space<smem>>
    %24 = vector.broadcast %23 : f32 to vector<2x16x16xf32>
    %25 = arith.mulf %24, %14 : vector<2x16x16xf32>
    %26 = arith.addf %11, %25 : vector<2x16x16xf32>
    %27 = vector.extract_strided_slice %12 {offsets = [0, 1, 0, 0], sizes = [2, 1, 16, 16], strides = [1, 1, 1, 1]} : vector<2x4x16x16xf32> to vector<2x1x16x16xf32>
    %28 = vector.shape_cast %27 : vector<2x1x16x16xf32> to vector<2x16x16xf32>
    %c9 = arith.constant 9 : index
    %29 = memref.load %arg2[%c9] : memref<108xf32, #tpu.memory_space<smem>>
    %30 = vector.broadcast %29 : f32 to vector<2x16x16xf32>
    %31 = arith.mulf %30, %28 : vector<2x16x16xf32>
    %32 = arith.addf %18, %31 : vector<2x16x16xf32>
    %c45 = arith.constant 45 : index
    %33 = memref.load %arg2[%c45] : memref<108xf32, #tpu.memory_space<smem>>
    %34 = vector.broadcast %33 : f32 to vector<2x16x16xf32>
    %35 = arith.mulf %34, %28 : vector<2x16x16xf32>
    %36 = arith.addf %22, %35 : vector<2x16x16xf32>
    %c81 = arith.constant 81 : index
    %37 = memref.load %arg2[%c81] : memref<108xf32, #tpu.memory_space<smem>>
    %38 = vector.broadcast %37 : f32 to vector<2x16x16xf32>
    %39 = arith.mulf %38, %28 : vector<2x16x16xf32>
    %40 = arith.addf %26, %39 : vector<2x16x16xf32>
    %41 = vector.extract_strided_slice %12 {offsets = [0, 2, 0, 0], sizes = [2, 1, 16, 16], strides = [1, 1, 1, 1]} : vector<2x4x16x16xf32> to vector<2x1x16x16xf32>
    %42 = vector.shape_cast %41 : vector<2x1x16x16xf32> to vector<2x16x16xf32>
    %c18 = arith.constant 18 : index
    %43 = memref.load %arg2[%c18] : memref<108xf32, #tpu.memory_space<smem>>
    %44 = vector.broadcast %43 : f32 to vector<2x16x16xf32>
    %45 = arith.mulf %44, %42 : vector<2x16x16xf32>
    %46 = arith.addf %32, %45 : vector<2x16x16xf32>
    %c54 = arith.constant 54 : index
    %47 = memref.load %arg2[%c54] : memref<108xf32, #tpu.memory_space<smem>>
    %48 = vector.broadcast %47 : f32 to vector<2x16x16xf32>
    %49 = arith.mulf %48, %42 : vector<2x16x16xf32>
    %50 = arith.addf %36, %49 : vector<2x16x16xf32>
    %c90 = arith.constant 90 : index
    %51 = memref.load %arg2[%c90] : memref<108xf32, #tpu.memory_space<smem>>
    %52 = vector.broadcast %51 : f32 to vector<2x16x16xf32>
    %53 = arith.mulf %52, %42 : vector<2x16x16xf32>
    %54 = arith.addf %40, %53 : vector<2x16x16xf32>
    %55 = vector.extract_strided_slice %12 {offsets = [0, 3, 0, 0], sizes = [2, 1, 16, 16], strides = [1, 1, 1, 1]} : vector<2x4x16x16xf32> to vector<2x1x16x16xf32>
    %56 = vector.shape_cast %55 : vector<2x1x16x16xf32> to vector<2x16x16xf32>
    %c27 = arith.constant 27 : index
    %57 = memref.load %arg2[%c27] : memref<108xf32, #tpu.memory_space<smem>>
    %58 = vector.broadcast %57 : f32 to vector<2x16x16xf32>
    %59 = arith.mulf %58, %56 : vector<2x16x16xf32>
    %60 = arith.addf %46, %59 : vector<2x16x16xf32>
    %c63 = arith.constant 63 : index
    %61 = memref.load %arg2[%c63] : memref<108xf32, #tpu.memory_space<smem>>
    %62 = vector.broadcast %61 : f32 to vector<2x16x16xf32>
    %63 = arith.mulf %62, %56 : vector<2x16x16xf32>
    %64 = arith.addf %50, %63 : vector<2x16x16xf32>
    %c99 = arith.constant 99 : index
    %65 = memref.load %arg2[%c99] : memref<108xf32, #tpu.memory_space<smem>>
    %66 = vector.broadcast %65 : f32 to vector<2x16x16xf32>
    %67 = arith.mulf %66, %56 : vector<2x16x16xf32>
    %68 = arith.addf %54, %67 : vector<2x16x16xf32>
    %c0_24 = arith.constant 0 : index
    %c0_25 = arith.constant 0 : index
    %c0_26 = arith.constant 0 : index
    %c1_27 = arith.constant 1 : index
    %69 = vector.load %arg5[%c0_24, %c0_25, %c0_26, %c1_27] : memref<2x4x18x18xf32, #tpu.memory_space<vmem>>, vector<2x4x16x16xf32>
    %70 = vector.extract_strided_slice %69 {offsets = [0, 0, 0, 0], sizes = [2, 1, 16, 16], strides = [1, 1, 1, 1]} : vector<2x4x16x16xf32> to vector<2x1x16x16xf32>
    %71 = vector.shape_cast %70 : vector<2x1x16x16xf32> to vector<2x16x16xf32>
    %c1_28 = arith.constant 1 : index
    %72 = memref.load %arg2[%c1_28] : memref<108xf32, #tpu.memory_space<smem>>
    %73 = vector.broadcast %72 : f32 to vector<2x16x16xf32>
    %74 = arith.mulf %73, %71 : vector<2x16x16xf32>
    %75 = arith.addf %60, %74 : vector<2x16x16xf32>
    %c37 = arith.constant 37 : index
    %76 = memref.load %arg2[%c37] : memref<108xf32, #tpu.memory_space<smem>>
    %77 = vector.broadcast %76 : f32 to vector<2x16x16xf32>
    %78 = arith.mulf %77, %71 : vector<2x16x16xf32>
    %79 = arith.addf %64, %78 : vector<2x16x16xf32>
    %c73 = arith.constant 73 : index
    %80 = memref.load %arg2[%c73] : memref<108xf32, #tpu.memory_space<smem>>
    %81 = vector.broadcast %80 : f32 to vector<2x16x16xf32>
    %82 = arith.mulf %81, %71 : vector<2x16x16xf32>
    %83 = arith.addf %68, %82 : vector<2x16x16xf32>
    %84 = vector.extract_strided_slice %69 {offsets = [0, 1, 0, 0], sizes = [2, 1, 16, 16], strides = [1, 1, 1, 1]} : vector<2x4x16x16xf32> to vector<2x1x16x16xf32>
    %85 = vector.shape_cast %84 : vector<2x1x16x16xf32> to vector<2x16x16xf32>
    %c10 = arith.constant 10 : index
    %86 = memref.load %arg2[%c10] : memref<108xf32, #tpu.memory_space<smem>>
    %87 = vector.broadcast %86 : f32 to vector<2x16x16xf32>
    %88 = arith.mulf %87, %85 : vector<2x16x16xf32>
    %89 = arith.addf %75, %88 : vector<2x16x16xf32>
    %c46 = arith.constant 46 : index
    %90 = memref.load %arg2[%c46] : memref<108xf32, #tpu.memory_space<smem>>
    %91 = vector.broadcast %90 : f32 to vector<2x16x16xf32>
    %92 = arith.mulf %91, %85 : vector<2x16x16xf32>
    %93 = arith.addf %79, %92 : vector<2x16x16xf32>
    %c82 = arith.constant 82 : index
    %94 = memref.load %arg2[%c82] : memref<108xf32, #tpu.memory_space<smem>>
    %95 = vector.broadcast %94 : f32 to vector<2x16x16xf32>
    %96 = arith.mulf %95, %85 : vector<2x16x16xf32>
    %97 = arith.addf %83, %96 : vector<2x16x16xf32>
    %98 = vector.extract_strided_slice %69 {offsets = [0, 2, 0, 0], sizes = [2, 1, 16, 16], strides = [1, 1, 1, 1]} : vector<2x4x16x16xf32> to vector<2x1x16x16xf32>
    %99 = vector.shape_cast %98 : vector<2x1x16x16xf32> to vector<2x16x16xf32>
    %c19 = arith.constant 19 : index
    %100 = memref.load %arg2[%c19] : memref<108xf32, #tpu.memory_space<smem>>
    %101 = vector.broadcast %100 : f32 to vector<2x16x16xf32>
    %102 = arith.mulf %101, %99 : vector<2x16x16xf32>
    %103 = arith.addf %89, %102 : vector<2x16x16xf32>
    %c55 = arith.constant 55 : index
    %104 = memref.load %arg2[%c55] : memref<108xf32, #tpu.memory_space<smem>>
    %105 = vector.broadcast %104 : f32 to vector<2x16x16xf32>
    %106 = arith.mulf %105, %99 : vector<2x16x16xf32>
    %107 = arith.addf %93, %106 : vector<2x16x16xf32>
    %c91 = arith.constant 91 : index
    %108 = memref.load %arg2[%c91] : memref<108xf32, #tpu.memory_space<smem>>
    %109 = vector.broadcast %108 : f32 to vector<2x16x16xf32>
    %110 = arith.mulf %109, %99 : vector<2x16x16xf32>
    %111 = arith.addf %97, %110 : vector<2x16x16xf32>
    %112 = vector.extract_strided_slice %69 {offsets = [0, 3, 0, 0], sizes = [2, 1, 16, 16], strides = [1, 1, 1, 1]} : vector<2x4x16x16xf32> to vector<2x1x16x16xf32>
    %113 = vector.shape_cast %112 : vector<2x1x16x16xf32> to vector<2x16x16xf32>
    %c28 = arith.constant 28 : index
    %114 = memref.load %arg2[%c28] : memref<108xf32, #tpu.memory_space<smem>>
    %115 = vector.broadcast %114 : f32 to vector<2x16x16xf32>
    %116 = arith.mulf %115, %113 : vector<2x16x16xf32>
    %117 = arith.addf %103, %116 : vector<2x16x16xf32>
    %c64 = arith.constant 64 : index
    %118 = memref.load %arg2[%c64] : memref<108xf32, #tpu.memory_space<smem>>
    %119 = vector.broadcast %118 : f32 to vector<2x16x16xf32>
    %120 = arith.mulf %119, %113 : vector<2x16x16xf32>
    %121 = arith.addf %107, %120 : vector<2x16x16xf32>
    %c100 = arith.constant 100 : index
    %122 = memref.load %arg2[%c100] : memref<108xf32, #tpu.memory_space<smem>>
    %123 = vector.broadcast %122 : f32 to vector<2x16x16xf32>
    %124 = arith.mulf %123, %113 : vector<2x16x16xf32>
    %125 = arith.addf %111, %124 : vector<2x16x16xf32>
    %c0_29 = arith.constant 0 : index
    %c0_30 = arith.constant 0 : index
    %c0_31 = arith.constant 0 : index
    %c2_32 = arith.constant 2 : index
    %126 = vector.load %arg5[%c0_29, %c0_30, %c0_31, %c2_32] : memref<2x4x18x18xf32, #tpu.memory_space<vmem>>, vector<2x4x16x16xf32>
    %127 = vector.extract_strided_slice %126 {offsets = [0, 0, 0, 0], sizes = [2, 1, 16, 16], strides = [1, 1, 1, 1]} : vector<2x4x16x16xf32> to vector<2x1x16x16xf32>
    %128 = vector.shape_cast %127 : vector<2x1x16x16xf32> to vector<2x16x16xf32>
    %c2_33 = arith.constant 2 : index
    %129 = memref.load %arg2[%c2_33] : memref<108xf32, #tpu.memory_space<smem>>
    %130 = vector.broadcast %129 : f32 to vector<2x16x16xf32>
    %131 = arith.mulf %130, %128 : vector<2x16x16xf32>
    %132 = arith.addf %117, %131 : vector<2x16x16xf32>
    %c38 = arith.constant 38 : index
    %133 = memref.load %arg2[%c38] : memref<108xf32, #tpu.memory_space<smem>>
    %134 = vector.broadcast %133 : f32 to vector<2x16x16xf32>
    %135 = arith.mulf %134, %128 : vector<2x16x16xf32>
    %136 = arith.addf %121, %135 : vector<2x16x16xf32>
    %c74 = arith.constant 74 : index
    %137 = memref.load %arg2[%c74] : memref<108xf32, #tpu.memory_space<smem>>
    %138 = vector.broadcast %137 : f32 to vector<2x16x16xf32>
    %139 = arith.mulf %138, %128 : vector<2x16x16xf32>
    %140 = arith.addf %125, %139 : vector<2x16x16xf32>
    %141 = vector.extract_strided_slice %126 {offsets = [0, 1, 0, 0], sizes = [2, 1, 16, 16], strides = [1, 1, 1, 1]} : vector<2x4x16x16xf32> to vector<2x1x16x16xf32>
    %142 = vector.shape_cast %141 : vector<2x1x16x16xf32> to vector<2x16x16xf32>
    %c11 = arith.constant 11 : index
    %143 = memref.load %arg2[%c11] : memref<108xf32, #tpu.memory_space<smem>>
    %144 = vector.broadcast %143 : f32 to vector<2x16x16xf32>
    %145 = arith.mulf %144, %142 : vector<2x16x16xf32>
    %146 = arith.addf %132, %145 : vector<2x16x16xf32>
    %c47 = arith.constant 47 : index
    %147 = memref.load %arg2[%c47] : memref<108xf32, #tpu.memory_space<smem>>
    %148 = vector.broadcast %147 : f32 to vector<2x16x16xf32>
    %149 = arith.mulf %148, %142 : vector<2x16x16xf32>
    %150 = arith.addf %136, %149 : vector<2x16x16xf32>
    %c83 = arith.constant 83 : index
    %151 = memref.load %arg2[%c83] : memref<108xf32, #tpu.memory_space<smem>>
    %152 = vector.broadcast %151 : f32 to vector<2x16x16xf32>
    %153 = arith.mulf %152, %142 : vector<2x16x16xf32>
    %154 = arith.addf %140, %153 : vector<2x16x16xf32>
    %155 = vector.extract_strided_slice %126 {offsets = [0, 2, 0, 0], sizes = [2, 1, 16, 16], strides = [1, 1, 1, 1]} : vector<2x4x16x16xf32> to vector<2x1x16x16xf32>
    %156 = vector.shape_cast %155 : vector<2x1x16x16xf32> to vector<2x16x16xf32>
    %c20 = arith.constant 20 : index
    %157 = memref.load %arg2[%c20] : memref<108xf32, #tpu.memory_space<smem>>
    %158 = vector.broadcast %157 : f32 to vector<2x16x16xf32>
    %159 = arith.mulf %158, %156 : vector<2x16x16xf32>
    %160 = arith.addf %146, %159 : vector<2x16x16xf32>
    %c56 = arith.constant 56 : index
    %161 = memref.load %arg2[%c56] : memref<108xf32, #tpu.memory_space<smem>>
    %162 = vector.broadcast %161 : f32 to vector<2x16x16xf32>
    %163 = arith.mulf %162, %156 : vector<2x16x16xf32>
    %164 = arith.addf %150, %163 : vector<2x16x16xf32>
    %c92 = arith.constant 92 : index
    %165 = memref.load %arg2[%c92] : memref<108xf32, #tpu.memory_space<smem>>
    %166 = vector.broadcast %165 : f32 to vector<2x16x16xf32>
    %167 = arith.mulf %166, %156 : vector<2x16x16xf32>
    %168 = arith.addf %154, %167 : vector<2x16x16xf32>
    %169 = vector.extract_strided_slice %126 {offsets = [0, 3, 0, 0], sizes = [2, 1, 16, 16], strides = [1, 1, 1, 1]} : vector<2x4x16x16xf32> to vector<2x1x16x16xf32>
    %170 = vector.shape_cast %169 : vector<2x1x16x16xf32> to vector<2x16x16xf32>
    %c29 = arith.constant 29 : index
    %171 = memref.load %arg2[%c29] : memref<108xf32, #tpu.memory_space<smem>>
    %172 = vector.broadcast %171 : f32 to vector<2x16x16xf32>
    %173 = arith.mulf %172, %170 : vector<2x16x16xf32>
    %174 = arith.addf %160, %173 : vector<2x16x16xf32>
    %c65 = arith.constant 65 : index
    %175 = memref.load %arg2[%c65] : memref<108xf32, #tpu.memory_space<smem>>
    %176 = vector.broadcast %175 : f32 to vector<2x16x16xf32>
    %177 = arith.mulf %176, %170 : vector<2x16x16xf32>
    %178 = arith.addf %164, %177 : vector<2x16x16xf32>
    %c101 = arith.constant 101 : index
    %179 = memref.load %arg2[%c101] : memref<108xf32, #tpu.memory_space<smem>>
    %180 = vector.broadcast %179 : f32 to vector<2x16x16xf32>
    %181 = arith.mulf %180, %170 : vector<2x16x16xf32>
    %182 = arith.addf %168, %181 : vector<2x16x16xf32>
    %c0_34 = arith.constant 0 : index
    %c0_35 = arith.constant 0 : index
    %c1_36 = arith.constant 1 : index
    %c0_37 = arith.constant 0 : index
    %183 = vector.load %arg5[%c0_34, %c0_35, %c1_36, %c0_37] : memref<2x4x18x18xf32, #tpu.memory_space<vmem>>, vector<2x4x16x16xf32>
    %184 = vector.extract_strided_slice %183 {offsets = [0, 0, 0, 0], sizes = [2, 1, 16, 16], strides = [1, 1, 1, 1]} : vector<2x4x16x16xf32> to vector<2x1x16x16xf32>
    %185 = vector.shape_cast %184 : vector<2x1x16x16xf32> to vector<2x16x16xf32>
    %c3_38 = arith.constant 3 : index
    %186 = memref.load %arg2[%c3_38] : memref<108xf32, #tpu.memory_space<smem>>
    %187 = vector.broadcast %186 : f32 to vector<2x16x16xf32>
    %188 = arith.mulf %187, %185 : vector<2x16x16xf32>
    %189 = arith.addf %174, %188 : vector<2x16x16xf32>
    %c39 = arith.constant 39 : index
    %190 = memref.load %arg2[%c39] : memref<108xf32, #tpu.memory_space<smem>>
    %191 = vector.broadcast %190 : f32 to vector<2x16x16xf32>
    %192 = arith.mulf %191, %185 : vector<2x16x16xf32>
    %193 = arith.addf %178, %192 : vector<2x16x16xf32>
    %c75 = arith.constant 75 : index
    %194 = memref.load %arg2[%c75] : memref<108xf32, #tpu.memory_space<smem>>
    %195 = vector.broadcast %194 : f32 to vector<2x16x16xf32>
    %196 = arith.mulf %195, %185 : vector<2x16x16xf32>
    %197 = arith.addf %182, %196 : vector<2x16x16xf32>
    %198 = vector.extract_strided_slice %183 {offsets = [0, 1, 0, 0], sizes = [2, 1, 16, 16], strides = [1, 1, 1, 1]} : vector<2x4x16x16xf32> to vector<2x1x16x16xf32>
    %199 = vector.shape_cast %198 : vector<2x1x16x16xf32> to vector<2x16x16xf32>
    %c12 = arith.constant 12 : index
    %200 = memref.load %arg2[%c12] : memref<108xf32, #tpu.memory_space<smem>>
    %201 = vector.broadcast %200 : f32 to vector<2x16x16xf32>
    %202 = arith.mulf %201, %199 : vector<2x16x16xf32>
    %203 = arith.addf %189, %202 : vector<2x16x16xf32>
    %c48 = arith.constant 48 : index
    %204 = memref.load %arg2[%c48] : memref<108xf32, #tpu.memory_space<smem>>
    %205 = vector.broadcast %204 : f32 to vector<2x16x16xf32>
    %206 = arith.mulf %205, %199 : vector<2x16x16xf32>
    %207 = arith.addf %193, %206 : vector<2x16x16xf32>
    %c84 = arith.constant 84 : index
    %208 = memref.load %arg2[%c84] : memref<108xf32, #tpu.memory_space<smem>>
    %209 = vector.broadcast %208 : f32 to vector<2x16x16xf32>
    %210 = arith.mulf %209, %199 : vector<2x16x16xf32>
    %211 = arith.addf %197, %210 : vector<2x16x16xf32>
    %212 = vector.extract_strided_slice %183 {offsets = [0, 2, 0, 0], sizes = [2, 1, 16, 16], strides = [1, 1, 1, 1]} : vector<2x4x16x16xf32> to vector<2x1x16x16xf32>
    %213 = vector.shape_cast %212 : vector<2x1x16x16xf32> to vector<2x16x16xf32>
    %c21 = arith.constant 21 : index
    %214 = memref.load %arg2[%c21] : memref<108xf32, #tpu.memory_space<smem>>
    %215 = vector.broadcast %214 : f32 to vector<2x16x16xf32>
    %216 = arith.mulf %215, %213 : vector<2x16x16xf32>
    %217 = arith.addf %203, %216 : vector<2x16x16xf32>
    %c57 = arith.constant 57 : index
    %218 = memref.load %arg2[%c57] : memref<108xf32, #tpu.memory_space<smem>>
    %219 = vector.broadcast %218 : f32 to vector<2x16x16xf32>
    %220 = arith.mulf %219, %213 : vector<2x16x16xf32>
    %221 = arith.addf %207, %220 : vector<2x16x16xf32>
    %c93 = arith.constant 93 : index
    %222 = memref.load %arg2[%c93] : memref<108xf32, #tpu.memory_space<smem>>
    %223 = vector.broadcast %222 : f32 to vector<2x16x16xf32>
    %224 = arith.mulf %223, %213 : vector<2x16x16xf32>
    %225 = arith.addf %211, %224 : vector<2x16x16xf32>
    %226 = vector.extract_strided_slice %183 {offsets = [0, 3, 0, 0], sizes = [2, 1, 16, 16], strides = [1, 1, 1, 1]} : vector<2x4x16x16xf32> to vector<2x1x16x16xf32>
    %227 = vector.shape_cast %226 : vector<2x1x16x16xf32> to vector<2x16x16xf32>
    %c30 = arith.constant 30 : index
    %228 = memref.load %arg2[%c30] : memref<108xf32, #tpu.memory_space<smem>>
    %229 = vector.broadcast %228 : f32 to vector<2x16x16xf32>
    %230 = arith.mulf %229, %227 : vector<2x16x16xf32>
    %231 = arith.addf %217, %230 : vector<2x16x16xf32>
    %c66 = arith.constant 66 : index
    %232 = memref.load %arg2[%c66] : memref<108xf32, #tpu.memory_space<smem>>
    %233 = vector.broadcast %232 : f32 to vector<2x16x16xf32>
    %234 = arith.mulf %233, %227 : vector<2x16x16xf32>
    %235 = arith.addf %221, %234 : vector<2x16x16xf32>
    %c102 = arith.constant 102 : index
    %236 = memref.load %arg2[%c102] : memref<108xf32, #tpu.memory_space<smem>>
    %237 = vector.broadcast %236 : f32 to vector<2x16x16xf32>
    %238 = arith.mulf %237, %227 : vector<2x16x16xf32>
    %239 = arith.addf %225, %238 : vector<2x16x16xf32>
    %c0_39 = arith.constant 0 : index
    %c0_40 = arith.constant 0 : index
    %c1_41 = arith.constant 1 : index
    %c1_42 = arith.constant 1 : index
    %240 = vector.load %arg5[%c0_39, %c0_40, %c1_41, %c1_42] : memref<2x4x18x18xf32, #tpu.memory_space<vmem>>, vector<2x4x16x16xf32>
    %241 = vector.extract_strided_slice %240 {offsets = [0, 0, 0, 0], sizes = [2, 1, 16, 16], strides = [1, 1, 1, 1]} : vector<2x4x16x16xf32> to vector<2x1x16x16xf32>
    %242 = vector.shape_cast %241 : vector<2x1x16x16xf32> to vector<2x16x16xf32>
    %c4 = arith.constant 4 : index
    %243 = memref.load %arg2[%c4] : memref<108xf32, #tpu.memory_space<smem>>
    %244 = vector.broadcast %243 : f32 to vector<2x16x16xf32>
    %245 = arith.mulf %244, %242 : vector<2x16x16xf32>
    %246 = arith.addf %231, %245 : vector<2x16x16xf32>
    %c40 = arith.constant 40 : index
    %247 = memref.load %arg2[%c40] : memref<108xf32, #tpu.memory_space<smem>>
    %248 = vector.broadcast %247 : f32 to vector<2x16x16xf32>
    %249 = arith.mulf %248, %242 : vector<2x16x16xf32>
    %250 = arith.addf %235, %249 : vector<2x16x16xf32>
    %c76 = arith.constant 76 : index
    %251 = memref.load %arg2[%c76] : memref<108xf32, #tpu.memory_space<smem>>
    %252 = vector.broadcast %251 : f32 to vector<2x16x16xf32>
    %253 = arith.mulf %252, %242 : vector<2x16x16xf32>
    %254 = arith.addf %239, %253 : vector<2x16x16xf32>
    %255 = vector.extract_strided_slice %240 {offsets = [0, 1, 0, 0], sizes = [2, 1, 16, 16], strides = [1, 1, 1, 1]} : vector<2x4x16x16xf32> to vector<2x1x16x16xf32>
    %256 = vector.shape_cast %255 : vector<2x1x16x16xf32> to vector<2x16x16xf32>
    %c13 = arith.constant 13 : index
    %257 = memref.load %arg2[%c13] : memref<108xf32, #tpu.memory_space<smem>>
    %258 = vector.broadcast %257 : f32 to vector<2x16x16xf32>
    %259 = arith.mulf %258, %256 : vector<2x16x16xf32>
    %260 = arith.addf %246, %259 : vector<2x16x16xf32>
    %c49 = arith.constant 49 : index
    %261 = memref.load %arg2[%c49] : memref<108xf32, #tpu.memory_space<smem>>
    %262 = vector.broadcast %261 : f32 to vector<2x16x16xf32>
    %263 = arith.mulf %262, %256 : vector<2x16x16xf32>
    %264 = arith.addf %250, %263 : vector<2x16x16xf32>
    %c85 = arith.constant 85 : index
    %265 = memref.load %arg2[%c85] : memref<108xf32, #tpu.memory_space<smem>>
    %266 = vector.broadcast %265 : f32 to vector<2x16x16xf32>
    %267 = arith.mulf %266, %256 : vector<2x16x16xf32>
    %268 = arith.addf %254, %267 : vector<2x16x16xf32>
    %269 = vector.extract_strided_slice %240 {offsets = [0, 2, 0, 0], sizes = [2, 1, 16, 16], strides = [1, 1, 1, 1]} : vector<2x4x16x16xf32> to vector<2x1x16x16xf32>
    %270 = vector.shape_cast %269 : vector<2x1x16x16xf32> to vector<2x16x16xf32>
    %c22 = arith.constant 22 : index
    %271 = memref.load %arg2[%c22] : memref<108xf32, #tpu.memory_space<smem>>
    %272 = vector.broadcast %271 : f32 to vector<2x16x16xf32>
    %273 = arith.mulf %272, %270 : vector<2x16x16xf32>
    %274 = arith.addf %260, %273 : vector<2x16x16xf32>
    %c58 = arith.constant 58 : index
    %275 = memref.load %arg2[%c58] : memref<108xf32, #tpu.memory_space<smem>>
    %276 = vector.broadcast %275 : f32 to vector<2x16x16xf32>
    %277 = arith.mulf %276, %270 : vector<2x16x16xf32>
    %278 = arith.addf %264, %277 : vector<2x16x16xf32>
    %c94 = arith.constant 94 : index
    %279 = memref.load %arg2[%c94] : memref<108xf32, #tpu.memory_space<smem>>
    %280 = vector.broadcast %279 : f32 to vector<2x16x16xf32>
    %281 = arith.mulf %280, %270 : vector<2x16x16xf32>
    %282 = arith.addf %268, %281 : vector<2x16x16xf32>
    %283 = vector.extract_strided_slice %240 {offsets = [0, 3, 0, 0], sizes = [2, 1, 16, 16], strides = [1, 1, 1, 1]} : vector<2x4x16x16xf32> to vector<2x1x16x16xf32>
    %284 = vector.shape_cast %283 : vector<2x1x16x16xf32> to vector<2x16x16xf32>
    %c31 = arith.constant 31 : index
    %285 = memref.load %arg2[%c31] : memref<108xf32, #tpu.memory_space<smem>>
    %286 = vector.broadcast %285 : f32 to vector<2x16x16xf32>
    %287 = arith.mulf %286, %284 : vector<2x16x16xf32>
    %288 = arith.addf %274, %287 : vector<2x16x16xf32>
    %c67 = arith.constant 67 : index
    %289 = memref.load %arg2[%c67] : memref<108xf32, #tpu.memory_space<smem>>
    %290 = vector.broadcast %289 : f32 to vector<2x16x16xf32>
    %291 = arith.mulf %290, %284 : vector<2x16x16xf32>
    %292 = arith.addf %278, %291 : vector<2x16x16xf32>
    %c103 = arith.constant 103 : index
    %293 = memref.load %arg2[%c103] : memref<108xf32, #tpu.memory_space<smem>>
    %294 = vector.broadcast %293 : f32 to vector<2x16x16xf32>
    %295 = arith.mulf %294, %284 : vector<2x16x16xf32>
    %296 = arith.addf %282, %295 : vector<2x16x16xf32>
    %c0_43 = arith.constant 0 : index
    %c0_44 = arith.constant 0 : index
    %c1_45 = arith.constant 1 : index
    %c2_46 = arith.constant 2 : index
    %297 = vector.load %arg5[%c0_43, %c0_44, %c1_45, %c2_46] : memref<2x4x18x18xf32, #tpu.memory_space<vmem>>, vector<2x4x16x16xf32>
    %298 = vector.extract_strided_slice %297 {offsets = [0, 0, 0, 0], sizes = [2, 1, 16, 16], strides = [1, 1, 1, 1]} : vector<2x4x16x16xf32> to vector<2x1x16x16xf32>
    %299 = vector.shape_cast %298 : vector<2x1x16x16xf32> to vector<2x16x16xf32>
    %c5 = arith.constant 5 : index
    %300 = memref.load %arg2[%c5] : memref<108xf32, #tpu.memory_space<smem>>
    %301 = vector.broadcast %300 : f32 to vector<2x16x16xf32>
    %302 = arith.mulf %301, %299 : vector<2x16x16xf32>
    %303 = arith.addf %288, %302 : vector<2x16x16xf32>
    %c41 = arith.constant 41 : index
    %304 = memref.load %arg2[%c41] : memref<108xf32, #tpu.memory_space<smem>>
    %305 = vector.broadcast %304 : f32 to vector<2x16x16xf32>
    %306 = arith.mulf %305, %299 : vector<2x16x16xf32>
    %307 = arith.addf %292, %306 : vector<2x16x16xf32>
    %c77 = arith.constant 77 : index
    %308 = memref.load %arg2[%c77] : memref<108xf32, #tpu.memory_space<smem>>
    %309 = vector.broadcast %308 : f32 to vector<2x16x16xf32>
    %310 = arith.mulf %309, %299 : vector<2x16x16xf32>
    %311 = arith.addf %296, %310 : vector<2x16x16xf32>
    %312 = vector.extract_strided_slice %297 {offsets = [0, 1, 0, 0], sizes = [2, 1, 16, 16], strides = [1, 1, 1, 1]} : vector<2x4x16x16xf32> to vector<2x1x16x16xf32>
    %313 = vector.shape_cast %312 : vector<2x1x16x16xf32> to vector<2x16x16xf32>
    %c14 = arith.constant 14 : index
    %314 = memref.load %arg2[%c14] : memref<108xf32, #tpu.memory_space<smem>>
    %315 = vector.broadcast %314 : f32 to vector<2x16x16xf32>
    %316 = arith.mulf %315, %313 : vector<2x16x16xf32>
    %317 = arith.addf %303, %316 : vector<2x16x16xf32>
    %c50 = arith.constant 50 : index
    %318 = memref.load %arg2[%c50] : memref<108xf32, #tpu.memory_space<smem>>
    %319 = vector.broadcast %318 : f32 to vector<2x16x16xf32>
    %320 = arith.mulf %319, %313 : vector<2x16x16xf32>
    %321 = arith.addf %307, %320 : vector<2x16x16xf32>
    %c86 = arith.constant 86 : index
    %322 = memref.load %arg2[%c86] : memref<108xf32, #tpu.memory_space<smem>>
    %323 = vector.broadcast %322 : f32 to vector<2x16x16xf32>
    %324 = arith.mulf %323, %313 : vector<2x16x16xf32>
    %325 = arith.addf %311, %324 : vector<2x16x16xf32>
    %326 = vector.extract_strided_slice %297 {offsets = [0, 2, 0, 0], sizes = [2, 1, 16, 16], strides = [1, 1, 1, 1]} : vector<2x4x16x16xf32> to vector<2x1x16x16xf32>
    %327 = vector.shape_cast %326 : vector<2x1x16x16xf32> to vector<2x16x16xf32>
    %c23 = arith.constant 23 : index
    %328 = memref.load %arg2[%c23] : memref<108xf32, #tpu.memory_space<smem>>
    %329 = vector.broadcast %328 : f32 to vector<2x16x16xf32>
    %330 = arith.mulf %329, %327 : vector<2x16x16xf32>
    %331 = arith.addf %317, %330 : vector<2x16x16xf32>
    %c59 = arith.constant 59 : index
    %332 = memref.load %arg2[%c59] : memref<108xf32, #tpu.memory_space<smem>>
    %333 = vector.broadcast %332 : f32 to vector<2x16x16xf32>
    %334 = arith.mulf %333, %327 : vector<2x16x16xf32>
    %335 = arith.addf %321, %334 : vector<2x16x16xf32>
    %c95 = arith.constant 95 : index
    %336 = memref.load %arg2[%c95] : memref<108xf32, #tpu.memory_space<smem>>
    %337 = vector.broadcast %336 : f32 to vector<2x16x16xf32>
    %338 = arith.mulf %337, %327 : vector<2x16x16xf32>
    %339 = arith.addf %325, %338 : vector<2x16x16xf32>
    %340 = vector.extract_strided_slice %297 {offsets = [0, 3, 0, 0], sizes = [2, 1, 16, 16], strides = [1, 1, 1, 1]} : vector<2x4x16x16xf32> to vector<2x1x16x16xf32>
    %341 = vector.shape_cast %340 : vector<2x1x16x16xf32> to vector<2x16x16xf32>
    %c32 = arith.constant 32 : index
    %342 = memref.load %arg2[%c32] : memref<108xf32, #tpu.memory_space<smem>>
    %343 = vector.broadcast %342 : f32 to vector<2x16x16xf32>
    %344 = arith.mulf %343, %341 : vector<2x16x16xf32>
    %345 = arith.addf %331, %344 : vector<2x16x16xf32>
    %c68 = arith.constant 68 : index
    %346 = memref.load %arg2[%c68] : memref<108xf32, #tpu.memory_space<smem>>
    %347 = vector.broadcast %346 : f32 to vector<2x16x16xf32>
    %348 = arith.mulf %347, %341 : vector<2x16x16xf32>
    %349 = arith.addf %335, %348 : vector<2x16x16xf32>
    %c104 = arith.constant 104 : index
    %350 = memref.load %arg2[%c104] : memref<108xf32, #tpu.memory_space<smem>>
    %351 = vector.broadcast %350 : f32 to vector<2x16x16xf32>
    %352 = arith.mulf %351, %341 : vector<2x16x16xf32>
    %353 = arith.addf %339, %352 : vector<2x16x16xf32>
    %c0_47 = arith.constant 0 : index
    %c0_48 = arith.constant 0 : index
    %c2_49 = arith.constant 2 : index
    %c0_50 = arith.constant 0 : index
    %354 = vector.load %arg5[%c0_47, %c0_48, %c2_49, %c0_50] : memref<2x4x18x18xf32, #tpu.memory_space<vmem>>, vector<2x4x16x16xf32>
    %355 = vector.extract_strided_slice %354 {offsets = [0, 0, 0, 0], sizes = [2, 1, 16, 16], strides = [1, 1, 1, 1]} : vector<2x4x16x16xf32> to vector<2x1x16x16xf32>
    %356 = vector.shape_cast %355 : vector<2x1x16x16xf32> to vector<2x16x16xf32>
    %c6 = arith.constant 6 : index
    %357 = memref.load %arg2[%c6] : memref<108xf32, #tpu.memory_space<smem>>
    %358 = vector.broadcast %357 : f32 to vector<2x16x16xf32>
    %359 = arith.mulf %358, %356 : vector<2x16x16xf32>
    %360 = arith.addf %345, %359 : vector<2x16x16xf32>
    %c42 = arith.constant 42 : index
    %361 = memref.load %arg2[%c42] : memref<108xf32, #tpu.memory_space<smem>>
    %362 = vector.broadcast %361 : f32 to vector<2x16x16xf32>
    %363 = arith.mulf %362, %356 : vector<2x16x16xf32>
    %364 = arith.addf %349, %363 : vector<2x16x16xf32>
    %c78 = arith.constant 78 : index
    %365 = memref.load %arg2[%c78] : memref<108xf32, #tpu.memory_space<smem>>
    %366 = vector.broadcast %365 : f32 to vector<2x16x16xf32>
    %367 = arith.mulf %366, %356 : vector<2x16x16xf32>
    %368 = arith.addf %353, %367 : vector<2x16x16xf32>
    %369 = vector.extract_strided_slice %354 {offsets = [0, 1, 0, 0], sizes = [2, 1, 16, 16], strides = [1, 1, 1, 1]} : vector<2x4x16x16xf32> to vector<2x1x16x16xf32>
    %370 = vector.shape_cast %369 : vector<2x1x16x16xf32> to vector<2x16x16xf32>
    %c15 = arith.constant 15 : index
    %371 = memref.load %arg2[%c15] : memref<108xf32, #tpu.memory_space<smem>>
    %372 = vector.broadcast %371 : f32 to vector<2x16x16xf32>
    %373 = arith.mulf %372, %370 : vector<2x16x16xf32>
    %374 = arith.addf %360, %373 : vector<2x16x16xf32>
    %c51 = arith.constant 51 : index
    %375 = memref.load %arg2[%c51] : memref<108xf32, #tpu.memory_space<smem>>
    %376 = vector.broadcast %375 : f32 to vector<2x16x16xf32>
    %377 = arith.mulf %376, %370 : vector<2x16x16xf32>
    %378 = arith.addf %364, %377 : vector<2x16x16xf32>
    %c87 = arith.constant 87 : index
    %379 = memref.load %arg2[%c87] : memref<108xf32, #tpu.memory_space<smem>>
    %380 = vector.broadcast %379 : f32 to vector<2x16x16xf32>
    %381 = arith.mulf %380, %370 : vector<2x16x16xf32>
    %382 = arith.addf %368, %381 : vector<2x16x16xf32>
    %383 = vector.extract_strided_slice %354 {offsets = [0, 2, 0, 0], sizes = [2, 1, 16, 16], strides = [1, 1, 1, 1]} : vector<2x4x16x16xf32> to vector<2x1x16x16xf32>
    %384 = vector.shape_cast %383 : vector<2x1x16x16xf32> to vector<2x16x16xf32>
    %c24 = arith.constant 24 : index
    %385 = memref.load %arg2[%c24] : memref<108xf32, #tpu.memory_space<smem>>
    %386 = vector.broadcast %385 : f32 to vector<2x16x16xf32>
    %387 = arith.mulf %386, %384 : vector<2x16x16xf32>
    %388 = arith.addf %374, %387 : vector<2x16x16xf32>
    %c60 = arith.constant 60 : index
    %389 = memref.load %arg2[%c60] : memref<108xf32, #tpu.memory_space<smem>>
    %390 = vector.broadcast %389 : f32 to vector<2x16x16xf32>
    %391 = arith.mulf %390, %384 : vector<2x16x16xf32>
    %392 = arith.addf %378, %391 : vector<2x16x16xf32>
    %c96 = arith.constant 96 : index
    %393 = memref.load %arg2[%c96] : memref<108xf32, #tpu.memory_space<smem>>
    %394 = vector.broadcast %393 : f32 to vector<2x16x16xf32>
    %395 = arith.mulf %394, %384 : vector<2x16x16xf32>
    %396 = arith.addf %382, %395 : vector<2x16x16xf32>
    %397 = vector.extract_strided_slice %354 {offsets = [0, 3, 0, 0], sizes = [2, 1, 16, 16], strides = [1, 1, 1, 1]} : vector<2x4x16x16xf32> to vector<2x1x16x16xf32>
    %398 = vector.shape_cast %397 : vector<2x1x16x16xf32> to vector<2x16x16xf32>
    %c33 = arith.constant 33 : index
    %399 = memref.load %arg2[%c33] : memref<108xf32, #tpu.memory_space<smem>>
    %400 = vector.broadcast %399 : f32 to vector<2x16x16xf32>
    %401 = arith.mulf %400, %398 : vector<2x16x16xf32>
    %402 = arith.addf %388, %401 : vector<2x16x16xf32>
    %c69 = arith.constant 69 : index
    %403 = memref.load %arg2[%c69] : memref<108xf32, #tpu.memory_space<smem>>
    %404 = vector.broadcast %403 : f32 to vector<2x16x16xf32>
    %405 = arith.mulf %404, %398 : vector<2x16x16xf32>
    %406 = arith.addf %392, %405 : vector<2x16x16xf32>
    %c105 = arith.constant 105 : index
    %407 = memref.load %arg2[%c105] : memref<108xf32, #tpu.memory_space<smem>>
    %408 = vector.broadcast %407 : f32 to vector<2x16x16xf32>
    %409 = arith.mulf %408, %398 : vector<2x16x16xf32>
    %410 = arith.addf %396, %409 : vector<2x16x16xf32>
    %c0_51 = arith.constant 0 : index
    %c0_52 = arith.constant 0 : index
    %c2_53 = arith.constant 2 : index
    %c1_54 = arith.constant 1 : index
    %411 = vector.load %arg5[%c0_51, %c0_52, %c2_53, %c1_54] : memref<2x4x18x18xf32, #tpu.memory_space<vmem>>, vector<2x4x16x16xf32>
    %412 = vector.extract_strided_slice %411 {offsets = [0, 0, 0, 0], sizes = [2, 1, 16, 16], strides = [1, 1, 1, 1]} : vector<2x4x16x16xf32> to vector<2x1x16x16xf32>
    %413 = vector.shape_cast %412 : vector<2x1x16x16xf32> to vector<2x16x16xf32>
    %c7 = arith.constant 7 : index
    %414 = memref.load %arg2[%c7] : memref<108xf32, #tpu.memory_space<smem>>
    %415 = vector.broadcast %414 : f32 to vector<2x16x16xf32>
    %416 = arith.mulf %415, %413 : vector<2x16x16xf32>
    %417 = arith.addf %402, %416 : vector<2x16x16xf32>
    %c43 = arith.constant 43 : index
    %418 = memref.load %arg2[%c43] : memref<108xf32, #tpu.memory_space<smem>>
    %419 = vector.broadcast %418 : f32 to vector<2x16x16xf32>
    %420 = arith.mulf %419, %413 : vector<2x16x16xf32>
    %421 = arith.addf %406, %420 : vector<2x16x16xf32>
    %c79 = arith.constant 79 : index
    %422 = memref.load %arg2[%c79] : memref<108xf32, #tpu.memory_space<smem>>
    %423 = vector.broadcast %422 : f32 to vector<2x16x16xf32>
    %424 = arith.mulf %423, %413 : vector<2x16x16xf32>
    %425 = arith.addf %410, %424 : vector<2x16x16xf32>
    %426 = vector.extract_strided_slice %411 {offsets = [0, 1, 0, 0], sizes = [2, 1, 16, 16], strides = [1, 1, 1, 1]} : vector<2x4x16x16xf32> to vector<2x1x16x16xf32>
    %427 = vector.shape_cast %426 : vector<2x1x16x16xf32> to vector<2x16x16xf32>
    %c16 = arith.constant 16 : index
    %428 = memref.load %arg2[%c16] : memref<108xf32, #tpu.memory_space<smem>>
    %429 = vector.broadcast %428 : f32 to vector<2x16x16xf32>
    %430 = arith.mulf %429, %427 : vector<2x16x16xf32>
    %431 = arith.addf %417, %430 : vector<2x16x16xf32>
    %c52 = arith.constant 52 : index
    %432 = memref.load %arg2[%c52] : memref<108xf32, #tpu.memory_space<smem>>
    %433 = vector.broadcast %432 : f32 to vector<2x16x16xf32>
    %434 = arith.mulf %433, %427 : vector<2x16x16xf32>
    %435 = arith.addf %421, %434 : vector<2x16x16xf32>
    %c88 = arith.constant 88 : index
    %436 = memref.load %arg2[%c88] : memref<108xf32, #tpu.memory_space<smem>>
    %437 = vector.broadcast %436 : f32 to vector<2x16x16xf32>
    %438 = arith.mulf %437, %427 : vector<2x16x16xf32>
    %439 = arith.addf %425, %438 : vector<2x16x16xf32>
    %440 = vector.extract_strided_slice %411 {offsets = [0, 2, 0, 0], sizes = [2, 1, 16, 16], strides = [1, 1, 1, 1]} : vector<2x4x16x16xf32> to vector<2x1x16x16xf32>
    %441 = vector.shape_cast %440 : vector<2x1x16x16xf32> to vector<2x16x16xf32>
    %c25 = arith.constant 25 : index
    %442 = memref.load %arg2[%c25] : memref<108xf32, #tpu.memory_space<smem>>
    %443 = vector.broadcast %442 : f32 to vector<2x16x16xf32>
    %444 = arith.mulf %443, %441 : vector<2x16x16xf32>
    %445 = arith.addf %431, %444 : vector<2x16x16xf32>
    %c61 = arith.constant 61 : index
    %446 = memref.load %arg2[%c61] : memref<108xf32, #tpu.memory_space<smem>>
    %447 = vector.broadcast %446 : f32 to vector<2x16x16xf32>
    %448 = arith.mulf %447, %441 : vector<2x16x16xf32>
    %449 = arith.addf %435, %448 : vector<2x16x16xf32>
    %c97 = arith.constant 97 : index
    %450 = memref.load %arg2[%c97] : memref<108xf32, #tpu.memory_space<smem>>
    %451 = vector.broadcast %450 : f32 to vector<2x16x16xf32>
    %452 = arith.mulf %451, %441 : vector<2x16x16xf32>
    %453 = arith.addf %439, %452 : vector<2x16x16xf32>
    %454 = vector.extract_strided_slice %411 {offsets = [0, 3, 0, 0], sizes = [2, 1, 16, 16], strides = [1, 1, 1, 1]} : vector<2x4x16x16xf32> to vector<2x1x16x16xf32>
    %455 = vector.shape_cast %454 : vector<2x1x16x16xf32> to vector<2x16x16xf32>
    %c34 = arith.constant 34 : index
    %456 = memref.load %arg2[%c34] : memref<108xf32, #tpu.memory_space<smem>>
    %457 = vector.broadcast %456 : f32 to vector<2x16x16xf32>
    %458 = arith.mulf %457, %455 : vector<2x16x16xf32>
    %459 = arith.addf %445, %458 : vector<2x16x16xf32>
    %c70 = arith.constant 70 : index
    %460 = memref.load %arg2[%c70] : memref<108xf32, #tpu.memory_space<smem>>
    %461 = vector.broadcast %460 : f32 to vector<2x16x16xf32>
    %462 = arith.mulf %461, %455 : vector<2x16x16xf32>
    %463 = arith.addf %449, %462 : vector<2x16x16xf32>
    %c106 = arith.constant 106 : index
    %464 = memref.load %arg2[%c106] : memref<108xf32, #tpu.memory_space<smem>>
    %465 = vector.broadcast %464 : f32 to vector<2x16x16xf32>
    %466 = arith.mulf %465, %455 : vector<2x16x16xf32>
    %467 = arith.addf %453, %466 : vector<2x16x16xf32>
    %c0_55 = arith.constant 0 : index
    %c0_56 = arith.constant 0 : index
    %c2_57 = arith.constant 2 : index
    %c2_58 = arith.constant 2 : index
    %468 = vector.load %arg5[%c0_55, %c0_56, %c2_57, %c2_58] : memref<2x4x18x18xf32, #tpu.memory_space<vmem>>, vector<2x4x16x16xf32>
    %469 = vector.extract_strided_slice %468 {offsets = [0, 0, 0, 0], sizes = [2, 1, 16, 16], strides = [1, 1, 1, 1]} : vector<2x4x16x16xf32> to vector<2x1x16x16xf32>
    %470 = vector.shape_cast %469 : vector<2x1x16x16xf32> to vector<2x16x16xf32>
    %c8 = arith.constant 8 : index
    %471 = memref.load %arg2[%c8] : memref<108xf32, #tpu.memory_space<smem>>
    %472 = vector.broadcast %471 : f32 to vector<2x16x16xf32>
    %473 = arith.mulf %472, %470 : vector<2x16x16xf32>
    %474 = arith.addf %459, %473 : vector<2x16x16xf32>
    %c44 = arith.constant 44 : index
    %475 = memref.load %arg2[%c44] : memref<108xf32, #tpu.memory_space<smem>>
    %476 = vector.broadcast %475 : f32 to vector<2x16x16xf32>
    %477 = arith.mulf %476, %470 : vector<2x16x16xf32>
    %478 = arith.addf %463, %477 : vector<2x16x16xf32>
    %c80 = arith.constant 80 : index
    %479 = memref.load %arg2[%c80] : memref<108xf32, #tpu.memory_space<smem>>
    %480 = vector.broadcast %479 : f32 to vector<2x16x16xf32>
    %481 = arith.mulf %480, %470 : vector<2x16x16xf32>
    %482 = arith.addf %467, %481 : vector<2x16x16xf32>
    %483 = vector.extract_strided_slice %468 {offsets = [0, 1, 0, 0], sizes = [2, 1, 16, 16], strides = [1, 1, 1, 1]} : vector<2x4x16x16xf32> to vector<2x1x16x16xf32>
    %484 = vector.shape_cast %483 : vector<2x1x16x16xf32> to vector<2x16x16xf32>
    %c17 = arith.constant 17 : index
    %485 = memref.load %arg2[%c17] : memref<108xf32, #tpu.memory_space<smem>>
    %486 = vector.broadcast %485 : f32 to vector<2x16x16xf32>
    %487 = arith.mulf %486, %484 : vector<2x16x16xf32>
    %488 = arith.addf %474, %487 : vector<2x16x16xf32>
    %c53 = arith.constant 53 : index
    %489 = memref.load %arg2[%c53] : memref<108xf32, #tpu.memory_space<smem>>
    %490 = vector.broadcast %489 : f32 to vector<2x16x16xf32>
    %491 = arith.mulf %490, %484 : vector<2x16x16xf32>
    %492 = arith.addf %478, %491 : vector<2x16x16xf32>
    %c89 = arith.constant 89 : index
    %493 = memref.load %arg2[%c89] : memref<108xf32, #tpu.memory_space<smem>>
    %494 = vector.broadcast %493 : f32 to vector<2x16x16xf32>
    %495 = arith.mulf %494, %484 : vector<2x16x16xf32>
    %496 = arith.addf %482, %495 : vector<2x16x16xf32>
    %497 = vector.extract_strided_slice %468 {offsets = [0, 2, 0, 0], sizes = [2, 1, 16, 16], strides = [1, 1, 1, 1]} : vector<2x4x16x16xf32> to vector<2x1x16x16xf32>
    %498 = vector.shape_cast %497 : vector<2x1x16x16xf32> to vector<2x16x16xf32>
    %c26 = arith.constant 26 : index
    %499 = memref.load %arg2[%c26] : memref<108xf32, #tpu.memory_space<smem>>
    %500 = vector.broadcast %499 : f32 to vector<2x16x16xf32>
    %501 = arith.mulf %500, %498 : vector<2x16x16xf32>
    %502 = arith.addf %488, %501 : vector<2x16x16xf32>
    %c62 = arith.constant 62 : index
    %503 = memref.load %arg2[%c62] : memref<108xf32, #tpu.memory_space<smem>>
    %504 = vector.broadcast %503 : f32 to vector<2x16x16xf32>
    %505 = arith.mulf %504, %498 : vector<2x16x16xf32>
    %506 = arith.addf %492, %505 : vector<2x16x16xf32>
    %c98 = arith.constant 98 : index
    %507 = memref.load %arg2[%c98] : memref<108xf32, #tpu.memory_space<smem>>
    %508 = vector.broadcast %507 : f32 to vector<2x16x16xf32>
    %509 = arith.mulf %508, %498 : vector<2x16x16xf32>
    %510 = arith.addf %496, %509 : vector<2x16x16xf32>
    %511 = vector.extract_strided_slice %468 {offsets = [0, 3, 0, 0], sizes = [2, 1, 16, 16], strides = [1, 1, 1, 1]} : vector<2x4x16x16xf32> to vector<2x1x16x16xf32>
    %512 = vector.shape_cast %511 : vector<2x1x16x16xf32> to vector<2x16x16xf32>
    %c35 = arith.constant 35 : index
    %513 = memref.load %arg2[%c35] : memref<108xf32, #tpu.memory_space<smem>>
    %514 = vector.broadcast %513 : f32 to vector<2x16x16xf32>
    %515 = arith.mulf %514, %512 : vector<2x16x16xf32>
    %516 = arith.addf %502, %515 : vector<2x16x16xf32>
    %c71 = arith.constant 71 : index
    %517 = memref.load %arg2[%c71] : memref<108xf32, #tpu.memory_space<smem>>
    %518 = vector.broadcast %517 : f32 to vector<2x16x16xf32>
    %519 = arith.mulf %518, %512 : vector<2x16x16xf32>
    %520 = arith.addf %506, %519 : vector<2x16x16xf32>
    %c107 = arith.constant 107 : index
    %521 = memref.load %arg2[%c107] : memref<108xf32, #tpu.memory_space<smem>>
    %522 = vector.broadcast %521 : f32 to vector<2x16x16xf32>
    %523 = arith.mulf %522, %512 : vector<2x16x16xf32>
    %524 = arith.addf %510, %523 : vector<2x16x16xf32>
    %c0_59 = arith.constant 0 : index
    %c0_60 = arith.constant 0 : index
    %c0_61 = arith.constant 0 : index
    %c0_62 = arith.constant 0 : index
    %525 = vector.load %arg4[%c0_59, %c0_60, %c0_61, %c0_62] : memref<2x3x16x16xf32, #tpu.memory_space<vmem>>, vector<2x1x16x16xf32>
    %526 = vector.shape_cast %525 : vector<2x1x16x16xf32> to vector<2x16x16xf32>
    %527 = vector.shape_cast %516 : vector<2x16x16xf32> to vector<2x1x16x16xf32>
    tpu.vector_store %arg4[%c0_59, %c0_60, %c0_61, %c0_62], %527 {strides = array<i32>} : memref<2x3x16x16xf32, #tpu.memory_space<vmem>>, vector<2x1x16x16xf32>,
    %c0_63 = arith.constant 0 : index
    %c1_64 = arith.constant 1 : index
    %c0_65 = arith.constant 0 : index
    %c0_66 = arith.constant 0 : index
    %528 = vector.load %arg4[%c0_63, %c1_64, %c0_65, %c0_66] : memref<2x3x16x16xf32, #tpu.memory_space<vmem>>, vector<2x1x16x16xf32>
    %529 = vector.shape_cast %528 : vector<2x1x16x16xf32> to vector<2x16x16xf32>
    %530 = vector.shape_cast %520 : vector<2x16x16xf32> to vector<2x1x16x16xf32>
    tpu.vector_store %arg4[%c0_63, %c1_64, %c0_65, %c0_66], %530 {strides = array<i32>} : memref<2x3x16x16xf32, #tpu.memory_space<vmem>>, vector<2x1x16x16xf32>,
    %c0_67 = arith.constant 0 : index
    %c2_68 = arith.constant 2 : index
    %c0_69 = arith.constant 0 : index
    %c0_70 = arith.constant 0 : index
    %531 = vector.load %arg4[%c0_67, %c2_68, %c0_69, %c0_70] : memref<2x3x16x16xf32, #tpu.memory_space<vmem>>, vector<2x1x16x16xf32>
    %532 = vector.shape_cast %531 : vector<2x1x16x16xf32> to vector<2x16x16xf32>
    %533 = vector.shape_cast %524 : vector<2x16x16xf32> to vector<2x1x16x16xf32>
    tpu.vector_store %arg4[%c0_67, %c2_68, %c0_69, %c0_70], %533 {strides = array<i32>} : memref<2x3x16x16xf32, #tpu.memory_space<vmem>>, vector<2x1x16x16xf32>,
    return
  }
}

</mosaic_0001>

<bundles_post_ra>
// kernel: generator_forward.1
= control target key start
LH: loop header
LB: loop body
LE: loop exit
PB: predicated region body
PF: predicated region fallthrough
CT: control target
= control target key end

     0   :  { %9 = vsyncpa [#allocation5], 0  ;;  %s4894_s0 = inlined_call_operand.vmem [shape: f32[2,3,16,16], index: 0, kind: input, shape index: {}]   ;;  %s4895_s1 = inlined_call_operand.vmem [shape: f32[2,1,16,16], index: 1, kind: input, shape index: {}]   ;;  %s4896_s2 = inlined_call_operand.vmem [shape: f32[108], index: 2, kind: input, shape index: {}]   ;;  %s4897_s3 = inlined_call_operand.vmem [shape: f32[3], index: 3, kind: input, shape index: {}]   ;;  %s4898_s4 = inlined_call_operand.hbm [shape: f32[2,3,16,16], index: 4, kind: output, shape index: {}]  }
   0x1   :  { %10 = vsyncpa [#allocation7], 0 }
   0x2   :  { %11 = vsyncpa [#allocation4], 0  ;;  %s22_s17 = sshll.u32 %s4896_s2, 4  ;;  %s32_s20 = sshll.u32 %s4897_s3, 4  ;;  %s23_s17 = int_to_ptr.vmem [resolvable:$true] %s22_s17  ;;  %s33_s20 = int_to_ptr.vmem [resolvable:$true] %s32_s20 }
   0x3   :  { %s2604_s21 = scalar_lea.vmem %s23_s17, 16  ;;  %p2609_p1 = scmp.lt.s32.totalorder %s23_s17, %s23_s17 }
   0x4   :  { %p2605_p0 = scmp.ne.s32.totalorder %s23_s17, %s2604_s21  ;;  %p2610_p2 = scmp.lt.s32.totalorder %s2604_s21, %s2604_s21 }
   0x6   :  { %p2611_p3 = por %p2610_p2, %p2609_p1 }
   0x8   :  { %p2612_p4 = pnand %p2611_p3, %p2605_p0 }
   0xa   :  { %2615 = shalt.err (!%p2612_p4)
}
   0xb   :  { %s2656_s22 = smov [#allocation3]   ;;  %s2616_s23 = scalar_lea.vmem %s33_s20, 16 }
   0xc   :  { %25 = dma.vmem_to_smem %s23_s17, 16, %s2656_s22, [#allocation5]  }
   0xd   :  { %p2617_p5 = scmp.ne.s32.totalorder %s33_s20, %s2616_s23  ;;  %p2621_p6 = scmp.lt.s32.totalorder %s33_s20, %s33_s20 }
   0xe   :  { %p2622_p7 = scmp.lt.s32.totalorder %s2616_s23, %s2616_s23 }
  0x10   :  { %p2623_p8 = por %p2622_p7, %p2621_p6 }
  0x12   :  { %p2624_p9 = pnand %p2623_p8, %p2617_p5 }
  0x14   :  { %2627 = shalt.err (!%p2624_p9)
}
  0x15   :  { %s2657_s2 = smov [#allocation6]  }
  0x16   :  { %35 = dma.vmem_to_smem %s33_s20, 16, %s2657_s2, [#allocation7]  }
  0x17   :  { %2650 = dma.done.wait [#allocation5], 16  }
  0x18   :  { %2651 = vsyncadd [#allocation5], 4294967280 }
  0x19   :  { %2652 = dma.done.wait [#allocation7], 16  }
  0x1a   :  { %2653 = vsyncadd [#allocation7], 4294967280 }
  0x1b   :  { %42 = sfence }
  0x1c   :  { %v71_v0 = vld [vmem:[%s4894_s0 + $0x10] sm:$0xff]  ;;  %v69_v1 = vld [vmem:[%s4894_s0] sm:$0xff]  ;;  %vm43_vm0 = vcmask 146432   ;;  %s2658_s27 = smov 1   ;;  %vm46_vm1 = vcmask 140288   ;;  %v72_v2 = vld [vmem:[%s4894_s0 + $0x18] sm:$0xff] }
  0x1d   :  { %97 = vrot.lane.b32.xlu1 %v71_v0, %s2658_s27  ;;  %93 = vrot.lane.b32.xlu0 %v69_v1, %s2658_s27  ;;  %v70_v3 = vld [vmem:[%s4894_s0 + $0x8] sm:$0xff]  ;;  %v2659_v4 = vmov 0.0   ;;  %v73_v6 = vld [vmem:[%s4894_s0 + $0x20] sm:$0xff]  ;;  %vm129_vm2 = vcmask 138248   ;;  %s2499_s28 = sld [smem:[#allocation3 + $0x1]]  ;;  %s189_s29 = sld [smem:[#allocation3]] }
  0x1e   :  { %48 = vst.msk [vmem:[#allocation2 + $0x18] sm:$0xff] %vm43_vm0, %v2659_v4  ;;  %49 = vst.msk [vmem:[#allocation2 + $0x20] sm:$0xff] %vm43_vm0, %v2659_v4  ;;  %v74_v5 = vld [vmem:[%s4894_s0 + $0x28] sm:$0xff]  ;;  %v76_v7 = vld [vmem:[%s4894_s0 + $0x38] sm:$0xff]  ;;  %s2488_s30 = sld [smem:[#allocation3 + $0x24]]  ;;  %s167_s5 = sld [smem:[#allocation6]] }
  0x1f   :  { %44 = vst.msk [vmem:[#allocation2] sm:$0xff] %vm43_vm0, %v2659_v4  ;;  %45 = vst.msk [vmem:[#allocation2 + $0x8] sm:$0xff] %vm43_vm0, %v2659_v4  ;;  %v75_v8 = vld [vmem:[%s4894_s0 + $0x30] sm:$0xff]  ;;  %v78_v9 = vld [vmem:[%s4894_s0 + $0x48] sm:$0xff]  ;;  %s2486_s6 = sld [smem:[#allocation6 + $0x1]]  ;;  %s2491_s7 = sld [smem:[#allocation3 + $0x2d]] }
  0x20   :  { %51 = vst.msk [vmem:[#allocation2 + $0x30] sm:$0xff] %vm43_vm0, %v2659_v4  ;;  %52 = vst.msk [vmem:[#allocation2 + $0x38] sm:$0xff] %vm43_vm0, %v2659_v4  ;;  %v77_v10 = vld [vmem:[%s4894_s0 + $0x40] sm:$0xff]  ;;  %v80_v11 = vld [vmem:[%s4894_s0 + $0x58] sm:$0xff]  ;;  %s2660_s8 = smov 127   ;;  %s2815_s9 = sld [smem:[#allocation3 + $0x36]] }
  0x21   :  { %54 = vst.msk [vmem:[#allocation2 + $0x48] sm:$0xff] %vm43_vm0, %v2659_v4  ;;  %55 = vst.msk [vmem:[#allocation2 + $0x50] sm:$0xff] %vm43_vm0, %v2659_v4  ;;  %99 = vrot.lane.b32.xlu1 %v72_v2, %s2658_s27  ;;  %95 = vrot.lane.b32.xlu0 %v70_v3, %s2658_s27  ;;  %v79_v12 = vld [vmem:[%s4894_s0 + $0x50] sm:$0xff]  ;;  %v143_v13 = vld [vmem:[%s4895_s1 + $0x8] sm:$0xff]  ;;  %s2817_s10 = sld [smem:[#allocation3 + $0x25]]  ;;  %s2861_s11 = sld [smem:[#allocation3 + $0x49]] }
  0x22   :  { %57 = vst.msk [vmem:[#allocation2 + $0x60] sm:$0xff] %vm43_vm0, %v2659_v4  ;;  %58 = vst.msk [vmem:[#allocation2 + $0x68] sm:$0xff] %vm43_vm0, %v2659_v4  ;;  %v142_v14 = vld [vmem:[%s4895_s1] sm:$0xff]  ;;  %v145_v15 = vld [vmem:[%s4895_s1 + $0x18] sm:$0xff]  ;;  %s2867_s12 = sld [smem:[#allocation3 + $0xa]]  ;;  %s2869_s13 = sld [smem:[#allocation3 + $0x1b]] }
  0x23   :  { %60 = vst.msk [vmem:[#allocation2 + $0x78] sm:$0xff] %vm43_vm0, %v2659_v4  ;;  %61 = vst.msk [vmem:[#allocation2 + $0x80] sm:$0xff] %vm43_vm0, %v2659_v4  ;;  %v144_v16 = vld [vmem:[%s4895_s1 + $0x10] sm:$0xff]  ;;  %s2490_s1 = sld [smem:[#allocation3 + $0x9]]  ;;  %v310_v21 = vstv %s2499_s28  ;;  %v2790_v25 = vstv %s189_s29  ;;  %s2875_s14 = sld [smem:[#allocation3 + $0x2e]]  ;;  %vm2453_vm3 = vcmask 130048  }
  0x24   :  { %63 = vst.msk [vmem:[#allocation2 + $0x90] sm:$0xff] %vm43_vm0, %v2659_v4  ;;  %64 = vst.msk [vmem:[#allocation2 + $0x98] sm:$0xff] %vm43_vm0, %v2659_v4  ;;  %v2795_v27 = vstv %s2488_s30  ;;  %v2802_v32 = vstv %s167_s5  ;;  %s2879_s15 = sld [smem:[#allocation3 + $0x3f]]  ;;  %s2890_s16 = sld [smem:[#allocation3 + $0x48]] }
  0x25   :  { %66 = vst.msk [vmem:[#allocation2 + $0xa8] sm:$0xff] %vm43_vm0, %v2659_v4  ;;  %67 = vst.msk [vmem:[#allocation2 + $0xb0] sm:$0xff] %vm43_vm0, %v2659_v4  ;;  %103 = vrot.lane.b32.xlu1 %v74_v5, %s2658_s27  ;;  %101 = vrot.lane.b32.xlu0 %v73_v6, %s2658_s27  ;;  %v2813_v37 = vstv %s2486_s6  ;;  %v2825_v41 = vstv %s2491_s7  ;;  %s2894_s17 = sld [smem:[#allocation3 + $0x51]]  ;;  %s2904_s18 = sld [smem:[#allocation3 + $0x5a]] }
  0x26   :  { %50 = vst.msk [vmem:[#allocation2 + $0x28] sm:$0x3] %vm46_vm1, %v2659_v4  ;;  %47 = vst.msk [vmem:[#allocation2 + $0x10] sm:$0x3] %vm46_vm1, %v2659_v4  ;;  %v2858_v63 = vstv %s2815_s9  ;;  %s2924_s19 = sld [smem:[#allocation3 + $0x63]]  ;;  %s2953_s20 = sld [smem:[#allocation6 + $0x2]] }
  0x27   :  { %53 = vst.msk [vmem:[#allocation2 + $0x40] sm:$0x3] %vm46_vm1, %v2659_v4  ;;  %56 = vst.msk [vmem:[#allocation2 + $0x58] sm:$0x3] %vm46_vm1, %v2659_v4  ;;  %v336_v0 = vstv %s2817_s10  ;;  %s2504_s21 = sld [smem:[#allocation3 + $0x52]]  ;;  %s2505_s22 = sld [smem:[#allocation3 + $0x13]] }
  0x28   :  { %59 = vst.msk [vmem:[#allocation2 + $0x70] sm:$0x3] %vm46_vm1, %v2659_v4  ;;  %62 = vst.msk [vmem:[#allocation2 + $0x88] sm:$0x3] %vm46_vm1, %v2659_v4  ;;  %s2506_s23 = sld [smem:[#allocation3 + $0x37]]  ;;  %s2507_s2 = sld [smem:[#allocation3 + $0x5b]] }
  0x29   :  { %65 = vst.msk [vmem:[#allocation2 + $0xa0] sm:$0x3] %vm46_vm1, %v2659_v4  ;;  %68 = vst.msk [vmem:[#allocation2 + $0xb8] sm:$0x3] %vm46_vm1, %v2659_v4  ;;  %107 = vrot.lane.b32.xlu1 %v76_v7, %s2658_s27  ;;  %105 = vrot.lane.b32.xlu0 %v75_v8, %s2658_s27  ;;  %v2811_v36 = vstv %s2490_s1  ;;  %s2508_s3 = sld [smem:[#allocation3 + $0x1c]]  ;;  %s2509_s24 = sld [smem:[#allocation3 + $0x40]] }
  0x2a   :  { %s2510_s25 = sld [smem:[#allocation3 + $0x64]]  ;;  %s2511_s0 = sld [smem:[#allocation3 + $0x2]] }
  0x2b   :  { %s2512_s26 = sld [smem:[#allocation3 + $0x26]]  ;;  %s2661_s28 = smov 126  }
  0x2c   :  { %s2513_s29 = sld [smem:[#allocation3 + $0x4a]]  ;;  %s2514_s30 = sld [smem:[#allocation3 + $0xb]] }
  0x2d   :  { %111 = vrot.lane.b32.xlu1 %v78_v9, %s2658_s27  ;;  %109 = vrot.lane.b32.xlu0 %v77_v10, %s2658_s27  ;;  %s2515_s5 = sld [smem:[#allocation3 + $0x2f]]  ;;  %s2516_s1 = sld [smem:[#allocation3 + $0x53]] }
  0x2e   :  { %s2517_s6 = sld [smem:[#allocation3 + $0x14]]  ;;  %s2520_s9 = sld [smem:[#allocation3 + $0x1d]] }
  0x2f   :  { %s2519_s7 = sld [smem:[#allocation3 + $0x5c]]  ;;  %s2521_s10 = sld [smem:[#allocation3 + $0x41]] }
  0x31   :  { %115 = vrot.lane.b32.xlu1 %v80_v11, %s2658_s27  ;;  %113 = vrot.lane.b32.xlu0 %v79_v12, %s2658_s27 }
  0x35   :  { %152 = vrot.lane.b32.xlu1 %v143_v13, %s2658_s27  ;;  %150 = vrot.lane.b32.xlu0 %v142_v14, %s2658_s27 }
  0x39   :  { %156 = vrot.lane.b32.xlu1 %v145_v15, %s2658_s27  ;;  %154 = vrot.lane.b32.xlu0 %v144_v16, %s2658_s27  ;;  %s2493_s27 = sld [smem:[#allocation3 + $0x12]] }
  0x3f   :  { %v2820_v38 = vstv %s2493_s27  ;;  %s2518_s27 = sld [smem:[#allocation3 + $0x38]] }
  0x8f   :  { %v98_v17 = vpop.permute.xlu1 %97  ;;  %v94_v18 = vpop.permute.xlu0 %93 }
  0x90   :  { %132 = vst.msk [vmem:[#allocation2 + $0x19] sm:$0xff] %vm129_vm2, %v98_v17  ;;  %130 = vst.msk [vmem:[#allocation2 + $0x1] sm:$0xff] %vm129_vm2, %v94_v18 }
  0x93   :  { %v100_v19 = vpop.permute.xlu1 %99  ;;  %v96_v20 = vpop.permute.xlu0 %95 }
  0x94   :  { %133 = vst.msk [vmem:[#allocation2 + $0x21] sm:$0xff] %vm129_vm2, %v100_v19  ;;  %131 = vst.msk [vmem:[#allocation2 + $0x9] sm:$0xff] %vm129_vm2, %v96_v20 }
  0x97   :  { %v104_v22 = vpop.permute.xlu1 %103  ;;  %v102_v23 = vpop.permute.xlu0 %101  ;;  %v2788_v24 = vld [vmem:[#allocation2] sm:$0xff]  ;;  %v2809_v35 = vld [vmem:[#allocation2 + $0x18] sm:$0xff] }
  0x98   :  { %135 = vst.msk [vmem:[#allocation2 + $0x39] sm:$0xff] %vm129_vm2, %v104_v22  ;;  %134 = vst.msk [vmem:[#allocation2 + $0x31] sm:$0xff] %vm129_vm2, %v102_v23  ;;  %v311_v26 = vmul.f32 %v310_v21, %v2788_v24  ;;  %v191_v28 = vmul.f32 %v2790_v25, %v2788_v24  ;;  %v201_v33 = vmul.f32 %v2795_v27, %v2788_v24 }
  0x99   :  { %v221_v45 = vmul.f32 %v2811_v36, %v2809_v35  ;;  %v231_v50 = vmul.f32 %v2825_v41, %v2809_v35  ;;  %v337_v11 = vmul.f32 %v336_v0, %v2788_v24 }
  0x9a   :  { %319 = vrot.lane.b32.xlu0 %v311_v26, %s2660_s8  ;;  %v195_v39 = vadd.f32 %v191_v28, %v2802_v32  ;;  %v205_v46 = vadd.f32 %v201_v33, %v2813_v37 }
  0x9b   :  { %v108_v29 = vpop.permute.xlu1 %107  ;;  %v106_v30 = vpop.permute.xlu0 %105  ;;  %v2800_v31 = vld [vmem:[#allocation2 + $0x8] sm:$0xff]  ;;  %v2834_v47 = vld [vmem:[#allocation2 + $0x20] sm:$0xff] }
  0x9c   :  { %137 = vst.msk [vmem:[#allocation2 + $0x69] sm:$0xff] %vm129_vm2, %v108_v29  ;;  %136 = vst.msk [vmem:[#allocation2 + $0x61] sm:$0xff] %vm129_vm2, %v106_v30  ;;  %v312_v34 = vmul.f32 %v310_v21, %v2800_v31  ;;  %v192_v40 = vmul.f32 %v2790_v25, %v2800_v31  ;;  %v225_v49 = vadd.f32 %v221_v45, %v195_v39  ;;  %v362_v30 = vstv %s2861_s11  ;;  %s2522_s11 = sld [smem:[#allocation3 + $0x65]] }
  0x9d   :  { %v202_v58 = vmul.f32 %v2795_v27, %v2800_v31  ;;  %v235_v59 = vadd.f32 %v231_v50, %v205_v46  ;;  %v222_v62 = vmul.f32 %v2811_v36, %v2834_v47  ;;  %v338_v10 = vmul.f32 %v336_v0, %v2800_v31 }
  0x9e   :  { %321 = vrot.lane.b32.xlu1 %v312_v34, %s2660_s8  ;;  %v196_v52 = vadd.f32 %v192_v40, %v2802_v32  ;;  %v232_v14 = vmul.f32 %v2825_v41, %v2834_v47  ;;  %v364_v50 = vmul.f32 %v362_v30, %v2800_v31 }
  0x9f   :  { %v112_v42 = vpop.permute.xlu1 %111  ;;  %v110_v43 = vpop.permute.xlu0 %109  ;;  %v2827_v44 = vld [vmem:[#allocation2 + $0x30] sm:$0xff]  ;;  %v2840_v51 = vld [vmem:[#allocation2 + $0x38] sm:$0xff]  ;;  %v206_v8 = vadd.f32 %v202_v58, %v2813_v37 }
  0xa0   :  { %139 = vst.msk [vmem:[#allocation2 + $0x81] sm:$0xff] %vm129_vm2, %v112_v42  ;;  %138 = vst.msk [vmem:[#allocation2 + $0x79] sm:$0xff] %vm129_vm2, %v110_v43  ;;  %v251_v48 = vmul.f32 %v2820_v38, %v2827_v44  ;;  %v252_v1 = vmul.f32 %v2820_v38, %v2840_v51  ;;  %v226_v2 = vadd.f32 %v222_v62, %v196_v52  ;;  %v2928_v43 = vstv %s2875_s14  ;;  %s2537_s14 = sld [smem:[#allocation3 + $0x4c]] }
  0xa1   :  { %v261_v9 = vmul.f32 %v2858_v63, %v2827_v44  ;;  %v262_v17 = vmul.f32 %v2858_v63, %v2840_v51  ;;  %v236_v23 = vadd.f32 %v232_v14, %v206_v8  ;;  %v363_v52 = vmul.f32 %v362_v30, %v2788_v24 }
  0xa2   :  { %v2847_v57 = vadd.f32 %v251_v48, %v225_v49  ;;  %v256_v13 = vadd.f32 %v252_v1, %v226_v2  ;;  %v290_v49 = vstv %s2879_s15  ;;  %v2956_v1 = vstv %s2904_s18  ;;  %s2538_s15 = sld [smem:[#allocation3 + $0xd]]  ;;  %s2541_s18 = sld [smem:[#allocation3 + $0x16]] }
  0xa3   :  { %v116_v53 = vpop.permute.xlu1 %115  ;;  %v114_v54 = vpop.permute.xlu0 %113  ;;  %v2843_v55 = vld [vmem:[#allocation2 + $0x68] sm:$0xff]  ;;  %v2845_v56 = vld [vmem:[#allocation2 + $0x60] sm:$0xff]  ;;  %v266_v42 = vadd.f32 %v262_v17, %v236_v23 }
  0xa4   :  { %141 = vst.msk [vmem:[#allocation2 + $0x99] sm:$0xff] %vm129_vm2, %v116_v53  ;;  %140 = vst.msk [vmem:[#allocation2 + $0x91] sm:$0xff] %vm129_vm2, %v114_v54  ;;  %v314_v60 = vmul.f32 %v310_v21, %v2843_v55  ;;  %v313_v61 = vmul.f32 %v310_v21, %v2845_v56  ;;  %v194_v7 = vmul.f32 %v2790_v25, %v2843_v55  ;;  %v2940_v53 = vstv %s2890_s16  ;;  %s2539_s16 = sld [smem:[#allocation3 + $0x31]] }
  0xa5   :  { %v193_v12 = vmul.f32 %v2790_v25, %v2845_v56  ;;  %v265_v25 = vadd.f32 %v261_v9, %v235_v59  ;;  %v340_v26 = vmul.f32 %v336_v0, %v2843_v55  ;;  %v339_v28 = vmul.f32 %v336_v0, %v2845_v56 }
  0xa6   :  { %325 = vrot.lane.b32.xlu1 %v314_v60, %s2660_s8  ;;  %323 = vrot.lane.b32.xlu0 %v313_v61, %s2660_s8  ;;  %v198_v22 = vadd.f32 %v194_v7, %v2802_v32  ;;  %v2947_v60 = vstv %s2894_s17  ;;  %v366_v2 = vmul.f32 %v362_v30, %v2843_v55  ;;  %v203_v14 = vmul.f32 %v2795_v27, %v2845_v56  ;;  %s2540_s17 = sld [smem:[#allocation3 + $0x55]] }
  0xa7   :  { %v153_v3 = vpop.permute.xlu1 %152  ;;  %v151_v4 = vpop.permute.xlu0 %150  ;;  %v2871_v5 = vld [vmem:[#allocation2 + $0x80] sm:$0xff]  ;;  %v2873_v6 = vld [vmem:[#allocation2 + $0x78] sm:$0xff]  ;;  %v197_v29 = vadd.f32 %v193_v12, %v2802_v32  ;;  %v388_v32 = vstv %s2867_s12  ;;  %s2535_s12 = sld [smem:[#allocation3 + $0x4]] }
  0xa8   :  { %164 = vst.msk [vmem:[#allocation2 + $0x51] sm:$0xff] %vm129_vm2, %v153_v3  ;;  %163 = vst.msk [vmem:[#allocation2 + $0x49] sm:$0xff] %vm129_vm2, %v151_v4  ;;  %v224_v15 = vmul.f32 %v2811_v36, %v2871_v5  ;;  %v223_v16 = vmul.f32 %v2811_v36, %v2873_v6  ;;  %v280_v36 = vstv %s2869_s13  ;;  %v234_v59 = vmul.f32 %v2825_v41, %v2871_v5  ;;  %s2536_s13 = sld [smem:[#allocation3 + $0x28]] }
  0xa9   :  { %v389_v3 = vmul.f32 %v388_v32, %v2809_v35 }
  0xaa   :  { %347 = vrot.lane.b32.xlu1 %v338_v10, %s2660_s8  ;;  %345 = vrot.lane.b32.xlu0 %v337_v11, %s2660_s8  ;;  %v228_v33 = vadd.f32 %v224_v15, %v198_v22  ;;  %v227_v39 = vadd.f32 %v223_v16, %v197_v29  ;;  %v365_v10 = vmul.f32 %v362_v30, %v2845_v56 }
  0xab   :  { %v157_v18 = vpop.permute.xlu1 %156  ;;  %v155_v19 = vpop.permute.xlu0 %154  ;;  %v2906_v20 = vld [vmem:[#allocation2 + $0x98] sm:$0xff]  ;;  %v2908_v21 = vld [vmem:[#allocation2 + $0x90] sm:$0xff]  ;;  %v415_v15 = vmul.f32 %v2928_v43, %v2809_v35  ;;  %v390_v22 = vmul.f32 %v388_v32, %v2834_v47  ;;  %v207_v30 = vadd.f32 %v203_v14, %v2813_v37 }
  0xac   :  { %166 = vst.msk [vmem:[#allocation2 + $0xb1] sm:$0xff] %vm129_vm2, %v157_v18  ;;  %165 = vst.msk [vmem:[#allocation2 + $0xa9] sm:$0xff] %vm129_vm2, %v155_v19  ;;  %v254_v34 = vmul.f32 %v2820_v38, %v2906_v20  ;;  %v253_v40 = vmul.f32 %v2820_v38, %v2908_v21  ;;  %v204_v38 = vmul.f32 %v2795_v27, %v2843_v55  ;;  %v300_v27 = vstv %s2924_s19  ;;  %s2542_s19 = sld [smem:[#allocation3 + $0x3a]] }
  0xad   :  { %v264_v12 = vmul.f32 %v2858_v63, %v2906_v20 }
  0xae   :  { %351 = vrot.lane.b32.xlu1 %v340_v26, %s2660_s8  ;;  %349 = vrot.lane.b32.xlu0 %v339_v28, %s2660_s8  ;;  %v258_v48 = vadd.f32 %v254_v34, %v228_v33  ;;  %v257_v61 = vadd.f32 %v253_v40, %v227_v39  ;;  %v208_v11 = vadd.f32 %v204_v38, %v2813_v37 }
  0xaf   :  { %v2930_v45 = vld [vmem:[#allocation2 + $0x50] sm:$0xff]  ;;  %v2932_v46 = vld [vmem:[#allocation2 + $0x48] sm:$0xff]  ;;  %v233_v33 = vmul.f32 %v2825_v41, %v2873_v6  ;;  %v392_v34 = vmul.f32 %v388_v32, %v2871_v5  ;;  %v416_v39 = vmul.f32 %v2928_v43, %v2834_v47  ;;  %v212_v40 = vmul.f32 %v2940_v53, %v2800_v31 }
  0xb0   :  { %v281_v54 = vmul.f32 %v280_v36, %v2932_v46  ;;  %v282_v58 = vmul.f32 %v280_v36, %v2930_v45  ;;  %v292_v62 = vmul.f32 %v290_v49, %v2930_v45  ;;  %v291_v0 = vmul.f32 %v290_v49, %v2932_v46 }
  0xb1   :  { %v238_v19 = vadd.f32 %v234_v59, %v208_v11  ;;  %v237_v41 = vadd.f32 %v233_v33, %v207_v30 }
  0xb2   :  { %373 = vrot.lane.b32.xlu1 %v364_v50, %s2660_s8  ;;  %371 = vrot.lane.b32.xlu0 %v363_v52, %s2660_s8  ;;  %v2965_v8 = vadd.f32 %v281_v54, %v2847_v57  ;;  %v2967_v9 = vadd.f32 %v282_v58, %v256_v13  ;;  %v241_v13 = vmul.f32 %v2947_v60, %v2809_v35 }
  0xb3   :  { %v2960_v4 = vld [vmem:[#allocation2 + $0xb0] sm:$0xff]  ;;  %v2962_v7 = vld [vmem:[#allocation2 + $0xa8] sm:$0xff]  ;;  %v2983_v17 = vadd.f32 %v292_v62, %v266_v42  ;;  %v2985_v18 = vadd.f32 %v291_v0, %v265_v25  ;;  %v268_v29 = vadd.f32 %v264_v12, %v238_v19  ;;  %v263_v25 = vmul.f32 %v2858_v63, %v2908_v21 }
  0xb4   :  { %v284_v16 = vmul.f32 %v280_v36, %v2960_v4  ;;  %v283_v57 = vmul.f32 %v280_v36, %v2962_v7  ;;  %v294_v28 = vmul.f32 %v290_v49, %v2960_v4  ;;  %v391_v36 = vmul.f32 %v388_v32, %v2873_v6 }
  0xb5   :  { %v293_v42 = vmul.f32 %v290_v49, %v2962_v7  ;;  %v172_v63 = vstv %s2953_s20  ;;  %v272_v32 = vmul.f32 %v2956_v1, %v2840_v51  ;;  %v211_v52 = vmul.f32 %v2940_v53, %v2788_v24  ;;  %s3399_s20 = sld [smem:[#allocation3 + $0x3]] }
  0xb6   :  { %377 = vrot.lane.b32.xlu1 %v366_v2, %s2660_s8  ;;  %375 = vrot.lane.b32.xlu0 %v365_v10, %s2660_s8  ;;  %v2989_v23 = vadd.f32 %v284_v16, %v258_v48  ;;  %v2991_v26 = vadd.f32 %v283_v57, %v257_v61  ;;  %v3007_v37 = vadd.f32 %v294_v28, %v268_v29 }
  0xb7   :  { %v242_v48 = vmul.f32 %v2947_v60, %v2834_v47  ;;  %v216_v50 = vadd.f32 %v212_v40, %v172_v63  ;;  %v267_v38 = vadd.f32 %v263_v25, %v237_v41  ;;  %v302_v54 = vmul.f32 %v300_v27, %v2930_v45 }
  0xb8   :  { %v214_v58 = vmul.f32 %v2940_v53, %v2843_v55  ;;  %v244_v49 = vmul.f32 %v2947_v60, %v2871_v5  ;;  %v271_v61 = vmul.f32 %v2956_v1, %v2827_v44  ;;  %v215_v62 = vadd.f32 %v211_v52, %v172_v63 }
  0xb9   :  { %v246_v59 = vadd.f32 %v242_v48, %v216_v50  ;;  %v274_v0 = vmul.f32 %v2956_v1, %v2906_v20  ;;  %v3028_v2 = vadd.f32 %v293_v42, %v267_v38  ;;  %v213_v10 = vmul.f32 %v2940_v53, %v2845_v56 }
  0xba   :  { %399 = vrot.lane.b32.xlu1 %v390_v22, %s2660_s8  ;;  %397 = vrot.lane.b32.xlu0 %v389_v3, %s2660_s8  ;;  %v218_v3 = vadd.f32 %v214_v58, %v172_v63  ;;  %v301_v12 = vmul.f32 %v300_v27, %v2932_v46  ;;  %v245_v14 = vadd.f32 %v241_v13, %v215_v62  ;;  %v440_v40 = vstv %s2504_s21  ;;  %s2526_s21 = sld [smem:[#allocation3 + $0xc]] }
  0xbb   :  { %v276_v11 = vadd.f32 %v272_v32, %v246_v59  ;;  %v243_v16 = vmul.f32 %v2947_v60, %v2873_v6  ;;  %v304_v19 = vmul.f32 %v300_v27, %v2960_v4  ;;  %v217_v22 = vadd.f32 %v213_v10, %v172_v63 }
  0xbc   :  { %v248_v57 = vadd.f32 %v244_v49, %v218_v3  ;;  %v273_v28 = vmul.f32 %v2956_v1, %v2908_v21  ;;  %v275_v30 = vadd.f32 %v271_v61, %v245_v14  ;;  %v303_v13 = vmul.f32 %v300_v27, %v2962_v7 }
  0xbd   :  { %v3038_v29 = vadd.f32 %v302_v54, %v276_v11  ;;  %v247_v33 = vadd.f32 %v243_v16, %v217_v22  ;;  %v418_v60 = vmul.f32 %v2928_v43, %v2871_v5  ;;  %v442_v27 = vmul.f32 %v440_v40, %v2834_v47 }
  0xbe   :  { %403 = vrot.lane.b32.xlu1 %v392_v34, %s2660_s8  ;;  %401 = vrot.lane.b32.xlu0 %v391_v36, %s2660_s8  ;;  %v278_v53 = vadd.f32 %v274_v0, %v248_v57  ;;  %v3043_v25 = vadd.f32 %v301_v12, %v275_v30  ;;  %v417_v34 = vmul.f32 %v2928_v43, %v2873_v6  ;;  %v466_v42 = vstv %s2505_s22  ;;  %s2547_s22 = sld [smem:[#allocation3 + $0x5]] }
  0xbf   :  { %v277_v36 = vadd.f32 %v273_v28, %v247_v33  ;;  %v444_v43 = vmul.f32 %v440_v40, %v2871_v5  ;;  %v443_v41 = vmul.f32 %v440_v40, %v2873_v6  ;;  %v468_v63 = vmul.f32 %v466_v42, %v2840_v51 }
  0xc0   :  { %v3049_v1 = vadd.f32 %v304_v19, %v278_v53  ;;  %v467_v48 = vmul.f32 %v466_v42, %v2827_v44  ;;  %v470_v32 = vmul.f32 %v466_v42, %v2906_v20  ;;  %v469_v50 = vmul.f32 %v466_v42, %v2908_v21 }
  0xc1   :  { %v492_v52 = vstv %s2506_s23  ;;  %v518_v59 = vstv %s2507_s2  ;;  %v544_v0 = vstv %s2508_s3  ;;  %v570_v57 = vstv %s2509_s24  ;;  %s2543_s23 = sld [smem:[#allocation3 + $0x5e]]  ;;  %s2524_s2 = sld [smem:[#allocation3 + $0x27]] }
  0xc2   :  { %425 = vrot.lane.b32.xlu1 %v416_v39, %s2660_s8  ;;  %423 = vrot.lane.b32.xlu0 %v415_v15, %s2660_s8  ;;  %4950 = vst [vmem:[#allocation12_spill] sm:$0xff] %v3049_v1  ;;  %v3053_v15 = vadd.f32 %v303_v13, %v277_v36  ;;  %v441_v39 = vmul.f32 %v440_v40, %v2809_v35  ;;  %v596_v53 = vstv %s2510_s25  ;;  %v622_v36 = vstv %s2511_s0  ;;  %s3413_s3 = sld [smem:[#allocation3 + $0x30]]  ;;  %s3415_s24 = sld [smem:[#allocation3 + $0x29]] }
  0xc3   :  { %v494_v38 = vmul.f32 %v492_v52, %v2840_v51  ;;  %v493_v54 = vmul.f32 %v492_v52, %v2827_v44  ;;  %v496_v58 = vmul.f32 %v492_v52, %v2906_v20  ;;  %v495_v49 = vmul.f32 %v492_v52, %v2908_v21  ;;  %s2544_s25 = sld [smem:[#allocation3 + $0x1f]]  ;;  %s2525_s0 = sld [smem:[#allocation3 + $0x4b]] }
  0xc4   :  { %4951 = vst [vmem:[#allocation13_spill] sm:$0xff] %v3053_v15  ;;  %v520_v61 = vmul.f32 %v518_v59, %v2840_v51  ;;  %v519_v62 = vmul.f32 %v518_v59, %v2827_v44  ;;  %v522_v3 = vmul.f32 %v518_v59, %v2906_v20  ;;  %v521_v10 = vmul.f32 %v518_v59, %v2908_v21 }
  0xc5   :  { %v546_v11 = vmul.f32 %v544_v0, %v2930_v45  ;;  %v545_v12 = vmul.f32 %v544_v0, %v2932_v46  ;;  %v548_v14 = vmul.f32 %v544_v0, %v2960_v4  ;;  %v547_v16 = vmul.f32 %v544_v0, %v2962_v7 }
  0xc6   :  { %429 = vrot.lane.b32.xlu1 %v418_v60, %s2660_s8  ;;  %427 = vrot.lane.b32.xlu0 %v417_v34, %s2660_s8  ;;  %v572_v19 = vmul.f32 %v570_v57, %v2930_v45  ;;  %v571_v22 = vmul.f32 %v570_v57, %v2932_v46  ;;  %v574_v28 = vmul.f32 %v570_v57, %v2960_v4 }
  0xc7   :  { %v573_v30 = vmul.f32 %v570_v57, %v2962_v7  ;;  %v598_v33 = vmul.f32 %v596_v53, %v2930_v45  ;;  %v597_v13 = vmul.f32 %v596_v53, %v2932_v46  ;;  %v600_v60 = vmul.f32 %v596_v53, %v2960_v4 }
  0xc8   :  { %v599_v34 = vmul.f32 %v596_v53, %v2962_v7  ;;  %v624_v40 = vmul.f32 %v622_v36, %v2800_v31  ;;  %v752_v53 = vstv %s2516_s1  ;;  %s3433_s1 = sld [smem:[#allocation3 + $0x15]] }
  0xca   :  { %451 = vrot.lane.b32.xlu1 %v442_v27, %s2660_s8  ;;  %449 = vrot.lane.b32.xlu0 %v441_v39, %s2660_s8  ;;  %v623_v27 = vmul.f32 %v622_v36, %v2788_v24  ;;  %v626_v39 = vmul.f32 %v622_v36, %v2843_v55 }
  0xce   :  { %455 = vrot.lane.b32.xlu1 %v444_v43, %s2660_s8  ;;  %453 = vrot.lane.b32.xlu0 %v443_v41, %s2660_s8  ;;  %v625_v43 = vmul.f32 %v622_v36, %v2845_v56  ;;  %v648_v41 = vstv %s2512_s26  ;;  %s3423_s26 = sld [smem:[#allocation3 + $0x43]] }
  0xcf   :  { %v650_v42 = vmul.f32 %v648_v41, %v2800_v31 }
  0xd2   :  { %477 = vrot.lane.b32.xlu1 %v468_v63, %s2660_s8  ;;  %475 = vrot.lane.b32.xlu0 %v467_v48, %s2660_s8  ;;  %v649_v63 = vmul.f32 %v648_v41, %v2788_v24  ;;  %v652_v48 = vmul.f32 %v648_v41, %v2843_v55 }
  0xd6   :  { %481 = vrot.lane.b32.xlu1 %v470_v32, %s2660_s8  ;;  %479 = vrot.lane.b32.xlu0 %v469_v50, %s2660_s8  ;;  %v651_v32 = vmul.f32 %v648_v41, %v2845_v56  ;;  %v674_v50 = vstv %s2513_s29  ;;  %s3425_s29 = sld [smem:[#allocation3 + $0x54]] }
  0xd7   :  { %v676_v52 = vmul.f32 %v674_v50, %v2800_v31  ;;  %v677_v59 = vmul.f32 %v674_v50, %v2845_v56 }
  0xda   :  { %503 = vrot.lane.b32.xlu1 %v494_v38, %s2660_s8  ;;  %501 = vrot.lane.b32.xlu0 %v493_v54, %s2660_s8  ;;  %v675_v38 = vmul.f32 %v674_v50, %v2788_v24 }
  0xde   :  { %507 = vrot.lane.b32.xlu1 %v496_v58, %s2660_s8  ;;  %505 = vrot.lane.b32.xlu0 %v495_v49, %s2660_s8  ;;  %v678_v49 = vmul.f32 %v674_v50, %v2843_v55 }
  0xe2   :  { %529 = vrot.lane.b32.xlu1 %v520_v61, %s2660_s8  ;;  %527 = vrot.lane.b32.xlu0 %v519_v62, %s2660_s8  ;;  %v700_v61 = vstv %s2514_s30  ;;  %s3427_s30 = sld [smem:[#allocation3 + $0x67]] }
  0xe3   :  { %v702_v62 = vmul.f32 %v700_v61, %v2834_v47  ;;  %v701_v0 = vmul.f32 %v700_v61, %v2809_v35 }
  0xe6   :  { %533 = vrot.lane.b32.xlu1 %v522_v3, %s2660_s8  ;;  %531 = vrot.lane.b32.xlu0 %v521_v10, %s2660_s8  ;;  %v704_v3 = vmul.f32 %v700_v61, %v2871_v5  ;;  %v703_v10 = vmul.f32 %v700_v61, %v2873_v6 }
  0xea   :  { %555 = vrot.lane.b32.xlu1 %v546_v11, %s2660_s8  ;;  %553 = vrot.lane.b32.xlu0 %v545_v12, %s2660_s8  ;;  %v726_v11 = vstv %s2515_s5  ;;  %s3429_s5 = sld [smem:[#allocation3 + $0x4d]] }
  0xeb   :  { %v727_v57 = vmul.f32 %v726_v11, %v2809_v35 }
  0xee   :  { %559 = vrot.lane.b32.xlu1 %v548_v14, %s2660_s8  ;;  %557 = vrot.lane.b32.xlu0 %v547_v16, %s2660_s8  ;;  %v728_v16 = vmul.f32 %v726_v11, %v2834_v47 }
  0xf2   :  { %581 = vrot.lane.b32.xlu1 %v572_v19, %s2660_s8  ;;  %579 = vrot.lane.b32.xlu0 %v571_v22, %s2660_s8 }
  0xf6   :  { %585 = vrot.lane.b32.xlu1 %v574_v28, %s2660_s8  ;;  %583 = vrot.lane.b32.xlu0 %v573_v30, %s2660_s8  ;;  %v730_v28 = vmul.f32 %v726_v11, %v2871_v5  ;;  %v729_v30 = vmul.f32 %v726_v11, %v2873_v6 }
  0xfa   :  { %607 = vrot.lane.b32.xlu1 %v598_v33, %s2660_s8  ;;  %605 = vrot.lane.b32.xlu0 %v597_v13, %s2660_s8 }
  0xfe   :  { %611 = vrot.lane.b32.xlu1 %v600_v60, %s2660_s8  ;;  %609 = vrot.lane.b32.xlu0 %v599_v34, %s2660_s8  ;;  %v754_v60 = vmul.f32 %v752_v53, %v2834_v47  ;;  %v753_v34 = vmul.f32 %v752_v53, %v2809_v35 }
 0x102   :  { %633 = vrot.lane.b32.xlu1 %v624_v40, %s2661_s28  ;;  %631 = vrot.lane.b32.xlu0 %v623_v27, %s2661_s28  ;;  %v756_v27 = vmul.f32 %v752_v53, %v2871_v5 }
 0x106   :  { %637 = vrot.lane.b32.xlu1 %v626_v39, %s2661_s28  ;;  %635 = vrot.lane.b32.xlu0 %v625_v43, %s2661_s28  ;;  %v755_v39 = vmul.f32 %v752_v53, %v2873_v6  ;;  %v778_v43 = vstv %s2517_s6  ;;  %s3448_s6 = sld [smem:[#allocation3 + $0x39]] }
 0x107   :  { %v780_v41 = vmul.f32 %v778_v43, %v2840_v51 }
 0x10a   :  { %659 = vrot.lane.b32.xlu1 %v650_v42, %s2661_s28  ;;  %657 = vrot.lane.b32.xlu0 %v649_v63, %s2661_s28  ;;  %v779_v42 = vmul.f32 %v778_v43, %v2827_v44  ;;  %v782_v63 = vmul.f32 %v778_v43, %v2906_v20 }
 0x10c   :  { %v3131_v54 = vpop.permute.xlu0 %319 }
 0x10e   :  { %663 = vrot.lane.b32.xlu1 %v652_v48, %s2661_s28  ;;  %661 = vrot.lane.b32.xlu0 %v651_v32, %s2661_s28  ;;  %v781_v48 = vmul.f32 %v778_v43, %v2908_v21  ;;  %v804_v32 = vstv %s2518_s27  ;;  %s3490_s27 = sld [smem:[#allocation3 + $0x1e]] }
 0x110   :  { %v3133_v58 = vpop.permute.xlu1 %321 }
 0x112   :  { %685 = vrot.lane.b32.xlu1 %v676_v52, %s2661_s28  ;;  %683 = vrot.lane.b32.xlu0 %v675_v38, %s2661_s28  ;;  %v806_v38 = vmul.f32 %v804_v32, %v2840_v51 }
 0x116   :  { %689 = vrot.lane.b32.xlu1 %v678_v49, %s2661_s28  ;;  %687 = vrot.lane.b32.xlu0 %v677_v59, %s2661_s28  ;;  %v805_v49 = vmul.f32 %v804_v32, %v2827_v44 }
 0x118   :  { %v3139_v31 = vpop.permute.xlu1 %325  ;;  %v3141_v24 = vpop.permute.xlu0 %323 }
 0x11a   :  { %711 = vrot.lane.b32.xlu1 %v702_v62, %s2661_s28  ;;  %709 = vrot.lane.b32.xlu0 %v701_v0, %s2661_s28  ;;  %v808_v62 = vmul.f32 %v804_v32, %v2906_v20  ;;  %v807_v0 = vmul.f32 %v804_v32, %v2908_v21 }
 0x11c   :  { %v3147_v55 = vpop.permute.xlu1 %347  ;;  %v3149_v56 = vpop.permute.xlu0 %345 }
 0x11e   :  { %715 = vrot.lane.b32.xlu1 %v704_v3, %s2661_s28  ;;  %713 = vrot.lane.b32.xlu0 %v703_v10, %s2661_s28  ;;  %v830_v3 = vstv %s2519_s7  ;;  %s3544_s7 = sld [smem:[#allocation3 + $0x42]] }
 0x11f   :  { %v834_v53 = vmul.f32 %v830_v3, %v2906_v20 }
 0x120   :  { %v3155_v12 = vpop.permute.xlu1 %351  ;;  %v3157_v14 = vpop.permute.xlu0 %349 }
 0x122   :  { %737 = vrot.lane.b32.xlu1 %v728_v16, %s2661_s28  ;;  %735 = vrot.lane.b32.xlu0 %v727_v57, %s2661_s28  ;;  %v832_v16 = vmul.f32 %v830_v3, %v2840_v51  ;;  %v831_v57 = vmul.f32 %v830_v3, %v2827_v44 }
 0x124   :  { %v3163_v19 = vpop.permute.xlu1 %373  ;;  %v3165_v22 = vpop.permute.xlu0 %371 }
 0x126   :  { %741 = vrot.lane.b32.xlu1 %v730_v28, %s2661_s28  ;;  %739 = vrot.lane.b32.xlu0 %v729_v30, %s2661_s28 }
 0x128   :  { %v3171_v33 = vpop.permute.xlu1 %377  ;;  %v3173_v13 = vpop.permute.xlu0 %375 }
 0x129   :  { %4952 = vst [vmem:[#allocation14_spill] sm:$0xff] %v3171_v33  ;;  %4953 = vst [vmem:[#allocation15_spill] sm:$0xff] %v3173_v13 }
 0x12a   :  { %763 = vrot.lane.b32.xlu1 %v754_v60, %s2661_s28  ;;  %761 = vrot.lane.b32.xlu0 %v753_v34, %s2661_s28  ;;  %v833_v60 = vmul.f32 %v830_v3, %v2908_v21  ;;  %v856_v34 = vstv %s2520_s9  ;;  %s3845_s9 = sld [smem:[#allocation3 + $0x5d]] }
 0x12b   :  { %v860_v43 = vmul.f32 %v856_v34, %v2960_v4 }
 0x12c   :  { %v3179_v36 = vpop.permute.xlu1 %399  ;;  %v3181_v40 = vpop.permute.xlu0 %397 }
 0x12d   :  { %4954 = vst [vmem:[#allocation16_spill] sm:$0xff] %v3179_v36  ;;  %4955 = vst [vmem:[#allocation17_spill] sm:$0xff] %v3181_v40 }
 0x12e   :  { %767 = vrot.lane.b32.xlu1 %v756_v27, %s2661_s28  ;;  %765 = vrot.lane.b32.xlu0 %v755_v39, %s2661_s28  ;;  %v858_v27 = vmul.f32 %v856_v34, %v2930_v45  ;;  %v857_v39 = vmul.f32 %v856_v34, %v2932_v46 }
 0x130   :  { %v3187_v47 = vpop.permute.xlu1 %403  ;;  %v3189_v35 = vpop.permute.xlu0 %401 }
 0x131   :  { %4956 = vst [vmem:[#allocation18_spill] sm:$0xff] %v3187_v47  ;;  %4957 = vst [vmem:[#allocation19_spill] sm:$0xff] %v3189_v35  ;;  %v3488_v35 = vstv %s3433_s1  ;;  %s2563_s1 = sld [smem:[#allocation3 + $0x33]] }
 0x132   :  { %789 = vrot.lane.b32.xlu1 %v780_v41, %s2661_s28  ;;  %787 = vrot.lane.b32.xlu0 %v779_v42, %s2661_s28  ;;  %v859_v41 = vmul.f32 %v856_v34, %v2962_v7  ;;  %v882_v42 = vstv %s2521_s10  ;;  %s3868_s10 = sld [smem:[#allocation3 + $0x66]] }
 0x133   :  { %v884_v32 = vmul.f32 %v882_v42, %v2930_v45  ;;  %v885_v3 = vmul.f32 %v882_v42, %v2962_v7 }
 0x134   :  { %v3195_v5 = vpop.permute.xlu1 %425  ;;  %v3197_v6 = vpop.permute.xlu0 %423 }
 0x135   :  { %4958 = vst [vmem:[#allocation20_spill] sm:$0xff] %v3195_v5  ;;  %4959 = vst [vmem:[#allocation21_spill] sm:$0xff] %v3197_v6 }
 0x136   :  { %793 = vrot.lane.b32.xlu1 %v782_v63, %s2661_s28  ;;  %791 = vrot.lane.b32.xlu0 %v781_v48, %s2661_s28 }
 0x138   :  { %v3203_v50 = vpop.permute.xlu1 %429  ;;  %v3205_v52 = vpop.permute.xlu0 %427 }
 0x139   :  { %4960 = vst [vmem:[#allocation22_spill] sm:$0xff] %v3203_v50  ;;  %4961 = vst [vmem:[#allocation23_spill] sm:$0xff] %v3205_v52  ;;  %v1356_v50 = vstv %s3427_s30  ;;  %s2583_s30 = sld [smem:[#allocation3 + $0x8]] }
 0x13a   :  { %815 = vrot.lane.b32.xlu1 %v806_v38, %s2661_s28  ;;  %813 = vrot.lane.b32.xlu0 %v805_v49, %s2661_s28  ;;  %v883_v38 = vmul.f32 %v882_v42, %v2932_v46 }
 0x13c   :  { %v3211_v59 = vpop.permute.xlu1 %451  ;;  %v3213_v61 = vpop.permute.xlu0 %449 }
 0x13d   :  { %4962 = vst [vmem:[#allocation24_spill] sm:$0xff] %v3211_v59  ;;  %4963 = vst [vmem:[#allocation25_spill] sm:$0xff] %v3213_v61  ;;  %v3468_v61 = vld [vmem:[#allocation2 + $0xb1] sm:$0xff]  ;;  %v3474_v59 = vstv %s3425_s29  ;;  %s4230_s29 = sld [smem:[#allocation3 + $0xf]] }
 0x13e   :  { %819 = vrot.lane.b32.xlu1 %v808_v62, %s2661_s28  ;;  %817 = vrot.lane.b32.xlu0 %v807_v0, %s2661_s28  ;;  %v886_v0 = vmul.f32 %v882_v42, %v2960_v4  ;;  %v3281_v42 = vld [vmem:[#allocation2 + $0x9] sm:$0xff]  ;;  %5022 = vst [vmem:[#allocation84_spill] sm:$0xff] %v3468_v61  ;;  %5024 = vst [vmem:[#allocation86_spill] sm:$0xff] %v3474_v59 }
 0x140   :  { %v3219_v10 = vpop.permute.xlu1 %455  ;;  %v3221_v11 = vpop.permute.xlu0 %453 }
 0x141   :  { %4964 = vst [vmem:[#allocation26_spill] sm:$0xff] %v3219_v10  ;;  %4965 = vst [vmem:[#allocation27_spill] sm:$0xff] %v3221_v11  ;;  %v3466_v10 = vld [vmem:[#allocation2 + $0x49] sm:$0xff] }
 0x142   :  { %841 = vrot.lane.b32.xlu1 %v832_v16, %s2661_s28  ;;  %839 = vrot.lane.b32.xlu0 %v831_v57, %s2661_s28  ;;  %v908_v16 = vstv %s2522_s11  ;;  %5021 = vst [vmem:[#allocation83_spill] sm:$0xff] %v3466_v10  ;;  %v3519_v1 = vmul.f32 %v1356_v50, %v3466_v10  ;;  %s3891_s11 = sld [smem:[#allocation3 + $0xe]] }
 0x143   :  { %v909_v34 = vmul.f32 %v908_v16, %v2932_v46 }
 0x144   :  { %v3227_v28 = vpop.permute.xlu1 %477  ;;  %v3229_v30 = vpop.permute.xlu0 %475  ;;  %5030 = vst [vmem:[#allocation92_spill] sm:$0xff] %v3519_v1 }
 0x145   :  { %4966 = vst [vmem:[#allocation28_spill] sm:$0xff] %v3227_v28  ;;  %4967 = vst [vmem:[#allocation29_spill] sm:$0xff] %v3229_v30  ;;  %v3470_v30 = vld [vmem:[#allocation2 + $0xa9] sm:$0xff]  ;;  %v1330_v28 = vstv %s3423_s26  ;;  %s4228_s26 = sld [smem:[#allocation3 + $0x61]] }
 0x146   :  { %845 = vrot.lane.b32.xlu1 %v834_v53, %s2661_s28  ;;  %843 = vrot.lane.b32.xlu0 %v833_v60, %s2661_s28  ;;  %v910_v60 = vmul.f32 %v908_v16, %v2930_v45  ;;  %5023 = vst [vmem:[#allocation85_spill] sm:$0xff] %v3470_v30  ;;  %v3507_v13 = vmul.f32 %v1330_v28, %v3466_v10 }
 0x147   :  { %v3510_v15 = vmul.f32 %v1330_v28, %v3468_v61  ;;  %v3513_v33 = vmul.f32 %v1330_v28, %v3470_v30  ;;  %v3539_v1 = vmul.f32 %v1356_v50, %v3470_v30 }
 0x148   :  { %v3235_v51 = vpop.permute.xlu1 %481  ;;  %v3237_v44 = vpop.permute.xlu0 %479 }
 0x149   :  { %4968 = vst [vmem:[#allocation30_spill] sm:$0xff] %v3235_v51  ;;  %4969 = vst [vmem:[#allocation31_spill] sm:$0xff] %v3237_v44  ;;  %v3458_v44 = vstv %s2525_s0  ;;  %s4226_s0 = sld [smem:[#allocation3 + $0x6]] }
 0x14a   :  { %867 = vrot.lane.b32.xlu1 %v858_v27, %s2661_s28  ;;  %865 = vrot.lane.b32.xlu0 %v857_v39, %s2661_s28  ;;  %5035 = vst [vmem:[#allocation97_spill] sm:$0xff] %v3539_v1 }
 0x14c   :  { %v3243_v20 = vpop.permute.xlu1 %503  ;;  %v3245_v21 = vpop.permute.xlu0 %501 }
 0x14d   :  { %4970 = vst [vmem:[#allocation32_spill] sm:$0xff] %v3243_v20  ;;  %4971 = vst [vmem:[#allocation33_spill] sm:$0xff] %v3245_v21  ;;  %v980_v21 = vstv %s2526_s21  ;;  %v3456_v20 = vstv %s3415_s24  ;;  %s2572_s21 = sld [smem:[#allocation3 + $0x2b]]  ;;  %s2577_s24 = sld [smem:[#allocation3 + $0x19]] }
 0x14e   :  { %871 = vrot.lane.b32.xlu1 %v860_v43, %s2661_s28  ;;  %869 = vrot.lane.b32.xlu0 %v859_v41, %s2661_s28  ;;  %v912_v43 = vmul.f32 %v908_v16, %v2960_v4  ;;  %v911_v41 = vmul.f32 %v908_v16, %v2962_v7  ;;  %v3295_v7 = vld [vmem:[#allocation2 + $0x61] sm:$0xff] }
 0x14f   :  { %4983 = vst [vmem:[#allocation45_spill] sm:$0xff] %v3295_v7 }
 0x150   :  { %v3251_v63 = vpop.permute.xlu1 %507  ;;  %v3253_v48 = vpop.permute.xlu0 %505 }
 0x151   :  { %4972 = vst [vmem:[#allocation34_spill] sm:$0xff] %v3251_v63  ;;  %4973 = vst [vmem:[#allocation35_spill] sm:$0xff] %v3253_v48  ;;  %v3409_v48 = vld [vmem:[#allocation2 + $0x91] sm:$0xff]  ;;  %v950_v63 = vstv %s3399_s20  ;;  %s2571_s20 = sld [smem:[#allocation3 + $0x7]] }
 0x152   :  { %893 = vrot.lane.b32.xlu1 %v884_v32, %s2661_s28  ;;  %891 = vrot.lane.b32.xlu0 %v883_v38, %s2661_s28  ;;  %v1070_v32 = vstv %s2535_s12  ;;  %v3283_v38 = vld [vmem:[#allocation2 + $0x1] sm:$0xff]  ;;  %s2551_s12 = sld [smem:[#allocation3 + $0x32]] }
 0x153   :  { %v1071_v4 = vmul.f32 %v1070_v32, %v3283_v38 }
 0x154   :  { %v3259_v49 = vpop.permute.xlu1 %529  ;;  %v3261_v62 = vpop.permute.xlu0 %527 }
 0x155   :  { %4974 = vst [vmem:[#allocation36_spill] sm:$0xff] %v3259_v49  ;;  %4975 = vst [vmem:[#allocation37_spill] sm:$0xff] %v3261_v62 }
 0x156   :  { %897 = vrot.lane.b32.xlu1 %v886_v0, %s2661_s28  ;;  %895 = vrot.lane.b32.xlu0 %v885_v3, %s2661_s28  ;;  %v1072_v0 = vmul.f32 %v1070_v32, %v3281_v42  ;;  %v3293_v3 = vld [vmem:[#allocation2 + $0x69] sm:$0xff] }
 0x157   :  { %4982 = vst [vmem:[#allocation44_spill] sm:$0xff] %v3293_v3 }
 0x158   :  { %v3267_v57 = vpop.permute.xlu1 %533  ;;  %v3269_v53 = vpop.permute.xlu0 %531 }
 0x159   :  { %4976 = vst [vmem:[#allocation38_spill] sm:$0xff] %v3267_v57  ;;  %4977 = vst [vmem:[#allocation39_spill] sm:$0xff] %v3269_v53 }
 0x15a   :  { %919 = vrot.lane.b32.xlu1 %v910_v60, %s2661_s28  ;;  %917 = vrot.lane.b32.xlu0 %v909_v34, %s2661_s28  ;;  %v1074_v34 = vmul.f32 %v1070_v32, %v3293_v3 }
 0x15c   :  { %v3275_v27 = vpop.permute.xlu1 %555  ;;  %v3277_v39 = vpop.permute.xlu0 %553 }
 0x15d   :  { %4978 = vst [vmem:[#allocation40_spill] sm:$0xff] %v3275_v27  ;;  %4979 = vst [vmem:[#allocation41_spill] sm:$0xff] %v3277_v39  ;;  %v3442_v39 = vstv %s2547_s22  ;;  %v3453_v27 = vstv %s3413_s3  ;;  %s2573_s22 = sld [smem:[#allocation3 + $0x4f]]  ;;  %s2576_s3 = sld [smem:[#allocation3 + $0x58]] }
 0x15e   :  { %923 = vrot.lane.b32.xlu1 %v912_v43, %s2661_s28  ;;  %921 = vrot.lane.b32.xlu0 %v911_v41, %s2661_s28  ;;  %v1073_v43 = vmul.f32 %v1070_v32, %v3295_v7  ;;  %v1096_v41 = vstv %s2536_s13  ;;  %v3564_v1 = vmul.f32 %v3442_v39, %v3281_v42  ;;  %s2552_s13 = sld [smem:[#allocation3 + $0x56]] }
 0x160   :  { %v3287_v45 = vpop.permute.xlu1 %559  ;;  %v3289_v46 = vpop.permute.xlu0 %557 }
 0x161   :  { %4980 = vst [vmem:[#allocation42_spill] sm:$0xff] %v3287_v45  ;;  %4981 = vst [vmem:[#allocation43_spill] sm:$0xff] %v3289_v46 }
 0x162   :  { %1081 = vrot.lane.b32.xlu1 %v1072_v0, %s2660_s8  ;;  %1079 = vrot.lane.b32.xlu0 %v1071_v4, %s2660_s8  ;;  %v1098_v0 = vmul.f32 %v1096_v41, %v3281_v42  ;;  %v1097_v4 = vmul.f32 %v1096_v41, %v3283_v38 }
 0x164   :  { %v3299_v16 = vpop.permute.xlu1 %581  ;;  %v3301_v60 = vpop.permute.xlu0 %579 }
 0x165   :  { %4984 = vst [vmem:[#allocation46_spill] sm:$0xff] %v3299_v16  ;;  %4985 = vst [vmem:[#allocation47_spill] sm:$0xff] %v3301_v60  ;;  %v1122_v16 = vstv %s2537_s14  ;;  %s2553_s14 = sld [smem:[#allocation3 + $0x17]] }
 0x166   :  { %1085 = vrot.lane.b32.xlu1 %v1074_v34, %s2660_s8  ;;  %1083 = vrot.lane.b32.xlu0 %v1073_v43, %s2660_s8  ;;  %v1100_v34 = vmul.f32 %v1096_v41, %v3293_v3  ;;  %v1099_v43 = vmul.f32 %v1096_v41, %v3295_v7 }
 0x168   :  { %v3307_v46 = vpop.permute.xlu1 %585  ;;  %v3309_v45 = vpop.permute.xlu0 %583 }
 0x169   :  { %4986 = vst [vmem:[#allocation48_spill] sm:$0xff] %v3307_v46  ;;  %4987 = vst [vmem:[#allocation49_spill] sm:$0xff] %v3309_v45 }
 0x16a   :  { %1107 = vrot.lane.b32.xlu1 %v1098_v0, %s2660_s8  ;;  %1105 = vrot.lane.b32.xlu0 %v1097_v4, %s2660_s8  ;;  %v1124_v0 = vmul.f32 %v1122_v16, %v3281_v42  ;;  %v1123_v4 = vmul.f32 %v1122_v16, %v3283_v38 }
 0x16c   :  { %v3315_v60 = vpop.permute.xlu1 %607  ;;  %v3317_v32 = vpop.permute.xlu0 %605 }
 0x16d   :  { %4988 = vst [vmem:[#allocation50_spill] sm:$0xff] %v3315_v60  ;;  %4989 = vst [vmem:[#allocation51_spill] sm:$0xff] %v3317_v32  ;;  %v3337_v60 = vld [vmem:[#allocation2 + $0x21] sm:$0xff] }
 0x16e   :  { %1111 = vrot.lane.b32.xlu1 %v1100_v34, %s2660_s8  ;;  %1109 = vrot.lane.b32.xlu0 %v1099_v43, %s2660_s8  ;;  %v1126_v34 = vmul.f32 %v1122_v16, %v3293_v3  ;;  %v1125_v43 = vmul.f32 %v1122_v16, %v3295_v7  ;;  %4994 = vst [vmem:[#allocation56_spill] sm:$0xff] %v3337_v60  ;;  %v3351_v16 = vld [vmem:[#allocation2 + $0x79] sm:$0xff] }
 0x16f   :  { %4999 = vst [vmem:[#allocation61_spill] sm:$0xff] %v3351_v16 }
 0x170   :  { %v3323_v45 = vpop.permute.xlu1 %611  ;;  %v3325_v46 = vpop.permute.xlu0 %609 }
 0x171   :  { %4990 = vst [vmem:[#allocation52_spill] sm:$0xff] %v3323_v45  ;;  %4991 = vst [vmem:[#allocation53_spill] sm:$0xff] %v3325_v46  ;;  %v1148_v45 = vstv %s2538_s15  ;;  %v3339_v46 = vld [vmem:[#allocation2 + $0x19] sm:$0xff]  ;;  %s2554_s15 = sld [smem:[#allocation3 + $0x3b]] }
 0x172   :  { %1133 = vrot.lane.b32.xlu1 %v1124_v0, %s2660_s8  ;;  %1131 = vrot.lane.b32.xlu0 %v1123_v4, %s2660_s8  ;;  %4995 = vst [vmem:[#allocation57_spill] sm:$0xff] %v3339_v46  ;;  %v1150_v53 = vmul.f32 %v1148_v45, %v3337_v60  ;;  %v1149_v57 = vmul.f32 %v1148_v45, %v3339_v46 }
 0x174   :  { %v3331_v32 = vpop.permute.xlu1 %633  ;;  %v3333_v41 = vpop.permute.xlu0 %631 }
 0x175   :  { %4992 = vst [vmem:[#allocation54_spill] sm:$0xff] %v3331_v32  ;;  %4993 = vst [vmem:[#allocation55_spill] sm:$0xff] %v3333_v41  ;;  %v3349_v41 = vld [vmem:[#allocation2 + $0x81] sm:$0xff] }
 0x176   :  { %1137 = vrot.lane.b32.xlu1 %v1126_v34, %s2660_s8  ;;  %1135 = vrot.lane.b32.xlu0 %v1125_v43, %s2660_s8  ;;  %4998 = vst [vmem:[#allocation60_spill] sm:$0xff] %v3349_v41  ;;  %v1152_v43 = vmul.f32 %v1148_v45, %v3349_v41 }
 0x178   :  { %v3343_v0 = vpop.permute.xlu1 %637  ;;  %v3345_v4 = vpop.permute.xlu0 %635 }
 0x179   :  { %4996 = vst [vmem:[#allocation58_spill] sm:$0xff] %v3343_v0  ;;  %4997 = vst [vmem:[#allocation59_spill] sm:$0xff] %v3345_v4  ;;  %v1151_v4 = vmul.f32 %v1148_v45, %v3351_v16  ;;  %v1174_v0 = vstv %s2539_s16  ;;  %s2555_s16 = sld [smem:[#allocation3 + $0x5f]] }
 0x17a   :  { %1159 = vrot.lane.b32.xlu1 %v1150_v53, %s2660_s8  ;;  %1157 = vrot.lane.b32.xlu0 %v1149_v57, %s2660_s8  ;;  %v1176_v57 = vmul.f32 %v1174_v0, %v3337_v60  ;;  %v1175_v53 = vmul.f32 %v1174_v0, %v3339_v46 }
 0x17c   :  { %v3355_v32 = vpop.permute.xlu1 %659  ;;  %v3357_v34 = vpop.permute.xlu0 %657 }
 0x17d   :  { %5000 = vst [vmem:[#allocation62_spill] sm:$0xff] %v3355_v32  ;;  %5001 = vst [vmem:[#allocation63_spill] sm:$0xff] %v3357_v34  ;;  %v1200_v32 = vstv %s2540_s17  ;;  %s2556_s17 = sld [smem:[#allocation3 + $0x20]] }
 0x17e   :  { %1163 = vrot.lane.b32.xlu1 %v1152_v43, %s2660_s8  ;;  %1161 = vrot.lane.b32.xlu0 %v1151_v4, %s2660_s8  ;;  %v1178_v43 = vmul.f32 %v1174_v0, %v3349_v41  ;;  %v1177_v4 = vmul.f32 %v1174_v0, %v3351_v16 }
 0x180   :  { %v3363_v62 = vpop.permute.xlu1 %663  ;;  %v3365_v49 = vpop.permute.xlu0 %661 }
 0x181   :  { %5002 = vst [vmem:[#allocation64_spill] sm:$0xff] %v3363_v62  ;;  %5003 = vst [vmem:[#allocation65_spill] sm:$0xff] %v3365_v49 }
 0x182   :  { %1185 = vrot.lane.b32.xlu1 %v1176_v57, %s2660_s8  ;;  %1183 = vrot.lane.b32.xlu0 %v1175_v53, %s2660_s8  ;;  %v1202_v57 = vmul.f32 %v1200_v32, %v3337_v60  ;;  %v1201_v53 = vmul.f32 %v1200_v32, %v3339_v46 }
 0x184   :  { %v3371_v34 = vpop.permute.xlu1 %685  ;;  %v3373_v45 = vpop.permute.xlu0 %683 }
 0x185   :  { %5004 = vst [vmem:[#allocation66_spill] sm:$0xff] %v3371_v34  ;;  %5005 = vst [vmem:[#allocation67_spill] sm:$0xff] %v3373_v45  ;;  %v3393_v34 = vld [vmem:[#allocation2 + $0x39] sm:$0xff] }
 0x186   :  { %1189 = vrot.lane.b32.xlu1 %v1178_v43, %s2660_s8  ;;  %1187 = vrot.lane.b32.xlu0 %v1177_v4, %s2660_s8  ;;  %v1204_v43 = vmul.f32 %v1200_v32, %v3349_v41  ;;  %v1203_v4 = vmul.f32 %v1200_v32, %v3351_v16  ;;  %5010 = vst [vmem:[#allocation72_spill] sm:$0xff] %v3393_v34 }
 0x188   :  { %v3379_v49 = vpop.permute.xlu1 %689  ;;  %v3381_v62 = vpop.permute.xlu0 %687 }
 0x189   :  { %5006 = vst [vmem:[#allocation68_spill] sm:$0xff] %v3379_v49  ;;  %5007 = vst [vmem:[#allocation69_spill] sm:$0xff] %v3381_v62  ;;  %v1226_v49 = vstv %s2541_s18  ;;  %v3395_v62 = vld [vmem:[#allocation2 + $0x31] sm:$0xff]  ;;  %s2557_s18 = sld [smem:[#allocation3 + $0x44]] }
 0x18a   :  { %1211 = vrot.lane.b32.xlu1 %v1202_v57, %s2660_s8  ;;  %1209 = vrot.lane.b32.xlu0 %v1201_v53, %s2660_s8  ;;  %5011 = vst [vmem:[#allocation73_spill] sm:$0xff] %v3395_v62  ;;  %v1227_v32 = vmul.f32 %v1226_v49, %v3395_v62 }
 0x18c   :  { %v3387_v45 = vpop.permute.xlu1 %711  ;;  %v3389_v0 = vpop.permute.xlu0 %709 }
 0x18d   :  { %5008 = vst [vmem:[#allocation70_spill] sm:$0xff] %v3387_v45  ;;  %5009 = vst [vmem:[#allocation71_spill] sm:$0xff] %v3389_v0  ;;  %v1228_v0 = vmul.f32 %v1226_v49, %v3393_v34  ;;  %v3407_v45 = vld [vmem:[#allocation2 + $0x99] sm:$0xff] }
 0x18e   :  { %1215 = vrot.lane.b32.xlu1 %v1204_v43, %s2660_s8  ;;  %1213 = vrot.lane.b32.xlu0 %v1203_v4, %s2660_s8 }
 0x190   :  { %v3401_v57 = vpop.permute.xlu1 %715  ;;  %v3403_v53 = vpop.permute.xlu0 %713 }
 0x191   :  { %5012 = vst [vmem:[#allocation74_spill] sm:$0xff] %v3401_v57  ;;  %5013 = vst [vmem:[#allocation75_spill] sm:$0xff] %v3403_v53  ;;  %v1230_v53 = vmul.f32 %v1226_v49, %v3407_v45  ;;  %v1229_v57 = vmul.f32 %v1226_v49, %v3409_v48 }
 0x192   :  { %1237 = vrot.lane.b32.xlu1 %v1228_v0, %s2660_s8  ;;  %1235 = vrot.lane.b32.xlu0 %v1227_v32, %s2660_s8  ;;  %v1252_v0 = vstv %s2542_s19  ;;  %s2558_s19 = sld [smem:[#allocation3 + $0x68]] }
 0x193   :  { %v1256_v51 = vmul.f32 %v1252_v0, %v3407_v45  ;;  %v1255_v11 = vmul.f32 %v1252_v0, %v3409_v48 }
 0x194   :  { %v3417_v43 = vpop.permute.xlu1 %737  ;;  %v3419_v4 = vpop.permute.xlu0 %735 }
 0x195   :  { %5014 = vst [vmem:[#allocation76_spill] sm:$0xff] %v3417_v43  ;;  %5015 = vst [vmem:[#allocation77_spill] sm:$0xff] %v3419_v4  ;;  %v1254_v4 = vmul.f32 %v1252_v0, %v3393_v34  ;;  %v1253_v43 = vmul.f32 %v1252_v0, %v3395_v62 }
 0x196   :  { %1241 = vrot.lane.b32.xlu1 %v1230_v53, %s2660_s8  ;;  %1239 = vrot.lane.b32.xlu0 %v1229_v57, %s2660_s8  ;;  %v1278_v57 = vstv %s2543_s23  ;;  %v3446_v53 = vstv %s2524_s2  ;;  %s2574_s23 = sld [smem:[#allocation3 + $0x10]]  ;;  %s2575_s2 = sld [smem:[#allocation3 + $0x34]] }
 0x197   :  { %v1280_v52 = vmul.f32 %v1278_v57, %v3393_v34  ;;  %v1282_v0 = vmul.f32 %v1278_v57, %v3407_v45  ;;  %v1281_v6 = vmul.f32 %v1278_v57, %v3409_v48 }
 0x198   :  { %v3435_v32 = vpop.permute.xlu1 %741  ;;  %v3437_v49 = vpop.permute.xlu0 %739 }
 0x199   :  { %5016 = vst [vmem:[#allocation78_spill] sm:$0xff] %v3435_v32  ;;  %5017 = vst [vmem:[#allocation79_spill] sm:$0xff] %v3437_v49  ;;  %v3450_v49 = vld [vmem:[#allocation2 + $0x51] sm:$0xff]  ;;  %v1304_v32 = vstv %s2544_s25  ;;  %s2578_s25 = sld [smem:[#allocation3 + $0x3d]] }
 0x19a   :  { %1263 = vrot.lane.b32.xlu1 %v1254_v4, %s2660_s8  ;;  %1261 = vrot.lane.b32.xlu0 %v1253_v43, %s2660_s8  ;;  %5018 = vst [vmem:[#allocation80_spill] sm:$0xff] %v3450_v49  ;;  %v1306_v5 = vmul.f32 %v1304_v32, %v3450_v49  ;;  %v1305_v47 = vmul.f32 %v1304_v32, %v3466_v10 }
 0x19b   :  { %v3494_v40 = vmul.f32 %v1304_v32, %v3468_v61  ;;  %v3497_v36 = vmul.f32 %v1304_v32, %v3470_v30  ;;  %v3516_v32 = vmul.f32 %v1356_v50, %v3450_v49 }
 0x19c   :  { %v3460_v4 = vpop.permute.xlu1 %763  ;;  %v3462_v43 = vpop.permute.xlu0 %761 }
 0x19d   :  { %5019 = vst [vmem:[#allocation81_spill] sm:$0xff] %v3460_v4  ;;  %5020 = vst [vmem:[#allocation82_spill] sm:$0xff] %v3462_v43  ;;  %v1279_v4 = vmul.f32 %v1278_v57, %v3395_v62  ;;  %v3480_v43 = vstv %s3429_s5  ;;  %s2560_s5 = sld [smem:[#allocation3 + $0x2a]] }
 0x19e   :  { %5025 = vst [vmem:[#allocation87_spill] sm:$0xff] %v3480_v43  ;;  %1267 = vrot.lane.b32.xlu1 %v1256_v51, %s2660_s8  ;;  %1265 = vrot.lane.b32.xlu0 %v1255_v11, %s2660_s8  ;;  %v3500_v11 = vmul.f32 %v1330_v28, %v3450_v49  ;;  %5029 = vst [vmem:[#allocation91_spill] sm:$0xff] %v3516_v32  ;;  %v3533_v28 = vmul.f32 %v980_v21, %v3339_v46 }
 0x19f   :  { %v3536_v32 = vmul.f32 %v1356_v50, %v3468_v61 }
 0x1a0   :  { %5026 = vst [vmem:[#allocation88_spill] sm:$0xff] %v3500_v11  ;;  %v3502_v51 = vpop.permute.xlu1 %767  ;;  %v3504_v57 = vpop.permute.xlu0 %765  ;;  %v3522_v11 = vmul.f32 %v950_v63, %v3281_v42  ;;  %5034 = vst [vmem:[#allocation96_spill] sm:$0xff] %v3533_v28  ;;  %v3556_v28 = vmul.f32 %v980_v21, %v3351_v16 }
 0x1a1   :  { %5027 = vst [vmem:[#allocation89_spill] sm:$0xff] %v3502_v51  ;;  %5028 = vst [vmem:[#allocation90_spill] sm:$0xff] %v3504_v57  ;;  %v3525_v57 = vmul.f32 %v980_v21, %v3337_v60  ;;  %v3528_v51 = vmul.f32 %v950_v63, %v3283_v38 }
 0x1a2   :  { %5031 = vst [vmem:[#allocation93_spill] sm:$0xff] %v3522_v11  ;;  %1289 = vrot.lane.b32.xlu1 %v1280_v52, %s2660_s8  ;;  %1287 = vrot.lane.b32.xlu0 %v1279_v4, %s2660_s8  ;;  %v3542_v11 = vstv %s3448_s6  ;;  %v3550_v52 = vmul.f32 %v980_v21, %v3349_v41  ;;  %v3553_v4 = vmul.f32 %v950_v63, %v3295_v7  ;;  %5039 = vst [vmem:[#allocation101_spill] sm:$0xff] %v3556_v28  ;;  %s2584_s6 = sld [smem:[#allocation3 + $0x2c]] }
 0x1a3   :  { %5032 = vst [vmem:[#allocation94_spill] sm:$0xff] %v3525_v57  ;;  %5033 = vst [vmem:[#allocation95_spill] sm:$0xff] %v3528_v51  ;;  %v3547_v57 = vmul.f32 %v950_v63, %v3293_v3  ;;  %v3572_v63 = vmul.f32 %v3446_v53, %v3281_v42  ;;  %v3576_v21 = vmul.f32 %v3453_v27, %v3337_v60 }
 0x1a4   :  { %5037 = vst [vmem:[#allocation99_spill] sm:$0xff] %v3550_v52  ;;  %5038 = vst [vmem:[#allocation100_spill] sm:$0xff] %v3553_v4  ;;  %v3558_v51 = vpop.permute.xlu1 %789  ;;  %v3560_v50 = vpop.permute.xlu0 %787  ;;  %v3580_v28 = vmul.f32 %v3446_v53, %v3283_v38  ;;  %v3584_v52 = vmul.f32 %v3453_v27, %v3339_v46  ;;  %v3588_v4 = vmul.f32 %v3442_v39, %v3293_v3 }
 0x1a5   :  { %5036 = vst [vmem:[#allocation98_spill] sm:$0xff] %v3547_v57  ;;  %v3568_v57 = vmul.f32 %v3442_v39, %v3283_v38  ;;  %5041 = vst [vmem:[#allocation103_spill] sm:$0xff] %v3572_v63  ;;  %v1040_v63 = vstv %s3490_s27  ;;  %s4244_s27 = sld [smem:[#allocation3 + $0x4e]] }
 0x1a6   :  { %5042 = vst [vmem:[#allocation104_spill] sm:$0xff] %v3576_v21  ;;  %5043 = vst [vmem:[#allocation105_spill] sm:$0xff] %v3580_v28  ;;  %1293 = vrot.lane.b32.xlu1 %v1282_v0, %s2660_s8  ;;  %1291 = vrot.lane.b32.xlu0 %v1281_v6, %s2660_s8  ;;  %v3598_v21 = vmul.f32 %v3446_v53, %v3293_v3  ;;  %v3602_v28 = vmul.f32 %v3453_v27, %v3349_v41 }
 0x1a7   :  { %5040 = vst [vmem:[#allocation102_spill] sm:$0xff] %v3568_v57  ;;  %5044 = vst [vmem:[#allocation106_spill] sm:$0xff] %v3584_v52  ;;  %v3592_v57 = vmul.f32 %v3442_v39, %v3295_v7  ;;  %v3606_v52 = vmul.f32 %v3446_v53, %v3295_v7  ;;  %v3611_v39 = vmul.f32 %v3453_v27, %v3351_v16 }
 0x1a8   :  { %5045 = vst [vmem:[#allocation107_spill] sm:$0xff] %v3598_v21  ;;  %5046 = vst [vmem:[#allocation108_spill] sm:$0xff] %v3602_v28  ;;  %v3615_v6 = vmul.f32 %v3456_v20, %v3281_v42  ;;  %v3619_v0 = vmul.f32 %v3456_v20, %v3283_v38  ;;  %v3623_v28 = vmul.f32 %v3458_v44, %v3281_v42  ;;  %v3625_v53 = vpop.permute.xlu1 %793 }
 0x1a9   :  { %5047 = vst [vmem:[#allocation109_spill] sm:$0xff] %v3606_v52  ;;  %5048 = vst [vmem:[#allocation110_spill] sm:$0xff] %v3611_v39  ;;  %v3627_v52 = vpop.permute.xlu0 %791  ;;  %v3631_v27 = vmul.f32 %v3474_v59, %v3337_v60  ;;  %v3635_v16 = vmul.f32 %v3458_v44, %v3283_v38  ;;  %v3639_v39 = vmul.f32 %v3474_v59, %v3339_v46 }
 0x1aa   :  { %5049 = vst [vmem:[#allocation111_spill] sm:$0xff] %v3623_v28  ;;  %v3643_v28 = vmul.f32 %v3456_v20, %v3293_v3  ;;  %v3647_v21 = vmul.f32 %v3456_v20, %v3295_v7  ;;  %v3651_v60 = vmul.f32 %v3458_v44, %v3293_v3  ;;  %v3659_v46 = vmul.f32 %v3458_v44, %v3295_v7 }
 0x1ab   :  { %5050 = vst [vmem:[#allocation112_spill] sm:$0xff] %v3631_v27  ;;  %5051 = vst [vmem:[#allocation113_spill] sm:$0xff] %v3635_v16  ;;  %v3655_v27 = vmul.f32 %v3474_v59, %v3349_v41  ;;  %1315 = vrot.lane.b32.xlu1 %v1306_v5, %s2660_s8  ;;  %1313 = vrot.lane.b32.xlu0 %v1305_v47, %s2660_s8  ;;  %v3665_v20 = vmul.f32 %v3480_v43, %v3281_v42 }
 0x1ac   :  { %5052 = vst [vmem:[#allocation114_spill] sm:$0xff] %v3639_v39  ;;  %5053 = vst [vmem:[#allocation115_spill] sm:$0xff] %v3651_v60  ;;  %v3669_v3 = vmul.f32 %v3480_v43, %v3283_v38  ;;  %v3673_v41 = vmul.f32 %v3488_v35, %v3393_v34  ;;  %v3679_v44 = vmul.f32 %v1040_v63, %v3450_v49  ;;  %v3692_v38 = vpop.permute.xlu1 %815 }
 0x1ad   :  { %5054 = vst [vmem:[#allocation116_spill] sm:$0xff] %v3655_v27  ;;  %5055 = vst [vmem:[#allocation117_spill] sm:$0xff] %v3659_v46  ;;  %v3676_v27 = vstv %s3544_s7  ;;  %v3683_v47 = vmul.f32 %v3488_v35, %v3395_v62  ;;  %v3686_v5 = vmul.f32 %v1040_v63, %v3466_v10  ;;  %v3690_v42 = vmul.f32 %v3488_v35, %v3407_v45  ;;  %v3694_v7 = vpop.permute.xlu0 %813  ;;  %s4246_s7 = sld [smem:[#allocation3 + $0x57]] }
 0x1ae   :  { %5056 = vst [vmem:[#allocation118_spill] sm:$0xff] %v3665_v20  ;;  %5057 = vst [vmem:[#allocation119_spill] sm:$0xff] %v3669_v3  ;;  %v3697_v43 = vmul.f32 %v1040_v63, %v3468_v61  ;;  %v3701_v46 = vmul.f32 %v3488_v35, %v3409_v48  ;;  %v3704_v60 = vmul.f32 %v1040_v63, %v3470_v30  ;;  %v5069_v30 = vld [vmem:[#allocation20_spill] sm:$0xff] }
 0x1af   :  { %5058 = vst [vmem:[#allocation120_spill] sm:$0xff] %v3676_v27  ;;  %v3708_v3 = vmul.f32 %v3542_v11, %v3393_v34  ;;  %v331_v20 = vadd.f32 %v3131_v54, %v2965_v8  ;;  %v3714_v59 = vmul.f32 %v3676_v27, %v3450_v49  ;;  %v3718_v39 = vmul.f32 %v3542_v11, %v3395_v62 }
 0x1b0   :  { %v3722_v35 = vmul.f32 %v3676_v27, %v3466_v10  ;;  %v332_v63 = vadd.f32 %v3133_v58, %v2967_v9  ;;  %v334_v34 = vadd.f32 %v3139_v31, %v2989_v23  ;;  %v333_v8 = vadd.f32 %v3141_v24, %v2991_v26  ;;  %1319 = vrot.lane.b32.xlu1 %v3494_v40, %s2660_s8  ;;  %v5061_v31 = vld [vmem:[#allocation12_spill] sm:$0xff]  ;;  %v5062_v24 = vld [vmem:[#allocation14_spill] sm:$0xff]  ;;  %v5063_v40 = vld [vmem:[#allocation13_spill] sm:$0xff]  ;;  %v3750_v49 = vpop.permute.xlu1 %819 }
 0x1b1   :  { %5059 = vst [vmem:[#allocation121_spill] sm:$0xff] %v3714_v59  ;;  %1317 = vrot.lane.b32.xlu0 %v3497_v36, %s2660_s8  ;;  %v358_v54 = vadd.f32 %v3147_v55, %v2983_v17  ;;  %v357_v10 = vadd.f32 %v3149_v56, %v2985_v18  ;;  %v360_v9 = vadd.f32 %v3155_v12, %v3007_v37  ;;  %v5064_v17 = vld [vmem:[#allocation15_spill] sm:$0xff]  ;;  %v3752_v18 = vpop.permute.xlu0 %817  ;;  %v5065_v37 = vld [vmem:[#allocation16_spill] sm:$0xff]  ;;  %v5066_v12 = vld [vmem:[#allocation17_spill] sm:$0xff] }
 0x1b2   :  { %5060 = vst [vmem:[#allocation122_spill] sm:$0xff] %v3722_v35  ;;  %v359_v23 = vadd.f32 %v3157_v14, %v3028_v2  ;;  %v384_v26 = vadd.f32 %v3163_v19, %v3038_v29  ;;  %v383_v58 = vadd.f32 %v3165_v22, %v3043_v25  ;;  %v386_v36 = vadd.f32 %v5062_v24, %v5061_v31  ;;  %v5067_v14 = vld [vmem:[#allocation18_spill] sm:$0xff]  ;;  %v5068_v29 = vld [vmem:[#allocation19_spill] sm:$0xff]  ;;  %v5070_v22 = vld [vmem:[#allocation21_spill] sm:$0xff] }
 0x1b3   :  { %v385_v55 = vadd.f32 %v5064_v17, %v5063_v40  ;;  %v410_v56 = vadd.f32 %v5065_v37, %v332_v63  ;;  %v409_v2 = vadd.f32 %v5066_v12, %v331_v20  ;;  %v412_v62 = vadd.f32 %v5067_v14, %v334_v34  ;;  %v5071_v31 = vld [vmem:[#allocation22_spill] sm:$0xff]  ;;  %v5072_v40 = vld [vmem:[#allocation88_spill] sm:$0xff]  ;;  %v5073_v17 = vld [vmem:[#allocation23_spill] sm:$0xff] }
 0x1b4   :  { %v411_v19 = vadd.f32 %v5068_v29, %v333_v8  ;;  %v436_v25 = vadd.f32 %v5069_v30, %v358_v54  ;;  %v435_v27 = vadd.f32 %v5070_v22, %v357_v10  ;;  %v438_v24 = vadd.f32 %v5071_v31, %v360_v9  ;;  %1341 = vrot.lane.b32.xlu1 %v5072_v40, %s2660_s8  ;;  %v5074_v37 = vld [vmem:[#allocation24_spill] sm:$0xff]  ;;  %v5076_v14 = vld [vmem:[#allocation29_spill] sm:$0xff]  ;;  %v5078_v54 = vld [vmem:[#allocation26_spill] sm:$0xff]  ;;  %v3773_v40 = vpop.permute.xlu1 %841 }
 0x1b5   :  { %1339 = vrot.lane.b32.xlu0 %v3507_v13, %s2660_s8  ;;  %v437_v63 = vadd.f32 %v5073_v17, %v359_v23  ;;  %v462_v20 = vadd.f32 %v5074_v37, %v384_v26  ;;  %v5075_v12 = vld [vmem:[#allocation28_spill] sm:$0xff]  ;;  %v487_v8 = vadd.f32 %v5076_v14, %v409_v2  ;;  %v5077_v29 = vld [vmem:[#allocation25_spill] sm:$0xff]  ;;  %v464_v10 = vadd.f32 %v5078_v54, %v386_v36  ;;  %v5079_v22 = vld [vmem:[#allocation27_spill] sm:$0xff]  ;;  %v3775_v16 = vpop.permute.xlu0 %839 }
 0x1b6   :  { %v488_v34 = vadd.f32 %v5075_v12, %v410_v56  ;;  %v461_v30 = vadd.f32 %v5077_v29, %v383_v58  ;;  %v463_v9 = vadd.f32 %v5079_v22, %v385_v55  ;;  %v5080_v31 = vld [vmem:[#allocation30_spill] sm:$0xff]  ;;  %v5081_v13 = vld [vmem:[#allocation31_spill] sm:$0xff]  ;;  %v5082_v17 = vld [vmem:[#allocation32_spill] sm:$0xff] }
 0x1b7   :  { %v490_v61 = vadd.f32 %v5080_v31, %v412_v62  ;;  %v489_v23 = vadd.f32 %v5081_v13, %v411_v19  ;;  %v514_v26 = vadd.f32 %v5082_v17, %v436_v25  ;;  %v5083_v37 = vld [vmem:[#allocation40_spill] sm:$0xff]  ;;  %v5084_v12 = vld [vmem:[#allocation41_spill] sm:$0xff]  ;;  %v5086_v29 = vld [vmem:[#allocation34_spill] sm:$0xff] }
 0x1b8   :  { %v566_v56 = vadd.f32 %v5083_v37, %v488_v34  ;;  %v565_v2 = vadd.f32 %v5084_v12, %v487_v8  ;;  %v5085_v14 = vld [vmem:[#allocation33_spill] sm:$0xff]  ;;  %v516_v36 = vadd.f32 %v5086_v29, %v438_v24  ;;  %v5087_v54 = vld [vmem:[#allocation35_spill] sm:$0xff]  ;;  %1345 = vrot.lane.b32.xlu1 %v3510_v15, %s2660_s8  ;;  %v5088_v62 = vld [vmem:[#allocation36_spill] sm:$0xff]  ;;  %v3796_v15 = vpop.permute.xlu1 %845 }
 0x1b9   :  { %v513_v58 = vadd.f32 %v5085_v14, %v435_v27  ;;  %v515_v55 = vadd.f32 %v5087_v54, %v437_v63  ;;  %1343 = vrot.lane.b32.xlu0 %v3513_v33, %s2660_s8  ;;  %v540_v19 = vadd.f32 %v5088_v62, %v462_v20  ;;  %v5089_v22 = vld [vmem:[#allocation37_spill] sm:$0xff]  ;;  %v5090_v31 = vld [vmem:[#allocation54_spill] sm:$0xff]  ;;  %v5091_v13 = vld [vmem:[#allocation55_spill] sm:$0xff]  ;;  %v3798_v54 = vpop.permute.xlu0 %843 }
 0x1ba   :  { %v539_v25 = vadd.f32 %v5089_v22, %v461_v30  ;;  %v644_v34 = vadd.f32 %v5090_v31, %v566_v56  ;;  %v643_v8 = vadd.f32 %v5091_v13, %v565_v2  ;;  %v5092_v17 = vld [vmem:[#allocation38_spill] sm:$0xff]  ;;  %v5093_v37 = vld [vmem:[#allocation39_spill] sm:$0xff]  ;;  %v5100_v13 = vld [vmem:[#allocation48_spill] sm:$0xff] }
 0x1bb   :  { %v542_v27 = vadd.f32 %v5092_v17, %v464_v10  ;;  %v541_v24 = vadd.f32 %v5093_v37, %v463_v9  ;;  %v5094_v12 = vld [vmem:[#allocation42_spill] sm:$0xff]  ;;  %v5095_v14 = vld [vmem:[#allocation43_spill] sm:$0xff]  ;;  %v594_v10 = vadd.f32 %v5100_v13, %v516_v36  ;;  %v5101_v17 = vld [vmem:[#allocation49_spill] sm:$0xff] }
 0x1bc   :  { %v568_v63 = vadd.f32 %v5094_v12, %v490_v61  ;;  %v567_v29 = vadd.f32 %v5095_v14, %v489_v23  ;;  %v5096_v33 = vld [vmem:[#allocation46_spill] sm:$0xff]  ;;  %v5097_v62 = vld [vmem:[#allocation47_spill] sm:$0xff]  ;;  %v593_v9 = vadd.f32 %v5101_v17, %v515_v55  ;;  %v5104_v12 = vld [vmem:[#allocation92_spill] sm:$0xff] }
 0x1bd   :  { %v592_v20 = vadd.f32 %v5096_v33, %v514_v26  ;;  %v591_v30 = vadd.f32 %v5097_v62, %v513_v58  ;;  %v5098_v22 = vld [vmem:[#allocation70_spill] sm:$0xff]  ;;  %v5099_v31 = vld [vmem:[#allocation71_spill] sm:$0xff]  ;;  %1365 = vrot.lane.b32.xlu0 %v5104_v12, %s2660_s8 }
 0x1be   :  { %v722_v56 = vadd.f32 %v5098_v22, %v644_v34  ;;  %v721_v2 = vadd.f32 %v5099_v31, %v643_v8  ;;  %v5102_v37 = vld [vmem:[#allocation50_spill] sm:$0xff]  ;;  %v5103_v23 = vld [vmem:[#allocation91_spill] sm:$0xff]  ;;  %v5108_v22 = vld [vmem:[#allocation52_spill] sm:$0xff] }
 0x1bf   :  { %v618_v61 = vadd.f32 %v5102_v37, %v540_v19  ;;  %1367 = vrot.lane.b32.xlu1 %v5103_v23, %s2660_s8  ;;  %v5105_v14 = vld [vmem:[#allocation58_spill] sm:$0xff]  ;;  %v5106_v33 = vld [vmem:[#allocation59_spill] sm:$0xff]  ;;  %v620_v55 = vadd.f32 %v5108_v22, %v542_v27  ;;  %v5109_v31 = vld [vmem:[#allocation53_spill] sm:$0xff]  ;;  %v868_v37 = vpop.permute.xlu1 %867  ;;  %v866_v23 = vpop.permute.xlu0 %865 }
 0x1c0   :  { %v646_v26 = vadd.f32 %v5105_v14, %v568_v63  ;;  %v645_v58 = vadd.f32 %v5106_v33, %v567_v29  ;;  %v800_v34 = vadd.f32 %v3558_v51, %v722_v56  ;;  %v799_v8 = vadd.f32 %v3560_v50, %v721_v2  ;;  %v5107_v62 = vld [vmem:[#allocation51_spill] sm:$0xff]  ;;  %v5110_v13 = vld [vmem:[#allocation62_spill] sm:$0xff]  ;;  %v5114_v56 = vld [vmem:[#allocation64_spill] sm:$0xff] }
 0x1c1   :  { %v617_v36 = vadd.f32 %v5107_v62, %v539_v25  ;;  %v619_v19 = vadd.f32 %v5109_v31, %v541_v24  ;;  %v670_v17 = vadd.f32 %v5110_v13, %v592_v20  ;;  %v5111_v35 = vld [vmem:[#allocation74_spill] sm:$0xff]  ;;  %v5112_v59 = vld [vmem:[#allocation75_spill] sm:$0xff]  ;;  %v672_v50 = vadd.f32 %v5114_v56, %v594_v10  ;;  %v5115_v2 = vld [vmem:[#allocation65_spill] sm:$0xff] }
 0x1c2   :  { %v724_v12 = vadd.f32 %v5111_v35, %v646_v26  ;;  %v723_v63 = vadd.f32 %v5112_v59, %v645_v58  ;;  %v878_v14 = vadd.f32 %v868_v37, %v800_v34  ;;  %v877_v29 = vadd.f32 %v866_v23, %v799_v8  ;;  %v5113_v33 = vld [vmem:[#allocation63_spill] sm:$0xff]  ;;  %v5116_v27 = vld [vmem:[#allocation97_spill] sm:$0xff]  ;;  %v5119_v34 = vld [vmem:[#allocation66_spill] sm:$0xff] }
 0x1c3   :  { %v669_v51 = vadd.f32 %v5113_v33, %v591_v30  ;;  %v671_v25 = vadd.f32 %v5115_v2, %v593_v9  ;;  %1371 = vrot.lane.b32.xlu1 %v3536_v32, %s2660_s8  ;;  %1369 = vrot.lane.b32.xlu0 %v5116_v27, %s2660_s8  ;;  %v5117_v20 = vld [vmem:[#allocation93_spill] sm:$0xff]  ;;  %v5118_v26 = vld [vmem:[#allocation95_spill] sm:$0xff]  ;;  %v696_v30 = vadd.f32 %v5119_v34, %v618_v61  ;;  %v5121_v62 = vld [vmem:[#allocation76_spill] sm:$0xff]  ;;  %v872_v32 = vpop.permute.xlu1 %871  ;;  %v870_v13 = vpop.permute.xlu0 %869 }
 0x1c4   :  { %v802_v24 = vadd.f32 %v3625_v53, %v724_v12  ;;  %v801_v35 = vadd.f32 %v3627_v52, %v723_v63  ;;  %v956_v59 = vadd.f32 %v5117_v20, %v878_v14  ;;  %v955_v58 = vadd.f32 %v5118_v26, %v877_v29  ;;  %v5120_v8 = vld [vmem:[#allocation67_spill] sm:$0xff]  ;;  %v5122_v22 = vld [vmem:[#allocation77_spill] sm:$0xff]  ;;  %v5123_v37 = vld [vmem:[#allocation94_spill] sm:$0xff] }
 0x1c5   :  { %v695_v10 = vadd.f32 %v5120_v8, %v617_v36  ;;  %v748_v9 = vadd.f32 %v5121_v62, %v670_v17  ;;  %v747_v31 = vadd.f32 %v5122_v22, %v669_v51  ;;  %v5124_v33 = vld [vmem:[#allocation96_spill] sm:$0xff]  ;;  %v5125_v63 = vld [vmem:[#allocation78_spill] sm:$0xff]  ;;  %v5131_v20 = vld [vmem:[#allocation81_spill] sm:$0xff] }
 0x1c6   :  { %v986_v23 = vadd.f32 %v5123_v37, %v956_v59  ;;  %v985_v53 = vadd.f32 %v5124_v33, %v955_v58  ;;  %v880_v12 = vadd.f32 %v872_v32, %v802_v24  ;;  %v879_v52 = vadd.f32 %v870_v13, %v801_v35  ;;  %v5126_v36 = vld [vmem:[#allocation102_spill] sm:$0xff]  ;;  %v5128_v56 = vld [vmem:[#allocation100_spill] sm:$0xff]  ;;  %v5130_v35 = vld [vmem:[#allocation79_spill] sm:$0xff] }
 0x1c7   :  { %v750_v14 = vadd.f32 %v5125_v63, %v672_v50  ;;  %v826_v29 = vadd.f32 %v3692_v38, %v748_v9  ;;  %v825_v61 = vadd.f32 %v3694_v7, %v747_v31  ;;  %1393 = vrot.lane.b32.xlu1 %v3564_v1, %s2661_s28  ;;  %1391 = vrot.lane.b32.xlu0 %v5126_v36, %s2661_s28  ;;  %v5127_v17 = vld [vmem:[#allocation98_spill] sm:$0xff]  ;;  %v5129_v24 = vld [vmem:[#allocation68_spill] sm:$0xff]  ;;  %v894_v26 = vpop.permute.xlu1 %893  ;;  %v892_v58 = vpop.permute.xlu0 %891  ;;  %v5132_v34 = vld [vmem:[#allocation99_spill] sm:$0xff] }
 0x1c8   :  { %v958_v51 = vadd.f32 %v5127_v17, %v880_v12  ;;  %v957_v2 = vadd.f32 %v5128_v56, %v879_v52  ;;  %v1016_v27 = vadd.f32 %v3673_v41, %v986_v23  ;;  %v1015_v50 = vadd.f32 %v3683_v47, %v985_v53  ;;  %v5133_v62 = vld [vmem:[#allocation101_spill] sm:$0xff]  ;;  %v5137_v23 = vld [vmem:[#allocation82_spill] sm:$0xff]  ;;  %v5139_v52 = vld [vmem:[#allocation104_spill] sm:$0xff] }
 0x1c9   :  { %v698_v38 = vadd.f32 %v5129_v24, %v620_v55  ;;  %v749_v7 = vadd.f32 %v5130_v35, %v671_v25  ;;  %v774_v59 = vadd.f32 %v5131_v20, %v696_v30  ;;  %v828_v1 = vadd.f32 %v3750_v49, %v750_v14  ;;  %v5134_v55 = vld [vmem:[#allocation103_spill] sm:$0xff]  ;;  %v5135_v30 = vld [vmem:[#allocation105_spill] sm:$0xff]  ;;  %v5140_v14 = vld [vmem:[#allocation106_spill] sm:$0xff] }
 0x1ca   :  { %v988_v8 = vadd.f32 %v5132_v34, %v958_v51  ;;  %v987_v9 = vadd.f32 %v5133_v62, %v957_v2  ;;  %v904_v22 = vadd.f32 %v894_v26, %v826_v29  ;;  %v903_v31 = vadd.f32 %v892_v58, %v825_v61  ;;  %v5142_v51 = vld [vmem:[#allocation109_spill] sm:$0xff]  ;;  %v5143_v2 = vld [vmem:[#allocation90_spill] sm:$0xff]  ;;  %v5148_v34 = vld [vmem:[#allocation111_spill] sm:$0xff] }
 0x1cb   :  { %v827_v41 = vadd.f32 %v3752_v18, %v749_v7  ;;  %1397 = vrot.lane.b32.xlu1 %v3588_v4, %s2661_s28  ;;  %1395 = vrot.lane.b32.xlu0 %v3592_v57, %s2661_s28  ;;  %v3863_v47 = vadd.f32 %v3679_v44, %v1016_v27  ;;  %v3866_v49 = vadd.f32 %v3686_v5, %v1015_v50  ;;  %v5136_v4 = vld [vmem:[#allocation69_spill] sm:$0xff]  ;;  %v898_v53 = vpop.permute.xlu1 %897  ;;  %v896_v12 = vpop.permute.xlu0 %895  ;;  %v5145_v7 = vld [vmem:[#allocation110_spill] sm:$0xff] }
 0x1cc   :  { %v966_v25 = vadd.f32 %v5134_v55, %v904_v22  ;;  %v965_v32 = vadd.f32 %v5135_v30, %v903_v31  ;;  %v1018_v18 = vadd.f32 %v3690_v42, %v988_v8  ;;  %v1017_v13 = vadd.f32 %v3701_v46, %v987_v9  ;;  %v5138_v44 = vld [vmem:[#allocation89_spill] sm:$0xff]  ;;  %v5147_v26 = vld [vmem:[#allocation122_spill] sm:$0xff]  ;;  %v5151_v55 = vld [vmem:[#allocation120_spill] sm:$0xff] }
 0x1cd   :  { %v697_v37 = vadd.f32 %v5136_v4, %v619_v19  ;;  %v773_v57 = vadd.f32 %v5137_v23, %v695_v10  ;;  %v776_v33 = vadd.f32 %v5138_v44, %v698_v38  ;;  %v852_v5 = vadd.f32 %v3773_v40, %v774_v59  ;;  %v5141_v10 = vld [vmem:[#allocation107_spill] sm:$0xff]  ;;  %v5144_v38 = vld [vmem:[#allocation108_spill] sm:$0xff]  ;;  %v5149_v62 = vld [vmem:[#allocation113_spill] sm:$0xff] }
 0x1ce   :  { %v996_v63 = vadd.f32 %v5139_v52, %v966_v25  ;;  %v995_v29 = vadd.f32 %v5140_v14, %v965_v32  ;;  %v906_v61 = vadd.f32 %v898_v53, %v828_v1  ;;  %v905_v36 = vadd.f32 %v896_v12, %v827_v41  ;;  %v5153_v32 = vld [vmem:[#allocation72_spill] sm:$0xff]  ;;  %v5157_v53 = vld [vmem:[#allocation61_spill] sm:$0xff]  ;;  %v5158_v12 = vld [vmem:[#allocation86_spill] sm:$0xff] }
 0x1cf   :  { %v851_v42 = vadd.f32 %v3775_v16, %v773_v57  ;;  %1419 = vrot.lane.b32.xlu1 %v3615_v6, %s2661_s28  ;;  %1417 = vrot.lane.b32.xlu0 %v3619_v0, %s2661_s28  ;;  %v3886_v46 = vadd.f32 %v3697_v43, %v1018_v18  ;;  %v3889_v40 = vadd.f32 %v3704_v60, %v1017_v13  ;;  %v1030_v19 = vstv %s3845_s9  ;;  %v920_v27 = vpop.permute.xlu1 %919  ;;  %v918_v50 = vpop.permute.xlu0 %917  ;;  %v5154_v13 = vld [vmem:[#allocation73_spill] sm:$0xff]  ;;  %v5156_v57 = vld [vmem:[#allocation114_spill] sm:$0xff]  ;;  %v5160_v14 = vld [vmem:[#allocation119_spill] sm:$0xff]  ;;  %s2580_s9 = sld [smem:[#allocation3 + $0x22]] }
 0x1d0   :  { %v968_v17 = vadd.f32 %v5141_v10, %v906_v61  ;;  %v967_v56 = vadd.f32 %v5142_v51, %v905_v36  ;;  %v1026_v16 = vadd.f32 %v3708_v3, %v996_v63  ;;  %v1025_v6 = vadd.f32 %v3718_v39, %v995_v29  ;;  %v5159_v63 = vld [vmem:[#allocation118_spill] sm:$0xff] }
 0x1d1   :  { %v775_v0 = vadd.f32 %v5143_v2, %v697_v37  ;;  %v854_v43 = vadd.f32 %v3796_v15, %v776_v33  ;;  %v1024_v60 = vmul.f32 %v3542_v11, %v3407_v45  ;;  %v1023_v24 = vmul.f32 %v3542_v11, %v3409_v48  ;;  %v5146_v15 = vld [vmem:[#allocation121_spill] sm:$0xff]  ;;  %v5155_v37 = vld [vmem:[#allocation112_spill] sm:$0xff] }
 0x1d2   :  { %v998_v35 = vadd.f32 %v5144_v38, %v968_v17  ;;  %v997_v20 = vadd.f32 %v5145_v7, %v967_v56  ;;  %v930_v3 = vadd.f32 %v920_v27, %v852_v5  ;;  %v929_v59 = vadd.f32 %v918_v50, %v851_v42  ;;  %v5161_v42 = vld [vmem:[#allocation115_spill] sm:$0xff]  ;;  %v5162_v17 = vld [vmem:[#allocation117_spill] sm:$0xff] }
 0x1d3   :  { %v853_v39 = vadd.f32 %v3798_v54, %v775_v0  ;;  %1423 = vrot.lane.b32.xlu1 %v3643_v28, %s2661_s28  ;;  %1421 = vrot.lane.b32.xlu0 %v3647_v21, %s2661_s28  ;;  %v3912_v1 = vadd.f32 %v5146_v15, %v1026_v16  ;;  %v3915_v58 = vadd.f32 %v5147_v26, %v1025_v6  ;;  %v1060_v11 = vstv %s3868_s10  ;;  %v924_v31 = vpop.permute.xlu1 %923  ;;  %v922_v41 = vpop.permute.xlu0 %921  ;;  %v5150_v28 = vld [vmem:[#allocation84_spill] sm:$0xff]  ;;  %v5152_v21 = vld [vmem:[#allocation85_spill] sm:$0xff]  ;;  %s4248_s10 = sld [smem:[#allocation3 + $0x50]] }
 0x1d4   :  { %v976_v8 = vadd.f32 %v5148_v34, %v930_v3  ;;  %v975_v9 = vadd.f32 %v5149_v62, %v929_v59  ;;  %v1028_v22 = vadd.f32 %v1024_v60, %v998_v35  ;;  %v1027_v54 = vadd.f32 %v1023_v24, %v997_v20  ;;  %v5163_v0 = vld [vmem:[#allocation44_spill] sm:$0xff]  ;;  %v5165_v50 = vld [vmem:[#allocation45_spill] sm:$0xff]  ;;  %v5167_v35 = vld [vmem:[#allocation83_spill] sm:$0xff] }
 0x1d5   :  { %v1054_v25 = vmul.f32 %v5151_v55, %v5150_v28  ;;  %v1053_v30 = vmul.f32 %v5151_v55, %v5152_v21  ;;  %v1032_v18 = vmul.f32 %v1030_v19, %v5153_v32  ;;  %v1031_v4 = vmul.f32 %v1030_v19, %v5154_v13  ;;  %v5166_v24 = vld [vmem:[#allocation80_spill] sm:$0xff]  ;;  %v5170_v55 = vld [vmem:[#allocation57_spill] sm:$0xff] }
 0x1d6   :  { %v1006_v23 = vadd.f32 %v5155_v37, %v976_v8  ;;  %v1005_v44 = vadd.f32 %v5156_v57, %v975_v9  ;;  %v932_v33 = vadd.f32 %v924_v31, %v854_v43  ;;  %v931_v5 = vadd.f32 %v922_v41, %v853_v39  ;;  %v5164_v43 = vld [vmem:[#allocation87_spill] sm:$0xff]  ;;  %v5168_v20 = vld [vmem:[#allocation116_spill] sm:$0xff] }
 0x1d7   :  { %v1003_v52 = vmul.f32 %v5158_v12, %v5157_v53  ;;  %1445 = vrot.lane.b32.xlu1 %v5159_v63, %s2661_s28  ;;  %1443 = vrot.lane.b32.xlu0 %v5160_v14, %s2661_s28  ;;  %v1460_v29 = vstv %s3891_s11  ;;  %v3935_v61 = vadd.f32 %v1054_v25, %v1028_v22  ;;  %v3937_v36 = vadd.f32 %v1053_v30, %v1027_v54  ;;  %v3941_v6 = vpop.permute.xlu1 %1081  ;;  %v3943_v2 = vpop.permute.xlu0 %1079  ;;  %v5169_v41 = vld [vmem:[#allocation56_spill] sm:$0xff]  ;;  %s4256_s11 = sld [smem:[#allocation3 + $0x46]] }
 0x1d8   :  { %v978_v10 = vadd.f32 %v5161_v42, %v932_v33  ;;  %v977_v51 = vadd.f32 %v5162_v17, %v931_v5  ;;  %v1036_v56 = vadd.f32 %v1032_v18, %v1006_v23  ;;  %v1035_v16 = vadd.f32 %v1031_v4, %v1005_v44 }
 0x1d9   :  { %v1438_v27 = vmul.f32 %v5164_v43, %v5163_v0  ;;  %v1437_v60 = vmul.f32 %v5164_v43, %v5165_v50  ;;  %v1062_v38 = vmul.f32 %v1060_v11, %v5166_v24  ;;  %v1061_v7 = vmul.f32 %v1060_v11, %v5167_v35 }
 0x1da   :  { %v1008_v3 = vadd.f32 %v5168_v20, %v978_v10  ;;  %v1007_v59 = vadd.f32 %v1003_v52, %v977_v51  ;;  %v1034_v39 = vmul.f32 %v1030_v19, %v3407_v45  ;;  %v1033_v15 = vmul.f32 %v1030_v19, %v3409_v48 }
 0x1db   :  { %1449 = vrot.lane.b32.xlu1 %v1438_v27, %s2661_s28  ;;  %1447 = vrot.lane.b32.xlu0 %v1437_v60, %s2661_s28  ;;  %v3956_v26 = vadd.f32 %v1062_v38, %v1036_v56  ;;  %v3958_v34 = vadd.f32 %v1061_v7, %v1035_v16  ;;  %v1064_v62 = vmul.f32 %v1060_v11, %v5150_v28  ;;  %v3962_v54 = vpop.permute.xlu1 %1085  ;;  %v3964_v31 = vpop.permute.xlu0 %1083  ;;  %v1486_v44 = vstv %s2551_s12  ;;  %s4258_s12 = sld [smem:[#allocation3 + $0x6a]] }
 0x1dc   :  { %v1038_v8 = vadd.f32 %v1034_v39, %v1008_v3  ;;  %v1037_v9 = vadd.f32 %v1033_v15, %v1007_v59  ;;  %v1063_v22 = vmul.f32 %v1060_v11, %v5152_v21  ;;  %v1462_v19 = vmul.f32 %v1460_v29, %v5169_v41  ;;  %v5173_v11 = vld [vmem:[#allocation60_spill] sm:$0xff] }
 0x1dd   :  { %v1461_v25 = vmul.f32 %v1460_v29, %v5170_v55  ;;  %v1464_v23 = vmul.f32 %v1460_v29, %v5173_v11  ;;  %v1463_v57 = vmul.f32 %v1460_v29, %v5157_v53  ;;  %v1488_v12 = vmul.f32 %v1486_v44, %v5169_v41 }
 0x1de   :  { %v3968_v30 = vadd.f32 %v1064_v62, %v1038_v8  ;;  %v3970_v18 = vadd.f32 %v1063_v22, %v1037_v9  ;;  %v1487_v52 = vmul.f32 %v1486_v44, %v5170_v55  ;;  %v1490_v29 = vmul.f32 %v1486_v44, %v5173_v11 }
 0x1df   :  { %1471 = vrot.lane.b32.xlu1 %v1462_v19, %s2661_s28  ;;  %1469 = vrot.lane.b32.xlu0 %v1461_v25, %s2661_s28  ;;  %v3974_v4 = vpop.permute.xlu1 %1107  ;;  %v3976_v37 = vpop.permute.xlu0 %1105  ;;  %v1489_v42 = vmul.f32 %v1486_v44, %v5157_v53  ;;  %v1512_v10 = vstv %s2552_s13  ;;  %v1538_v60 = vstv %s2553_s14  ;;  %s4262_s13 = sld [smem:[#allocation3 + $0x18]]  ;;  %s4283_s14 = sld [smem:[#allocation3 + $0x3c]] }
 0x1e0   :  { %5171 = vst [vmem:[#allocation12_spill] sm:$0xff] %v3968_v30  ;;  %5172 = vst [vmem:[#allocation14_spill] sm:$0xff] %v3970_v18  ;;  %v1514_v56 = vmul.f32 %v1512_v10, %v5169_v41  ;;  %v1513_v16 = vmul.f32 %v1512_v10, %v5170_v55  ;;  %v1516_v27 = vmul.f32 %v1512_v10, %v5173_v11  ;;  %v1564_v8 = vstv %s2554_s15  ;;  %s4324_s15 = sld [smem:[#allocation3 + $0x21]] }
 0x1e1   :  { %v1515_v50 = vmul.f32 %v1512_v10, %v5157_v53  ;;  %v1540_v20 = vmul.f32 %v1538_v60, %v5153_v32  ;;  %v1539_v3 = vmul.f32 %v1538_v60, %v5154_v13  ;;  %v1542_v39 = vmul.f32 %v1538_v60, %v3407_v45 }
 0x1e2   :  { %v1541_v15 = vmul.f32 %v1538_v60, %v3409_v48  ;;  %v1566_v22 = vmul.f32 %v1564_v8, %v5153_v32  ;;  %v1565_v41 = vmul.f32 %v1564_v8, %v5154_v13  ;;  %v1568_v25 = vmul.f32 %v1564_v8, %v3407_v45 }
 0x1e3   :  { %1475 = vrot.lane.b32.xlu1 %v1464_v23, %s2661_s28  ;;  %1473 = vrot.lane.b32.xlu0 %v1463_v57, %s2661_s28  ;;  %v3982_v33 = vpop.permute.xlu1 %1111  ;;  %v3984_v5 = vpop.permute.xlu0 %1109  ;;  %v1567_v11 = vmul.f32 %v1564_v8, %v3409_v48  ;;  %v1590_v23 = vstv %s2555_s16  ;;  %s4380_s16 = sld [smem:[#allocation3 + $0x45]] }
 0x1e4   :  { %v1594_v10 = vmul.f32 %v1590_v23, %v3407_v45 }
 0x1e7   :  { %1497 = vrot.lane.b32.xlu1 %v1488_v12, %s2661_s28  ;;  %1495 = vrot.lane.b32.xlu0 %v1487_v52, %s2661_s28  ;;  %v3990_v63 = vpop.permute.xlu1 %1133  ;;  %v3992_v14 = vpop.permute.xlu0 %1131  ;;  %v1592_v12 = vmul.f32 %v1590_v23, %v5153_v32  ;;  %v1591_v52 = vmul.f32 %v1590_v23, %v5154_v13 }
 0x1eb   :  { %1501 = vrot.lane.b32.xlu1 %v1490_v29, %s2661_s28  ;;  %1499 = vrot.lane.b32.xlu0 %v1489_v42, %s2661_s28  ;;  %v3998_v17 = vpop.permute.xlu1 %1137  ;;  %v4000_v51 = vpop.permute.xlu0 %1135 }
 0x1ec   :  { %5174 = vst [vmem:[#allocation13_spill] sm:$0xff] %v3998_v17  ;;  %5175 = vst [vmem:[#allocation15_spill] sm:$0xff] %v4000_v51 }
 0x1ef   :  { %1523 = vrot.lane.b32.xlu1 %v1514_v56, %s2661_s28  ;;  %1521 = vrot.lane.b32.xlu0 %v1513_v16, %s2661_s28  ;;  %v4006_v0 = vpop.permute.xlu1 %1159  ;;  %v4008_v43 = vpop.permute.xlu0 %1157  ;;  %v1593_v56 = vmul.f32 %v1590_v23, %v3409_v48  ;;  %v1616_v16 = vstv %s2556_s17  ;;  %s4706_s17 = sld [smem:[#allocation3 + $0x69]] }
 0x1f0   :  { %5176 = vst [vmem:[#allocation16_spill] sm:$0xff] %v4006_v0  ;;  %5177 = vst [vmem:[#allocation17_spill] sm:$0xff] %v4008_v43  ;;  %v1620_v60 = vmul.f32 %v1616_v16, %v5150_v28  ;;  %v4322_v43 = vstv %s4262_s13 }
 0x1f3   :  { %1527 = vrot.lane.b32.xlu1 %v1516_v27, %s2661_s28  ;;  %1525 = vrot.lane.b32.xlu0 %v1515_v50, %s2661_s28  ;;  %v4014_v38 = vpop.permute.xlu1 %1163  ;;  %v4016_v7 = vpop.permute.xlu0 %1161  ;;  %v1618_v27 = vmul.f32 %v1616_v16, %v5166_v24  ;;  %v1617_v50 = vmul.f32 %v1616_v16, %v5167_v35 }
 0x1f4   :  { %5178 = vst [vmem:[#allocation18_spill] sm:$0xff] %v4014_v38  ;;  %5179 = vst [vmem:[#allocation19_spill] sm:$0xff] %v4016_v7 }
 0x1f7   :  { %1549 = vrot.lane.b32.xlu1 %v1540_v20, %s2661_s28  ;;  %1547 = vrot.lane.b32.xlu0 %v1539_v3, %s2661_s28  ;;  %v4022_v59 = vpop.permute.xlu1 %1185  ;;  %v4024_v53 = vpop.permute.xlu0 %1183  ;;  %v1619_v20 = vmul.f32 %v1616_v16, %v5152_v21  ;;  %v1642_v3 = vstv %s2557_s18  ;;  %s4729_s18 = sld [smem:[#allocation3 + $0x11]] }
 0x1f8   :  { %5180 = vst [vmem:[#allocation20_spill] sm:$0xff] %v4022_v59  ;;  %5181 = vst [vmem:[#allocation21_spill] sm:$0xff] %v4024_v53  ;;  %v1644_v8 = vmul.f32 %v1642_v3, %v5166_v24  ;;  %v1645_v23 = vmul.f32 %v1642_v3, %v5152_v21 }
 0x1fb   :  { %1553 = vrot.lane.b32.xlu1 %v1542_v39, %s2661_s28  ;;  %1551 = vrot.lane.b32.xlu0 %v1541_v15, %s2661_s28  ;;  %v4030_v62 = vpop.permute.xlu1 %1189  ;;  %v4032_v9 = vpop.permute.xlu0 %1187 }
 0x1fc   :  { %5182 = vst [vmem:[#allocation22_spill] sm:$0xff] %v4030_v62  ;;  %5183 = vst [vmem:[#allocation88_spill] sm:$0xff] %v4032_v9  ;;  %v2090_v9 = vstv %s4256_s11  ;;  %v2116_v62 = vstv %s4258_s12 }
 0x1ff   :  { %1575 = vrot.lane.b32.xlu1 %v1566_v22, %s2661_s28  ;;  %1573 = vrot.lane.b32.xlu0 %v1565_v41, %s2661_s28  ;;  %v4038_v19 = vpop.permute.xlu1 %1211  ;;  %v4040_v55 = vpop.permute.xlu0 %1209  ;;  %v1643_v22 = vmul.f32 %v1642_v3, %v5167_v35 }
 0x200   :  { %5184 = vst [vmem:[#allocation23_spill] sm:$0xff] %v4038_v19  ;;  %5185 = vst [vmem:[#allocation24_spill] sm:$0xff] %v4040_v55  ;;  %v4306_v19 = vld [vmem:[#allocation2 + $0xaa] sm:$0xff] }
 0x201   :  { %5245 = vst [vmem:[#allocation103_spill] sm:$0xff] %v4306_v19  ;;  %v4343_v17 = vmul.f32 %v2090_v9, %v4306_v19 }
 0x203   :  { %1579 = vrot.lane.b32.xlu1 %v1568_v25, %s2661_s28  ;;  %1577 = vrot.lane.b32.xlu0 %v1567_v11, %s2661_s28  ;;  %v4046_v57 = vpop.permute.xlu1 %1215  ;;  %v4048_v44 = vpop.permute.xlu0 %1213  ;;  %v1646_v11 = vmul.f32 %v1642_v3, %v5150_v28  ;;  %v4108_v3 = vld [vmem:[#allocation2 + $0xa] sm:$0xff] }
 0x204   :  { %5186 = vst [vmem:[#allocation28_spill] sm:$0xff] %v4046_v57  ;;  %5187 = vst [vmem:[#allocation29_spill] sm:$0xff] %v4048_v44  ;;  %v4292_v44 = vstv %s4244_s27 }
 0x207   :  { %1601 = vrot.lane.b32.xlu1 %v1592_v12, %s2661_s28  ;;  %1599 = vrot.lane.b32.xlu0 %v1591_v52, %s2661_s28  ;;  %v4054_v29 = vpop.permute.xlu1 %1237  ;;  %v4056_v42 = vpop.permute.xlu0 %1235  ;;  %v1668_v12 = vstv %s2558_s19  ;;  %s2587_s19 = sld [smem:[#allocation3 + $0x35]] }
 0x208   :  { %5188 = vst [vmem:[#allocation25_spill] sm:$0xff] %v4054_v29  ;;  %5189 = vst [vmem:[#allocation26_spill] sm:$0xff] %v4056_v42  ;;  %v1669_v16 = vmul.f32 %v1668_v12, %v5167_v35 }
 0x20b   :  { %1605 = vrot.lane.b32.xlu1 %v1594_v10, %s2661_s28  ;;  %1603 = vrot.lane.b32.xlu0 %v1593_v56, %s2661_s28  ;;  %v4062_v32 = vpop.permute.xlu1 %1241  ;;  %v4064_v13 = vpop.permute.xlu0 %1239  ;;  %v1670_v56 = vmul.f32 %v1668_v12, %v5166_v24 }
 0x20c   :  { %5190 = vst [vmem:[#allocation27_spill] sm:$0xff] %v4062_v32  ;;  %5191 = vst [vmem:[#allocation30_spill] sm:$0xff] %v4064_v13  ;;  %v4287_v13 = vld [vmem:[#allocation2 + $0x4a] sm:$0xff]  ;;  %v4289_v32 = vld [vmem:[#allocation2 + $0xb2] sm:$0xff] }
 0x20d   :  { %5240 = vst [vmem:[#allocation68_spill] sm:$0xff] %v4287_v13  ;;  %5241 = vst [vmem:[#allocation79_spill] sm:$0xff] %v4289_v32  ;;  %v4349_v30 = vmul.f32 %v2116_v62, %v4287_v13 }
 0x20f   :  { %1627 = vrot.lane.b32.xlu1 %v1618_v27, %s2661_s28  ;;  %1625 = vrot.lane.b32.xlu0 %v1617_v50, %s2661_s28  ;;  %v4070_v45 = vpop.permute.xlu1 %1263  ;;  %v4072_v48 = vpop.permute.xlu0 %1261 }
 0x210   :  { %5192 = vst [vmem:[#allocation31_spill] sm:$0xff] %v4070_v45  ;;  %5193 = vst [vmem:[#allocation32_spill] sm:$0xff] %v4072_v48  ;;  %v2038_v48 = vstv %s4228_s26  ;;  %v2064_v45 = vstv %s2580_s9 }
 0x211   :  { %v4327_v0 = vmul.f32 %v2064_v45, %v4306_v19 }
 0x213   :  { %1631 = vrot.lane.b32.xlu1 %v1620_v60, %s2661_s28  ;;  %1629 = vrot.lane.b32.xlu0 %v1619_v20, %s2661_s28  ;;  %v4078_v39 = vpop.permute.xlu1 %1267  ;;  %v4080_v15 = vpop.permute.xlu0 %1265  ;;  %v1672_v60 = vmul.f32 %v1668_v12, %v5150_v28  ;;  %v1671_v20 = vmul.f32 %v1668_v12, %v5152_v21  ;;  %v4122_v21 = vld [vmem:[#allocation2 + $0x62] sm:$0xff] }
 0x214   :  { %5194 = vst [vmem:[#allocation40_spill] sm:$0xff] %v4078_v39  ;;  %5195 = vst [vmem:[#allocation41_spill] sm:$0xff] %v4080_v15  ;;  %v1710_v39 = vstv %s4226_s0 }
 0x215   :  { %5204 = vst [vmem:[#allocation39_spill] sm:$0xff] %v4122_v21 }
 0x217   :  { %1653 = vrot.lane.b32.xlu1 %v1644_v8, %s2661_s28  ;;  %1651 = vrot.lane.b32.xlu0 %v1643_v22, %s2661_s28  ;;  %v4086_v41 = vpop.permute.xlu1 %1289  ;;  %v4088_v25 = vpop.permute.xlu0 %1287  ;;  %v1830_v8 = vstv %s2571_s20  ;;  %v4110_v22 = vld [vmem:[#allocation2 + $0x2] sm:$0xff]  ;;  %s2588_s20 = sld [smem:[#allocation3 + $0x59]] }
 0x218   :  { %5196 = vst [vmem:[#allocation33_spill] sm:$0xff] %v4086_v41  ;;  %5197 = vst [vmem:[#allocation34_spill] sm:$0xff] %v4088_v25  ;;  %v1831_v28 = vmul.f32 %v1830_v8, %v4110_v22 }
 0x21b   :  { %1657 = vrot.lane.b32.xlu1 %v1646_v11, %s2661_s28  ;;  %1655 = vrot.lane.b32.xlu0 %v1645_v23, %s2661_s28  ;;  %v4094_v52 = vpop.permute.xlu1 %1293  ;;  %v4096_v10 = vpop.permute.xlu0 %1291  ;;  %v1832_v11 = vmul.f32 %v1830_v8, %v4108_v3  ;;  %v4120_v23 = vld [vmem:[#allocation2 + $0x6a] sm:$0xff] }
 0x21c   :  { %5198 = vst [vmem:[#allocation35_spill] sm:$0xff] %v4094_v52  ;;  %5199 = vst [vmem:[#allocation36_spill] sm:$0xff] %v4096_v10 }
 0x21f   :  { %1679 = vrot.lane.b32.xlu1 %v1670_v56, %s2661_s28  ;;  %1677 = vrot.lane.b32.xlu0 %v1669_v16, %s2661_s28  ;;  %v4102_v27 = vpop.permute.xlu1 %1315  ;;  %v4104_v50 = vpop.permute.xlu0 %1313  ;;  %v1834_v16 = vmul.f32 %v1830_v8, %v4120_v23 }
 0x220   :  { %5200 = vst [vmem:[#allocation37_spill] sm:$0xff] %v4102_v27  ;;  %5201 = vst [vmem:[#allocation54_spill] sm:$0xff] %v4104_v50  ;;  %v1740_v50 = vstv %s4230_s29  ;;  %v4273_v27 = vstv %s2583_s30 }
 0x223   :  { %1683 = vrot.lane.b32.xlu1 %v1672_v60, %s2661_s28  ;;  %1681 = vrot.lane.b32.xlu0 %v1671_v20, %s2661_s28  ;;  %v4114_v24 = vpop.permute.xlu1 %1319  ;;  %v4116_v35 = vpop.permute.xlu0 %1317  ;;  %v1833_v60 = vmul.f32 %v1830_v8, %v4122_v21  ;;  %v1856_v20 = vstv %s2572_s21  ;;  %s2589_s21 = sld [smem:[#allocation3 + $0x1a]] }
 0x224   :  { %5202 = vst [vmem:[#allocation55_spill] sm:$0xff] %v4114_v24  ;;  %5203 = vst [vmem:[#allocation38_spill] sm:$0xff] %v4116_v35 }
 0x227   :  { %1841 = vrot.lane.b32.xlu1 %v1832_v11, %s2660_s8  ;;  %1839 = vrot.lane.b32.xlu0 %v1831_v28, %s2660_s8  ;;  %v4126_v12 = vpop.permute.xlu1 %1341  ;;  %v4128_v56 = vpop.permute.xlu0 %1339  ;;  %v1858_v11 = vmul.f32 %v1856_v20, %v4108_v3  ;;  %v1857_v28 = vmul.f32 %v1856_v20, %v4110_v22 }
 0x228   :  { %5205 = vst [vmem:[#allocation42_spill] sm:$0xff] %v4126_v12  ;;  %5206 = vst [vmem:[#allocation43_spill] sm:$0xff] %v4128_v56  ;;  %v1882_v12 = vstv %s2573_s22  ;;  %s2590_s22 = sld [smem:[#allocation3 + $0x3e]] }
 0x22b   :  { %1845 = vrot.lane.b32.xlu1 %v1834_v16, %s2660_s8  ;;  %1843 = vrot.lane.b32.xlu0 %v1833_v60, %s2660_s8  ;;  %v4134_v35 = vpop.permute.xlu1 %1345  ;;  %v4136_v24 = vpop.permute.xlu0 %1343  ;;  %v1860_v16 = vmul.f32 %v1856_v20, %v4120_v23  ;;  %v1859_v60 = vmul.f32 %v1856_v20, %v4122_v21 }
 0x22c   :  { %5207 = vst [vmem:[#allocation46_spill] sm:$0xff] %v4134_v35  ;;  %5208 = vst [vmem:[#allocation47_spill] sm:$0xff] %v4136_v24 }
 0x22f   :  { %1867 = vrot.lane.b32.xlu1 %v1858_v11, %s2660_s8  ;;  %1865 = vrot.lane.b32.xlu0 %v1857_v28, %s2660_s8  ;;  %v4144_v8 = vpop.permute.xlu0 %1365  ;;  %v1884_v11 = vmul.f32 %v1882_v12, %v4108_v3  ;;  %v1883_v28 = vmul.f32 %v1882_v12, %v4110_v22 }
 0x230   :  { %5210 = vst [vmem:[#allocation71_spill] sm:$0xff] %v4144_v8 }
 0x231   :  { %v4142_v56 = vpop.permute.xlu1 %1367 }
 0x232   :  { %5209 = vst [vmem:[#allocation70_spill] sm:$0xff] %v4142_v56  ;;  %v4164_v56 = vld [vmem:[#allocation2 + $0x22] sm:$0xff] }
 0x233   :  { %1871 = vrot.lane.b32.xlu1 %v1860_v16, %s2660_s8  ;;  %1869 = vrot.lane.b32.xlu0 %v1859_v60, %s2660_s8  ;;  %v1886_v16 = vmul.f32 %v1882_v12, %v4120_v23  ;;  %v1885_v60 = vmul.f32 %v1882_v12, %v4122_v21  ;;  %5215 = vst [vmem:[#allocation92_spill] sm:$0xff] %v4164_v56  ;;  %v4178_v12 = vld [vmem:[#allocation2 + $0x7a] sm:$0xff] }
 0x234   :  { %5220 = vst [vmem:[#allocation53_spill] sm:$0xff] %v4178_v12 }
 0x235   :  { %v4150_v24 = vpop.permute.xlu1 %1371  ;;  %v4152_v35 = vpop.permute.xlu0 %1369 }
 0x236   :  { %5211 = vst [vmem:[#allocation48_spill] sm:$0xff] %v4150_v24  ;;  %5212 = vst [vmem:[#allocation49_spill] sm:$0xff] %v4152_v35  ;;  %v1908_v24 = vstv %s2574_s23  ;;  %v4166_v35 = vld [vmem:[#allocation2 + $0x1a] sm:$0xff]  ;;  %s2591_s23 = sld [smem:[#allocation3 + $0x62]] }
 0x237   :  { %1893 = vrot.lane.b32.xlu1 %v1884_v11, %s2660_s8  ;;  %1891 = vrot.lane.b32.xlu0 %v1883_v28, %s2660_s8  ;;  %5216 = vst [vmem:[#allocation58_spill] sm:$0xff] %v4166_v35  ;;  %v1910_v10 = vmul.f32 %v1908_v24, %v4164_v56  ;;  %v1909_v52 = vmul.f32 %v1908_v24, %v4166_v35 }
 0x239   :  { %v4158_v8 = vpop.permute.xlu1 %1393  ;;  %v4160_v20 = vpop.permute.xlu0 %1391 }
 0x23a   :  { %5213 = vst [vmem:[#allocation50_spill] sm:$0xff] %v4158_v8  ;;  %5214 = vst [vmem:[#allocation91_spill] sm:$0xff] %v4160_v20  ;;  %v4176_v20 = vld [vmem:[#allocation2 + $0x82] sm:$0xff] }
 0x23b   :  { %1897 = vrot.lane.b32.xlu1 %v1886_v16, %s2660_s8  ;;  %1895 = vrot.lane.b32.xlu0 %v1885_v60, %s2660_s8  ;;  %5219 = vst [vmem:[#allocation52_spill] sm:$0xff] %v4176_v20  ;;  %v1912_v60 = vmul.f32 %v1908_v24, %v4176_v20 }
 0x23d   :  { %v4170_v11 = vpop.permute.xlu1 %1397  ;;  %v4172_v28 = vpop.permute.xlu0 %1395 }
 0x23e   :  { %5217 = vst [vmem:[#allocation59_spill] sm:$0xff] %v4170_v11  ;;  %5218 = vst [vmem:[#allocation51_spill] sm:$0xff] %v4172_v28  ;;  %v1911_v28 = vmul.f32 %v1908_v24, %v4178_v12  ;;  %v1934_v11 = vstv %s2575_s2  ;;  %s2592_s2 = sld [smem:[#allocation3 + $0x23]] }
 0x23f   :  { %1919 = vrot.lane.b32.xlu1 %v1910_v10, %s2660_s8  ;;  %1917 = vrot.lane.b32.xlu0 %v1909_v52, %s2660_s8  ;;  %v1936_v52 = vmul.f32 %v1934_v11, %v4164_v56  ;;  %v1935_v10 = vmul.f32 %v1934_v11, %v4166_v35 }
 0x241   :  { %v4182_v8 = vpop.permute.xlu1 %1419  ;;  %v4184_v16 = vpop.permute.xlu0 %1417 }
 0x242   :  { %5221 = vst [vmem:[#allocation62_spill] sm:$0xff] %v4182_v8  ;;  %5222 = vst [vmem:[#allocation74_spill] sm:$0xff] %v4184_v16  ;;  %v1960_v8 = vstv %s2576_s3  ;;  %s2593_s3 = sld [smem:[#allocation3 + $0x47]] }
 0x243   :  { %1923 = vrot.lane.b32.xlu1 %v1912_v60, %s2660_s8  ;;  %1921 = vrot.lane.b32.xlu0 %v1911_v28, %s2660_s8  ;;  %v1938_v60 = vmul.f32 %v1934_v11, %v4176_v20  ;;  %v1937_v28 = vmul.f32 %v1934_v11, %v4178_v12 }
 0x245   :  { %v4190_v25 = vpop.permute.xlu1 %1423  ;;  %v4192_v41 = vpop.permute.xlu0 %1421 }
 0x246   :  { %5223 = vst [vmem:[#allocation75_spill] sm:$0xff] %v4190_v25  ;;  %5224 = vst [vmem:[#allocation63_spill] sm:$0xff] %v4192_v41 }
 0x247   :  { %1945 = vrot.lane.b32.xlu1 %v1936_v52, %s2660_s8  ;;  %1943 = vrot.lane.b32.xlu0 %v1935_v10, %s2660_s8  ;;  %v1962_v52 = vmul.f32 %v1960_v8, %v4164_v56  ;;  %v1961_v10 = vmul.f32 %v1960_v8, %v4166_v35 }
 0x249   :  { %v4198_v16 = vpop.permute.xlu1 %1445  ;;  %v4200_v24 = vpop.permute.xlu0 %1443 }
 0x24a   :  { %5225 = vst [vmem:[#allocation64_spill] sm:$0xff] %v4198_v16  ;;  %5226 = vst [vmem:[#allocation65_spill] sm:$0xff] %v4200_v24  ;;  %v4220_v16 = vld [vmem:[#allocation2 + $0x3a] sm:$0xff] }
 0x24b   :  { %1949 = vrot.lane.b32.xlu1 %v1938_v60, %s2660_s8  ;;  %1947 = vrot.lane.b32.xlu0 %v1937_v28, %s2660_s8  ;;  %v1964_v60 = vmul.f32 %v1960_v8, %v4176_v20  ;;  %v1963_v28 = vmul.f32 %v1960_v8, %v4178_v12  ;;  %5231 = vst [vmem:[#allocation67_spill] sm:$0xff] %v4220_v16 }
 0x24c   :  { %v2040_v53 = vmul.f32 %v2038_v48, %v4220_v16 }
 0x24d   :  { %v4206_v41 = vpop.permute.xlu1 %1449  ;;  %v4208_v25 = vpop.permute.xlu0 %1447 }
 0x24e   :  { %5227 = vst [vmem:[#allocation97_spill] sm:$0xff] %v4206_v41  ;;  %5228 = vst [vmem:[#allocation93_spill] sm:$0xff] %v4208_v25  ;;  %v1986_v41 = vstv %s2577_s24  ;;  %v4222_v25 = vld [vmem:[#allocation2 + $0x32] sm:$0xff]  ;;  %s2594_s24 = sld [smem:[#allocation3 + $0x6b]] }
 0x24f   :  { %1971 = vrot.lane.b32.xlu1 %v1962_v52, %s2660_s8  ;;  %1969 = vrot.lane.b32.xlu0 %v1961_v10, %s2660_s8  ;;  %5232 = vst [vmem:[#allocation76_spill] sm:$0xff] %v4222_v25  ;;  %v1988_v8 = vmul.f32 %v1986_v41, %v4220_v16  ;;  %v2039_v59 = vmul.f32 %v2038_v48, %v4222_v25 }
 0x251   :  { %v4214_v24 = vpop.permute.xlu1 %1471  ;;  %v4216_v11 = vpop.permute.xlu0 %1469 }
 0x252   :  { %5229 = vst [vmem:[#allocation95_spill] sm:$0xff] %v4214_v24  ;;  %5230 = vst [vmem:[#allocation66_spill] sm:$0xff] %v4216_v11  ;;  %v1987_v11 = vmul.f32 %v1986_v41, %v4222_v25  ;;  %v4238_v24 = vld [vmem:[#allocation2 + $0x9a] sm:$0xff] }
 0x253   :  { %1975 = vrot.lane.b32.xlu1 %v1964_v60, %s2660_s8  ;;  %1973 = vrot.lane.b32.xlu0 %v1963_v28, %s2660_s8  ;;  %v4240_v60 = vld [vmem:[#allocation2 + $0x92] sm:$0xff]  ;;  %v2042_v7 = vmul.f32 %v2038_v48, %v4238_v24 }
 0x254   :  { %v2041_v38 = vmul.f32 %v2038_v48, %v4240_v60 }
 0x255   :  { %v4232_v52 = vpop.permute.xlu1 %1475  ;;  %v4234_v10 = vpop.permute.xlu0 %1473 }
 0x256   :  { %5233 = vst [vmem:[#allocation77_spill] sm:$0xff] %v4232_v52  ;;  %5234 = vst [vmem:[#allocation94_spill] sm:$0xff] %v4234_v10  ;;  %v1990_v52 = vmul.f32 %v1986_v41, %v4238_v24 }
 0x257   :  { %1997 = vrot.lane.b32.xlu1 %v1988_v8, %s2660_s8  ;;  %1995 = vrot.lane.b32.xlu0 %v1987_v11, %s2660_s8  ;;  %v1989_v8 = vmul.f32 %v1986_v41, %v4240_v60  ;;  %v2012_v11 = vstv %s2578_s25 }
 0x258   :  { %v2013_v41 = vmul.f32 %v2012_v11, %v4222_v25  ;;  %v2016_v42 = vmul.f32 %v2012_v11, %v4238_v24  ;;  %v2015_v29 = vmul.f32 %v2012_v11, %v4240_v60 }
 0x259   :  { %v4250_v28 = vpop.permute.xlu1 %1497  ;;  %v4252_v10 = vpop.permute.xlu0 %1495 }
 0x25a   :  { %5235 = vst [vmem:[#allocation96_spill] sm:$0xff] %v4250_v28  ;;  %5236 = vst [vmem:[#allocation78_spill] sm:$0xff] %v4252_v10  ;;  %v2014_v10 = vmul.f32 %v2012_v11, %v4220_v16  ;;  %v2065_v11 = vmul.f32 %v2064_v45, %v4287_v13 }
 0x25b   :  { %2001 = vrot.lane.b32.xlu1 %v1990_v52, %s2660_s8  ;;  %1999 = vrot.lane.b32.xlu0 %v1989_v8, %s2660_s8  ;;  %v4275_v52 = vstv %s2560_s5  ;;  %v4279_v8 = vstv %s2563_s1 }
 0x25d   :  { %v4264_v15 = vpop.permute.xlu1 %1501  ;;  %v4266_v28 = vpop.permute.xlu0 %1499 }
 0x25e   :  { %5237 = vst [vmem:[#allocation102_spill] sm:$0xff] %v4264_v15  ;;  %5238 = vst [vmem:[#allocation98_spill] sm:$0xff] %v4266_v28  ;;  %v4281_v28 = vstv %s2584_s6  ;;  %v4285_v15 = vld [vmem:[#allocation2 + $0x52] sm:$0xff] }
 0x25f   :  { %2023 = vrot.lane.b32.xlu1 %v2014_v10, %s2660_s8  ;;  %2021 = vrot.lane.b32.xlu0 %v2013_v41, %s2660_s8  ;;  %5239 = vst [vmem:[#allocation100_spill] sm:$0xff] %v4285_v15  ;;  %v4295_v10 = vstv %s4246_s7  ;;  %v4298_v41 = vstv %s4248_s10  ;;  %v4330_v48 = vmul.f32 %v2090_v9, %v4285_v15 }
 0x260   :  { %5242 = vst [vmem:[#allocation81_spill] sm:$0xff] %v4298_v41 }
 0x261   :  { %v4300_v57 = vpop.permute.xlu1 %1523  ;;  %v4302_v55 = vpop.permute.xlu0 %1521  ;;  %5246 = vst [vmem:[#allocation105_spill] sm:$0xff] %v4330_v48  ;;  %v4352_v48 = vmul.f32 %v1710_v39, %v4108_v3 }
 0x262   :  { %5243 = vst [vmem:[#allocation99_spill] sm:$0xff] %v4300_v57  ;;  %5244 = vst [vmem:[#allocation101_spill] sm:$0xff] %v4302_v55  ;;  %v2066_v55 = vmul.f32 %v2064_v45, %v4285_v15  ;;  %v4319_v57 = vmul.f32 %v2064_v45, %v4289_v32  ;;  %v4346_v45 = vmul.f32 %v2116_v62, %v4285_v15 }
 0x263   :  { %2027 = vrot.lane.b32.xlu1 %v2016_v42, %s2660_s8  ;;  %2025 = vrot.lane.b32.xlu0 %v2015_v29, %s2660_s8  ;;  %v4333_v42 = vmul.f32 %v2090_v9, %v4287_v13  ;;  %v4336_v29 = vmul.f32 %v2090_v9, %v4289_v32  ;;  %5251 = vst [vmem:[#allocation106_spill] sm:$0xff] %v4352_v48 }
 0x264   :  { %v4364_v9 = vmul.f32 %v2116_v62, %v4289_v32  ;;  %v4372_v48 = vmul.f32 %v1710_v39, %v4120_v23 }
 0x265   :  { %5247 = vst [vmem:[#allocation69_spill] sm:$0xff] %v4333_v42  ;;  %5248 = vst [vmem:[#allocation82_spill] sm:$0xff] %v4336_v29  ;;  %v4338_v51 = vpop.permute.xlu1 %1527  ;;  %v4340_v18 = vpop.permute.xlu0 %1525  ;;  %v4355_v42 = vmul.f32 %v1740_v50, %v4164_v56  ;;  %v4358_v29 = vmul.f32 %v1710_v39, %v4110_v22 }
 0x266   :  { %5249 = vst [vmem:[#allocation89_spill] sm:$0xff] %v4338_v51  ;;  %5250 = vst [vmem:[#allocation104_spill] sm:$0xff] %v4340_v18  ;;  %v4361_v18 = vmul.f32 %v1740_v50, %v4166_v35  ;;  %v4369_v51 = vmul.f32 %v2116_v62, %v4306_v19  ;;  %v4394_v62 = vmul.f32 %v4273_v27, %v4110_v22 }
 0x267   :  { %5252 = vst [vmem:[#allocation107_spill] sm:$0xff] %v4355_v42  ;;  %5253 = vst [vmem:[#allocation109_spill] sm:$0xff] %v4358_v29  ;;  %2049 = vrot.lane.b32.xlu1 %v2040_v53, %s2660_s8  ;;  %2047 = vrot.lane.b32.xlu0 %v2039_v59, %s2660_s8  ;;  %v4375_v42 = vmul.f32 %v1740_v50, %v4176_v20  ;;  %v4378_v29 = vstv %s4283_s14  ;;  %v4386_v53 = vmul.f32 %v1740_v50, %v4178_v12 }
 0x268   :  { %5254 = vst [vmem:[#allocation90_spill] sm:$0xff] %v4361_v18  ;;  %5255 = vst [vmem:[#allocation108_spill] sm:$0xff] %v4372_v48  ;;  %v4383_v18 = vmul.f32 %v1710_v39, %v4122_v21  ;;  %v4390_v59 = vmul.f32 %v4273_v27, %v4108_v3  ;;  %v4402_v39 = vmul.f32 %v4275_v52, %v4108_v3 }
 0x269   :  { %5256 = vst [vmem:[#allocation110_spill] sm:$0xff] %v4375_v42  ;;  %5258 = vst [vmem:[#allocation122_spill] sm:$0xff] %v4386_v53  ;;  %v4396_v42 = vpop.permute.xlu1 %1549  ;;  %v4398_v48 = vpop.permute.xlu0 %1547  ;;  %v4406_v50 = vmul.f32 %v4279_v8, %v4164_v56  ;;  %v4410_v53 = vmul.f32 %v4275_v52, %v4110_v22 }
 0x26a   :  { %5257 = vst [vmem:[#allocation121_spill] sm:$0xff] %v4383_v18  ;;  %5259 = vst [vmem:[#allocation111_spill] sm:$0xff] %v4390_v59  ;;  %v4414_v18 = vmul.f32 %v4279_v8, %v4166_v35  ;;  %v4422_v59 = vmul.f32 %v4273_v27, %v4122_v21 }
 0x26b   :  { %5260 = vst [vmem:[#allocation113_spill] sm:$0xff] %v4394_v62  ;;  %5261 = vst [vmem:[#allocation84_spill] sm:$0xff] %v4402_v39  ;;  %v4418_v62 = vmul.f32 %v4273_v27, %v4120_v23  ;;  %v4426_v39 = vmul.f32 %v4275_v52, %v4120_v23  ;;  %2053 = vrot.lane.b32.xlu1 %v2042_v7, %s2660_s8  ;;  %2051 = vrot.lane.b32.xlu0 %v2041_v38, %s2660_s8 }
 0x26c   :  { %5262 = vst [vmem:[#allocation120_spill] sm:$0xff] %v4406_v50  ;;  %5263 = vst [vmem:[#allocation85_spill] sm:$0xff] %v4410_v53  ;;  %v4430_v50 = vmul.f32 %v4279_v8, %v4176_v20  ;;  %v4440_v27 = vmul.f32 %v4279_v8, %v4178_v12  ;;  %v4444_v53 = vmul.f32 %v4281_v28, %v4108_v3 }
 0x26d   :  { %5264 = vst [vmem:[#allocation72_spill] sm:$0xff] %v4414_v18  ;;  %5265 = vst [vmem:[#allocation73_spill] sm:$0xff] %v4426_v39  ;;  %v4436_v18 = vmul.f32 %v4275_v52, %v4122_v21  ;;  %v1800_v39 = vstv %s4324_s15  ;;  %v4453_v38 = vmul.f32 %v4292_v44, %v4108_v3  ;;  %v4457_v7 = vmul.f32 %v4295_v10, %v4164_v56  ;;  %v4463_v8 = vpop.permute.xlu1 %1553 }
 0x26e   :  { %5266 = vst [vmem:[#allocation112_spill] sm:$0xff] %v4430_v50  ;;  %5268 = vst [vmem:[#allocation61_spill] sm:$0xff] %v4440_v27  ;;  %v4449_v50 = vmul.f32 %v4281_v28, %v4110_v22  ;;  %v4461_v52 = vmul.f32 %v4292_v44, %v4110_v22  ;;  %v4465_v27 = vpop.permute.xlu0 %1551  ;;  %v4477_v56 = vmul.f32 %v4281_v28, %v4122_v21 }
 0x26f   :  { %5267 = vst [vmem:[#allocation114_spill] sm:$0xff] %v4436_v18  ;;  %5269 = vst [vmem:[#allocation86_spill] sm:$0xff] %v4453_v38  ;;  %v4469_v18 = vmul.f32 %v4295_v10, %v4166_v35  ;;  %v4473_v38 = vmul.f32 %v4281_v28, %v4120_v23  ;;  %v4489_v35 = vmul.f32 %v4292_v44, %v4122_v21  ;;  %2075 = vrot.lane.b32.xlu1 %v2066_v55, %s2660_s8 }
 0x270   :  { %5270 = vst [vmem:[#allocation118_spill] sm:$0xff] %v4457_v7  ;;  %5271 = vst [vmem:[#allocation119_spill] sm:$0xff] %v4461_v52  ;;  %v4481_v7 = vmul.f32 %v4292_v44, %v4120_v23  ;;  %v4485_v52 = vmul.f32 %v4295_v10, %v4176_v20  ;;  %v4497_v28 = vmul.f32 %v4298_v41, %v4108_v3  ;;  %2073 = vrot.lane.b32.xlu0 %v2065_v11, %s2660_s8 }
 0x271   :  { %5272 = vst [vmem:[#allocation115_spill] sm:$0xff] %v4469_v18  ;;  %5275 = vst [vmem:[#allocation87_spill] sm:$0xff] %v4489_v35  ;;  %v4493_v18 = vmul.f32 %v4295_v10, %v4178_v12  ;;  %v4503_v20 = vmul.f32 %v4298_v41, %v4110_v22  ;;  %v4507_v44 = vmul.f32 %v4322_v43, %v4220_v16  ;;  %v4513_v10 = vstv %s4380_s16  ;;  %v4530_v12 = vpop.permute.xlu1 %1575 }
 0x272   :  { %5273 = vst [vmem:[#allocation117_spill] sm:$0xff] %v4481_v7  ;;  %5274 = vst [vmem:[#allocation44_spill] sm:$0xff] %v4485_v52  ;;  %v4510_v52 = vmul.f32 %v1800_v39, %v4285_v15  ;;  %v4517_v3 = vmul.f32 %v4322_v43, %v4222_v25  ;;  %v4520_v55 = vmul.f32 %v1800_v39, %v4287_v13 }
 0x273   :  { %5276 = vst [vmem:[#allocation45_spill] sm:$0xff] %v4493_v18  ;;  %5277 = vst [vmem:[#allocation80_spill] sm:$0xff] %v4497_v28  ;;  %v4524_v22 = vmul.f32 %v4298_v41, %v4120_v23  ;;  %v4528_v11 = vmul.f32 %v4322_v43, %v4238_v24  ;;  %v4532_v18 = vpop.permute.xlu0 %1573  ;;  %v4535_v35 = vmul.f32 %v1800_v39, %v4289_v32  ;;  %2079 = vrot.lane.b32.xlu1 %v4319_v57, %s2660_s8  ;;  %v5285_v57 = vld [vmem:[#allocation14_spill] sm:$0xff] }
 0x274   :  { %5278 = vst [vmem:[#allocation83_spill] sm:$0xff] %v4503_v20  ;;  %5279 = vst [vmem:[#allocation116_spill] sm:$0xff] %v4513_v10  ;;  %v4539_v7 = vmul.f32 %v4322_v43, %v4240_v60  ;;  %v4542_v21 = vmul.f32 %v1800_v39, %v4306_v19  ;;  %v4546_v23 = vmul.f32 %v4378_v29, %v4220_v16  ;;  %2077 = vrot.lane.b32.xlu0 %v4327_v0, %s2660_s8  ;;  %v5291_v16 = vld [vmem:[#allocation20_spill] sm:$0xff] }
 0x275   :  { %5280 = vst [vmem:[#allocation56_spill] sm:$0xff] %v4524_v22  ;;  %v1092_v22 = vadd.f32 %v3941_v6, %v3863_v47  ;;  %v4552_v41 = vmul.f32 %v4513_v10, %v4285_v15  ;;  %v4556_v20 = vmul.f32 %v4378_v29, %v4222_v25  ;;  %v4560_v43 = vmul.f32 %v4513_v10, %v4287_v13  ;;  %v4588_v15 = vpop.permute.xlu1 %1579  ;;  %v5296_v10 = vld [vmem:[#allocation88_spill] sm:$0xff] }
 0x276   :  { %v1091_v39 = vadd.f32 %v3943_v2, %v3866_v49  ;;  %v1094_v28 = vadd.f32 %v3962_v54, %v3886_v46  ;;  %v1093_v47 = vadd.f32 %v3964_v31, %v3889_v40  ;;  %v1118_v6 = vadd.f32 %v3974_v4, %v3912_v1  ;;  %v5283_v54 = vld [vmem:[#allocation12_spill] sm:$0xff]  ;;  %v5284_v31 = vld [vmem:[#allocation13_spill] sm:$0xff]  ;;  %v5286_v1 = vld [vmem:[#allocation15_spill] sm:$0xff] }
 0x277   :  { %5281 = vst [vmem:[#allocation57_spill] sm:$0xff] %v4552_v41  ;;  %5282 = vst [vmem:[#allocation60_spill] sm:$0xff] %v4560_v43  ;;  %v1117_v13 = vadd.f32 %v3976_v37, %v3915_v58  ;;  %v1120_v49 = vadd.f32 %v3982_v33, %v3935_v61  ;;  %v1119_v46 = vadd.f32 %v3984_v5, %v3937_v36  ;;  %v4590_v58 = vpop.permute.xlu0 %1577  ;;  %v5287_v61 = vld [vmem:[#allocation16_spill] sm:$0xff]  ;;  %v5288_v33 = vld [vmem:[#allocation17_spill] sm:$0xff] }
 0x278   :  { %v1144_v40 = vadd.f32 %v3990_v63, %v3956_v26  ;;  %v1143_v2 = vadd.f32 %v3992_v14, %v3958_v34  ;;  %v1146_v0 = vadd.f32 %v5284_v31, %v5283_v54  ;;  %v1145_v4 = vadd.f32 %v5286_v1, %v5285_v57  ;;  %v5289_v5 = vld [vmem:[#allocation18_spill] sm:$0xff]  ;;  %v5290_v26 = vld [vmem:[#allocation19_spill] sm:$0xff]  ;;  %v5292_v14 = vld [vmem:[#allocation21_spill] sm:$0xff] }
 0x279   :  { %v1170_v37 = vadd.f32 %v5287_v61, %v1092_v22  ;;  %v1169_v36 = vadd.f32 %v5288_v33, %v1091_v39  ;;  %v1172_v25 = vadd.f32 %v5289_v5, %v1094_v28  ;;  %v1171_v63 = vadd.f32 %v5290_v26, %v1093_v47  ;;  %v5293_v54 = vld [vmem:[#allocation22_spill] sm:$0xff]  ;;  %v5294_v57 = vld [vmem:[#allocation105_spill] sm:$0xff]  ;;  %v5297_v61 = vld [vmem:[#allocation23_spill] sm:$0xff] }
 0x27a   :  { %v1196_v34 = vadd.f32 %v5291_v16, %v1118_v6  ;;  %v1195_v19 = vadd.f32 %v5292_v14, %v1117_v13  ;;  %v1198_v31 = vadd.f32 %v5293_v54, %v1120_v49  ;;  %2101 = vrot.lane.b32.xlu1 %v5294_v57, %s2660_s8  ;;  %v5295_v1 = vld [vmem:[#allocation69_spill] sm:$0xff]  ;;  %v1197_v22 = vadd.f32 %v5296_v10, %v1119_v46  ;;  %v5299_v5 = vld [vmem:[#allocation26_spill] sm:$0xff]  ;;  %v5300_v26 = vld [vmem:[#allocation24_spill] sm:$0xff]  ;;  %v4611_v57 = vpop.permute.xlu1 %1601 }
 0x27b   :  { %2099 = vrot.lane.b32.xlu0 %v5295_v1, %s2660_s8  ;;  %v1222_v39 = vadd.f32 %v5297_v61, %v1144_v40  ;;  %v5298_v33 = vld [vmem:[#allocation25_spill] sm:$0xff]  ;;  %v1247_v47 = vadd.f32 %v5299_v5, %v1169_v36  ;;  %v1221_v16 = vadd.f32 %v5300_v26, %v1143_v2  ;;  %v5301_v6 = vld [vmem:[#allocation28_spill] sm:$0xff]  ;;  %v5303_v54 = vld [vmem:[#allocation27_spill] sm:$0xff]  ;;  %v4613_v43 = vpop.permute.xlu0 %1599 }
 0x27c   :  { %v1248_v28 = vadd.f32 %v5298_v33, %v1170_v37  ;;  %v1224_v13 = vadd.f32 %v5301_v6, %v1146_v0  ;;  %v5302_v14 = vld [vmem:[#allocation29_spill] sm:$0xff]  ;;  %v1250_v32 = vadd.f32 %v5303_v54, %v1172_v25  ;;  %v5304_v1 = vld [vmem:[#allocation30_spill] sm:$0xff]  ;;  %v5305_v46 = vld [vmem:[#allocation31_spill] sm:$0xff] }
 0x27d   :  { %v1223_v49 = vadd.f32 %v5302_v14, %v1145_v4  ;;  %v1249_v10 = vadd.f32 %v5304_v1, %v1171_v63  ;;  %v1274_v40 = vadd.f32 %v5305_v46, %v1196_v34  ;;  %v5306_v61 = vld [vmem:[#allocation37_spill] sm:$0xff]  ;;  %v5307_v33 = vld [vmem:[#allocation54_spill] sm:$0xff]  ;;  %v5308_v5 = vld [vmem:[#allocation32_spill] sm:$0xff] }
 0x27e   :  { %v1326_v37 = vadd.f32 %v5306_v61, %v1248_v28  ;;  %v1325_v36 = vadd.f32 %v5307_v33, %v1247_v47  ;;  %v1273_v2 = vadd.f32 %v5308_v5, %v1195_v19  ;;  %v5309_v26 = vld [vmem:[#allocation40_spill] sm:$0xff]  ;;  %v5310_v6 = vld [vmem:[#allocation41_spill] sm:$0xff]  ;;  %v5311_v25 = vld [vmem:[#allocation82_spill] sm:$0xff] }
 0x27f   :  { %v1276_v0 = vadd.f32 %v5309_v26, %v1198_v31  ;;  %v1275_v4 = vadd.f32 %v5310_v6, %v1197_v22  ;;  %2105 = vrot.lane.b32.xlu1 %v5311_v25, %s2660_s8  ;;  %2103 = vrot.lane.b32.xlu0 %v4343_v17, %s2660_s8  ;;  %v5312_v14 = vld [vmem:[#allocation33_spill] sm:$0xff]  ;;  %v5313_v54 = vld [vmem:[#allocation34_spill] sm:$0xff]  ;;  %v5315_v46 = vld [vmem:[#allocation91_spill] sm:$0xff]  ;;  %v4634_v25 = vpop.permute.xlu1 %1605  ;;  %v4636_v41 = vpop.permute.xlu0 %1603 }
 0x280   :  { %v1300_v63 = vadd.f32 %v5312_v14, %v1222_v39  ;;  %v1299_v34 = vadd.f32 %v5313_v54, %v1221_v16  ;;  %v5314_v1 = vld [vmem:[#allocation50_spill] sm:$0xff]  ;;  %v1403_v47 = vadd.f32 %v5315_v46, %v1325_v36  ;;  %v5316_v61 = vld [vmem:[#allocation35_spill] sm:$0xff]  ;;  %v5317_v33 = vld [vmem:[#allocation36_spill] sm:$0xff] }
 0x281   :  { %v1404_v28 = vadd.f32 %v5314_v1, %v1326_v37  ;;  %v1302_v19 = vadd.f32 %v5316_v61, %v1224_v13  ;;  %v1301_v31 = vadd.f32 %v5317_v33, %v1223_v49  ;;  %v5318_v5 = vld [vmem:[#allocation55_spill] sm:$0xff]  ;;  %v5319_v26 = vld [vmem:[#allocation38_spill] sm:$0xff] }
 0x282   :  { %v1328_v22 = vadd.f32 %v5318_v5, %v1250_v32  ;;  %v1327_v6 = vadd.f32 %v5319_v26, %v1249_v10  ;;  %v5320_v17 = vld [vmem:[#allocation42_spill] sm:$0xff]  ;;  %v5321_v14 = vld [vmem:[#allocation43_spill] sm:$0xff] }
 0x283   :  { %v1352_v39 = vadd.f32 %v5320_v17, %v1274_v40  ;;  %v1351_v16 = vadd.f32 %v5321_v14, %v1273_v2  ;;  %v5322_v54 = vld [vmem:[#allocation95_spill] sm:$0xff]  ;;  %v5323_v1 = vld [vmem:[#allocation66_spill] sm:$0xff]  ;;  %2127 = vrot.lane.b32.xlu1 %v4346_v45, %s2660_s8  ;;  %2125 = vrot.lane.b32.xlu0 %v4349_v30, %s2660_s8  ;;  %v5330_v17 = vld [vmem:[#allocation48_spill] sm:$0xff]  ;;  %v1628_v45 = vpop.permute.xlu1 %1627 }
 0x284   :  { %v1482_v37 = vadd.f32 %v5322_v54, %v1404_v28  ;;  %v1481_v36 = vadd.f32 %v5323_v1, %v1403_v47  ;;  %v5324_v46 = vld [vmem:[#allocation46_spill] sm:$0xff]  ;;  %v5325_v61 = vld [vmem:[#allocation47_spill] sm:$0xff]  ;;  %v5331_v14 = vld [vmem:[#allocation49_spill] sm:$0xff] }
 0x285   :  { %v1354_v13 = vadd.f32 %v5324_v46, %v1276_v0  ;;  %v1353_v49 = vadd.f32 %v5325_v61, %v1275_v4  ;;  %v5326_v33 = vld [vmem:[#allocation70_spill] sm:$0xff]  ;;  %v5327_v10 = vld [vmem:[#allocation59_spill] sm:$0xff]  ;;  %v1380_v4 = vadd.f32 %v5330_v17, %v1302_v19  ;;  %v1626_v46 = vpop.permute.xlu0 %1625  ;;  %v5333_v61 = vld [vmem:[#allocation77_spill] sm:$0xff] }
 0x286   :  { %v1378_v32 = vadd.f32 %v5326_v33, %v1300_v63  ;;  %v1406_v40 = vadd.f32 %v5327_v10, %v1328_v22  ;;  %v5328_v5 = vld [vmem:[#allocation51_spill] sm:$0xff]  ;;  %v1560_v28 = vadd.f32 %v4396_v42, %v1482_v37  ;;  %v1559_v47 = vadd.f32 %v4398_v48, %v1481_v36  ;;  %v5332_v54 = vld [vmem:[#allocation62_spill] sm:$0xff]  ;;  %v5342_v17 = vld [vmem:[#allocation96_spill] sm:$0xff] }
 0x287   :  { %v1405_v2 = vadd.f32 %v5328_v5, %v1327_v6  ;;  %v5329_v26 = vld [vmem:[#allocation71_spill] sm:$0xff]  ;;  %v1379_v63 = vadd.f32 %v5331_v14, %v1301_v31  ;;  %v1430_v1 = vadd.f32 %v5332_v54, %v1352_v39  ;;  %v5334_v33 = vld [vmem:[#allocation94_spill] sm:$0xff]  ;;  %2131 = vrot.lane.b32.xlu1 %v4364_v9, %s2660_s8  ;;  %2129 = vrot.lane.b32.xlu0 %v4369_v51, %s2660_s8  ;;  %v1632_v9 = vpop.permute.xlu1 %1631  ;;  %s4683_s8 = sld [smem:[#allocation3 + $0x60]] }
 0x288   :  { %v1377_v0 = vadd.f32 %v5329_v26, %v1299_v34  ;;  %v1484_v30 = vadd.f32 %v5333_v61, %v1406_v40  ;;  %v1638_v10 = vadd.f32 %v1628_v45, %v1560_v28  ;;  %v1637_v6 = vadd.f32 %v1626_v46, %v1559_v47  ;;  %v5335_v5 = vld [vmem:[#allocation74_spill] sm:$0xff]  ;;  %v5336_v37 = vld [vmem:[#allocation75_spill] sm:$0xff]  ;;  %v5340_v47 = vld [vmem:[#allocation64_spill] sm:$0xff] }
 0x289   :  { %v1483_v22 = vadd.f32 %v5334_v33, %v1405_v2  ;;  %v1429_v42 = vadd.f32 %v5335_v5, %v1351_v16  ;;  %v1432_v48 = vadd.f32 %v5336_v37, %v1354_v13  ;;  %v5337_v36 = vld [vmem:[#allocation63_spill] sm:$0xff]  ;;  %v5338_v39 = vld [vmem:[#allocation106_spill] sm:$0xff]  ;;  %v5339_v2 = vld [vmem:[#allocation109_spill] sm:$0xff]  ;;  %v1456_v16 = vadd.f32 %v5340_v47, %v1378_v32  ;;  %v1630_v45 = vpop.permute.xlu0 %1629 }
 0x28a   :  { %v1431_v34 = vadd.f32 %v5337_v36, %v1353_v49  ;;  %v1562_v19 = vadd.f32 %v4463_v8, %v1484_v30  ;;  %v1716_v40 = vadd.f32 %v5338_v39, %v1638_v10  ;;  %v1715_v28 = vadd.f32 %v5339_v2, %v1637_v6  ;;  %v5341_v26 = vld [vmem:[#allocation65_spill] sm:$0xff]  ;;  %v5343_v14 = vld [vmem:[#allocation78_spill] sm:$0xff]  ;;  %v5344_v46 = vld [vmem:[#allocation107_spill] sm:$0xff] }
 0x28b   :  { %v1561_v31 = vadd.f32 %v4465_v27, %v1483_v22  ;;  %v1455_v13 = vadd.f32 %v5341_v26, %v1377_v0  ;;  %v1508_v49 = vadd.f32 %v5342_v17, %v1430_v1  ;;  %v1507_v54 = vadd.f32 %v5343_v14, %v1429_v42  ;;  %v5345_v61 = vld [vmem:[#allocation90_spill] sm:$0xff]  ;;  %v5347_v0 = vld [vmem:[#allocation111_spill] sm:$0xff]  ;;  %v5348_v1 = vld [vmem:[#allocation113_spill] sm:$0xff] }
 0x28c   :  { %v1746_v51 = vadd.f32 %v5344_v46, %v1716_v40  ;;  %v1745_v8 = vadd.f32 %v5345_v61, %v1715_v28  ;;  %v1640_v30 = vadd.f32 %v1632_v9, %v1562_v19  ;;  %v5346_v33 = vld [vmem:[#allocation102_spill] sm:$0xff]  ;;  %2153 = vrot.lane.b32.xlu1 %v5347_v0, %s2661_s28  ;;  %2151 = vrot.lane.b32.xlu0 %v5348_v1, %s2661_s28  ;;  %v5349_v6 = vld [vmem:[#allocation108_spill] sm:$0xff]  ;;  %v5350_v42 = vld [vmem:[#allocation121_spill] sm:$0xff]  ;;  %v1654_v28 = vpop.permute.xlu1 %1653 }
 0x28d   :  { %v1639_v27 = vadd.f32 %v1630_v45, %v1561_v31  ;;  %v1510_v22 = vadd.f32 %v5346_v33, %v1432_v48  ;;  %v1586_v10 = vadd.f32 %v4530_v12, %v1508_v49  ;;  %v1585_v32 = vadd.f32 %v4532_v18, %v1507_v54  ;;  %v5351_v19 = vld [vmem:[#allocation97_spill] sm:$0xff]  ;;  %v5352_v31 = vld [vmem:[#allocation98_spill] sm:$0xff]  ;;  %v5353_v39 = vld [vmem:[#allocation99_spill] sm:$0xff]  ;;  %v1652_v47 = vpop.permute.xlu0 %1651 }
 0x28e   :  { %v1718_v5 = vadd.f32 %v5349_v6, %v1640_v30  ;;  %v1776_v36 = vadd.f32 %v4507_v44, %v1746_v51  ;;  %v1775_v48 = vadd.f32 %v4517_v3, %v1745_v8  ;;  %v1458_v12 = vadd.f32 %v5351_v19, %v1380_v4  ;;  %v5354_v26 = vld [vmem:[#allocation110_spill] sm:$0xff]  ;;  %v5356_v4 = vld [vmem:[#allocation84_spill] sm:$0xff]  ;;  %v5359_v61 = vld [vmem:[#allocation101_spill] sm:$0xff] }
 0x28f   :  { %v1717_v37 = vadd.f32 %v5350_v42, %v1639_v27  ;;  %v1509_v18 = vadd.f32 %v5352_v31, %v1431_v34  ;;  %v1534_v40 = vadd.f32 %v5353_v39, %v1456_v16  ;;  %v1588_v2 = vadd.f32 %v4588_v15, %v1510_v22  ;;  %v5355_v49 = vld [vmem:[#allocation122_spill] sm:$0xff]  ;;  %v5357_v16 = vld [vmem:[#allocation85_spill] sm:$0xff]  ;;  %v5361_v33 = vld [vmem:[#allocation120_spill] sm:$0xff] }
 0x290   :  { %v1748_v17 = vadd.f32 %v5354_v26, %v1718_v5  ;;  %v1664_v54 = vadd.f32 %v1654_v28, %v1586_v10  ;;  %v1663_v9 = vadd.f32 %v1652_v47, %v1585_v32  ;;  %2157 = vrot.lane.b32.xlu1 %v4418_v62, %s2661_s28  ;;  %2155 = vrot.lane.b32.xlu0 %v4422_v59, %s2661_s28  ;;  %v5358_v62 = vld [vmem:[#allocation93_spill] sm:$0xff]  ;;  %v1658_v30 = vpop.permute.xlu1 %1657  ;;  %v5362_v10 = vld [vmem:[#allocation72_spill] sm:$0xff]  ;;  %v5364_v5 = vld [vmem:[#allocation114_spill] sm:$0xff]  ;;  %v1820_v26 = vstv %s4706_s17 }
 0x291   :  { %v1747_v14 = vadd.f32 %v5355_v49, %v1717_v37  ;;  %v1587_v44 = vadd.f32 %v4590_v58, %v1509_v18  ;;  %v4701_v3 = vadd.f32 %v4510_v52, %v1776_v36  ;;  %v4704_v15 = vadd.f32 %v4520_v55, %v1775_v48  ;;  %v5360_v52 = vld [vmem:[#allocation89_spill] sm:$0xff]  ;;  %v1656_v27 = vpop.permute.xlu0 %1655  ;;  %v5365_v37 = vld [vmem:[#allocation104_spill] sm:$0xff]  ;;  %v5371_v49 = vld [vmem:[#allocation119_spill] sm:$0xff] }
 0x292   :  { %v1726_v34 = vadd.f32 %v5356_v4, %v1664_v54  ;;  %v1725_v45 = vadd.f32 %v5357_v16, %v1663_v9  ;;  %v1778_v58 = vadd.f32 %v4528_v11, %v1748_v17  ;;  %v1457_v51 = vadd.f32 %v5358_v62, %v1379_v63  ;;  %v5367_v18 = vld [vmem:[#allocation61_spill] sm:$0xff]  ;;  %v5369_v28 = vld [vmem:[#allocation60_spill] sm:$0xff]  ;;  %v5372_v4 = vld [vmem:[#allocation79_spill] sm:$0xff] }
 0x293   :  { %v1777_v46 = vadd.f32 %v4539_v7, %v1747_v14  ;;  %v1533_v59 = vadd.f32 %v5359_v61, %v1455_v13  ;;  %v1536_v8 = vadd.f32 %v5360_v52, %v1458_v12  ;;  %v1612_v55 = vadd.f32 %v4611_v57, %v1534_v40  ;;  %v5363_v13 = vld [vmem:[#allocation73_spill] sm:$0xff]  ;;  %v5366_v12 = vld [vmem:[#allocation112_spill] sm:$0xff]  ;;  %v5374_v16 = vld [vmem:[#allocation103_spill] sm:$0xff] }
 0x294   :  { %v1756_v22 = vadd.f32 %v5361_v33, %v1726_v34  ;;  %v1755_v32 = vadd.f32 %v5362_v10, %v1725_v45  ;;  %v1666_v0 = vadd.f32 %v1658_v30, %v1588_v2  ;;  %v1665_v1 = vadd.f32 %v1656_v27, %v1587_v44  ;;  %2179 = vrot.lane.b32.xlu1 %v4444_v53, %s2661_s28  ;;  %v1680_v36 = vpop.permute.xlu1 %1679  ;;  %v5373_v34 = vld [vmem:[#allocation116_spill] sm:$0xff]  ;;  %v5375_v45 = vld [vmem:[#allocation67_spill] sm:$0xff] }
 0x295   :  { %v1611_v11 = vadd.f32 %v4613_v43, %v1533_v59  ;;  %2177 = vrot.lane.b32.xlu0 %v4449_v50, %s2661_s28  ;;  %v4724_v7 = vadd.f32 %v4535_v35, %v1778_v58  ;;  %v4727_v57 = vadd.f32 %v4542_v21, %v1777_v46  ;;  %v1790_v63 = vstv %s4683_s8  ;;  %v1678_v48 = vpop.permute.xlu0 %1677  ;;  %v5376_v46 = vld [vmem:[#allocation76_spill] sm:$0xff]  ;;  %v5378_v59 = vld [vmem:[#allocation115_spill] sm:$0xff] }
 0x296   :  { %v1728_v6 = vadd.f32 %v5363_v13, %v1666_v0  ;;  %v1727_v42 = vadd.f32 %v5364_v5, %v1665_v1  ;;  %v1786_v43 = vadd.f32 %v4546_v23, %v1756_v22  ;;  %v1785_v53 = vadd.f32 %v4556_v20, %v1755_v32  ;;  %v5379_v30 = vld [vmem:[#allocation80_spill] sm:$0xff]  ;;  %v5380_v27 = vld [vmem:[#allocation83_spill] sm:$0xff]  ;;  %v5382_v22 = vld [vmem:[#allocation81_spill] sm:$0xff] }
 0x297   :  { %v1535_v50 = vadd.f32 %v5365_v37, %v1457_v51  ;;  %v1614_v35 = vadd.f32 %v4634_v25, %v1536_v8  ;;  %v1784_v21 = vmul.f32 %v4378_v29, %v4238_v24  ;;  %v1783_v19 = vmul.f32 %v4378_v29, %v4240_v60  ;;  %v5368_v25 = vld [vmem:[#allocation57_spill] sm:$0xff]  ;;  %v5370_v29 = vld [vmem:[#allocation86_spill] sm:$0xff]  ;;  %v5381_v33 = vld [vmem:[#allocation39_spill] sm:$0xff] }
 0x298   :  { %v1758_v31 = vadd.f32 %v5366_v12, %v1728_v6  ;;  %v1757_v39 = vadd.f32 %v5367_v18, %v1727_v42  ;;  %v1690_v23 = vadd.f32 %v1680_v36, %v1612_v55  ;;  %v1689_v40 = vadd.f32 %v1678_v48, %v1611_v11  ;;  %2183 = vrot.lane.b32.xlu1 %v4473_v38, %s2661_s28  ;;  %v1684_v44 = vpop.permute.xlu1 %1683  ;;  %v5377_v51 = vld [vmem:[#allocation118_spill] sm:$0xff]  ;;  %v5383_v11 = vld [vmem:[#allocation117_spill] sm:$0xff]  ;;  %v5384_v6 = vld [vmem:[#allocation87_spill] sm:$0xff] }
 0x299   :  { %v1613_v20 = vadd.f32 %v4636_v41, %v1535_v50  ;;  %2181 = vrot.lane.b32.xlu0 %v4477_v56, %s2661_s28  ;;  %v1816_v2 = vadd.f32 %v5368_v25, %v1786_v43  ;;  %v1815_v47 = vadd.f32 %v5369_v28, %v1785_v53  ;;  %v1682_v41 = vpop.permute.xlu0 %1681  ;;  %v1814_v38 = vmul.f32 %v5373_v34, %v5372_v4  ;;  %v5385_v50 = vld [vmem:[#allocation100_spill] sm:$0xff]  ;;  %v5388_v18 = vld [vmem:[#allocation45_spill] sm:$0xff] }
 0x29a   :  { %v1736_v17 = vadd.f32 %v5370_v29, %v1690_v23  ;;  %v1735_v14 = vadd.f32 %v5371_v49, %v1689_v40  ;;  %v1788_v54 = vadd.f32 %v1784_v21, %v1758_v31  ;;  %v1787_v9 = vadd.f32 %v1783_v19, %v1757_v39  ;;  %v5386_v36 = vld [vmem:[#allocation68_spill] sm:$0xff] }
 0x29b   :  { %v1813_v56 = vmul.f32 %v5373_v34, %v5374_v16  ;;  %v1792_v58 = vmul.f32 %v1790_v63, %v5375_v45  ;;  %v1791_v62 = vmul.f32 %v1790_v63, %v5376_v46  ;;  %v1692_v8 = vadd.f32 %v1684_v44, %v1614_v35  ;;  %v5387_v12 = vld [vmem:[#allocation44_spill] sm:$0xff]  ;;  %v5391_v44 = vld [vmem:[#allocation58_spill] sm:$0xff] }
 0x29c   :  { %v1766_v61 = vadd.f32 %v5377_v51, %v1736_v17  ;;  %v1765_v52 = vadd.f32 %v5378_v59, %v1735_v14  ;;  %v1691_v55 = vadd.f32 %v1682_v41, %v1613_v20  ;;  %2205 = vrot.lane.b32.xlu1 %v5379_v30, %s2661_s28  ;;  %v2197_v10 = vmul.f32 %v5382_v22, %v5381_v33  ;;  %v1842_v53 = vpop.permute.xlu1 %1841  ;;  %v5389_v20 = vld [vmem:[#allocation56_spill] sm:$0xff] }
 0x29d   :  { %2203 = vrot.lane.b32.xlu0 %v5380_v27, %s2661_s28  ;;  %v2220_v32 = vstv %s4729_s18  ;;  %v1818_v0 = vadd.f32 %v1814_v38, %v1788_v54  ;;  %v1817_v1 = vadd.f32 %v1813_v56, %v1787_v9  ;;  %v1738_v13 = vadd.f32 %v5383_v11, %v1692_v8  ;;  %v1840_v37 = vpop.permute.xlu0 %1839  ;;  %v5390_v9 = vld [vmem:[#allocation92_spill] sm:$0xff] }
 0x29e   :  { %v1737_v5 = vadd.f32 %v5384_v6, %v1691_v55  ;;  %v1796_v42 = vadd.f32 %v1792_v58, %v1766_v61  ;;  %v1795_v43 = vadd.f32 %v1791_v62, %v1765_v52  ;;  %v1822_v35 = vmul.f32 %v1820_v26, %v5385_v50  ;;  %v5392_v51 = vld [vmem:[#allocation52_spill] sm:$0xff]  ;;  %v5393_v61 = vld [vmem:[#allocation53_spill] sm:$0xff] }
 0x29f   :  { %v1821_v48 = vmul.f32 %v1820_v26, %v5386_v36  ;;  %v1794_v21 = vmul.f32 %v1790_v63, %v4238_v24  ;;  %v1793_v19 = vmul.f32 %v1790_v63, %v4240_v60  ;;  %v1768_v31 = vadd.f32 %v5387_v12, %v1738_v13 }
 0x2a0   :  { %v1767_v39 = vadd.f32 %v5388_v18, %v1737_v5  ;;  %v1852_v23 = vadd.f32 %v1842_v53, %v4701_v3  ;;  %v1851_v40 = vadd.f32 %v1840_v37, %v4704_v15  ;;  %2209 = vrot.lane.b32.xlu1 %v5389_v20, %s2661_s28  ;;  %v1826_v25 = vadd.f32 %v1822_v35, %v1796_v42  ;;  %v1846_v14 = vpop.permute.xlu1 %1845 }
 0x2a1   :  { %2207 = vrot.lane.b32.xlu0 %v2197_v10, %s2661_s28  ;;  %v1825_v28 = vadd.f32 %v1821_v48, %v1795_v43  ;;  %v1798_v29 = vadd.f32 %v1794_v21, %v1768_v31  ;;  %v1824_v17 = vmul.f32 %v1820_v26, %v5372_v4  ;;  %v1823_v49 = vmul.f32 %v1820_v26, %v5374_v16  ;;  %v1844_v54 = vpop.permute.xlu0 %1843 }
 0x2a2   :  { %v1797_v63 = vadd.f32 %v1793_v19, %v1767_v39  ;;  %v2222_v3 = vmul.f32 %v2220_v32, %v5390_v9  ;;  %v2221_v15 = vmul.f32 %v2220_v32, %v5391_v44  ;;  %v1854_v41 = vadd.f32 %v1846_v14, %v4724_v7 }
 0x2a3   :  { %v1853_v34 = vadd.f32 %v1844_v54, %v4727_v57  ;;  %v1828_v38 = vadd.f32 %v1824_v17, %v1798_v29  ;;  %v2224_v26 = vmul.f32 %v2220_v32, %v5392_v51  ;;  %v2223_v59 = vmul.f32 %v2220_v32, %v5393_v61 }
 0x2a4   :  { %v1827_v56 = vadd.f32 %v1823_v49, %v1797_v63  ;;  %2231 = vrot.lane.b32.xlu1 %v2222_v3, %s2661_s28  ;;  %v1868_v58 = vpop.permute.xlu1 %1867  ;;  %v2246_v55 = vstv %s2587_s19  ;;  %v2272_v6 = vstv %s2588_s20  ;;  %v2298_v31 = vstv %s2589_s21 }
 0x2a5   :  { %2229 = vrot.lane.b32.xlu0 %v2221_v15, %s2661_s28  ;;  %v1866_v62 = vpop.permute.xlu0 %1865  ;;  %v1878_v52 = vadd.f32 %v1868_v58, %v1816_v2  ;;  %v2248_v30 = vmul.f32 %v2246_v55, %v5390_v9  ;;  %v2247_v27 = vmul.f32 %v2246_v55, %v5391_v44  ;;  %v2250_v10 = vmul.f32 %v2246_v55, %v5392_v51 }
 0x2a6   :  { %v1877_v8 = vadd.f32 %v1866_v62, %v1815_v47  ;;  %v2249_v32 = vmul.f32 %v2246_v55, %v5393_v61  ;;  %v2274_v5 = vmul.f32 %v2272_v6, %v5390_v9  ;;  %v2273_v42 = vmul.f32 %v2272_v6, %v5391_v44 }
 0x2a7   :  { %v2276_v48 = vmul.f32 %v2272_v6, %v5392_v51  ;;  %v2275_v21 = vmul.f32 %v2272_v6, %v5393_v61  ;;  %v2300_v20 = vmul.f32 %v2298_v31, %v5375_v45  ;;  %v2302_v17 = vmul.f32 %v2298_v31, %v4238_v24 }
 0x2a8   :  { %2235 = vrot.lane.b32.xlu1 %v2224_v26, %s2661_s28  ;;  %v1872_v7 = vpop.permute.xlu1 %1871  ;;  %v2301_v63 = vmul.f32 %v2298_v31, %v4240_v60  ;;  %v2324_v54 = vstv %s2590_s22  ;;  %v2350_v61 = vstv %s2591_s23 }
 0x2a9   :  { %2233 = vrot.lane.b32.xlu0 %v2223_v59, %s2661_s28  ;;  %v1870_v57 = vpop.permute.xlu0 %1869  ;;  %v1880_v33 = vadd.f32 %v1872_v7, %v1818_v0  ;;  %v2326_v44 = vmul.f32 %v2324_v54, %v5375_v45  ;;  %v2325_v15 = vmul.f32 %v2324_v54, %v5376_v46  ;;  %v2328_v58 = vmul.f32 %v2324_v54, %v4238_v24 }
 0x2aa   :  { %v1879_v22 = vadd.f32 %v1870_v57, %v1817_v1  ;;  %v2327_v62 = vmul.f32 %v2324_v54, %v4240_v60  ;;  %v2351_v55 = vmul.f32 %v2350_v61, %v5376_v46 }
 0x2ac   :  { %2257 = vrot.lane.b32.xlu1 %v2248_v30, %s2661_s28  ;;  %v1894_v2 = vpop.permute.xlu1 %1893 }
 0x2ad   :  { %2255 = vrot.lane.b32.xlu0 %v2247_v27, %s2661_s28  ;;  %v1892_v47 = vpop.permute.xlu0 %1891  ;;  %v1904_v11 = vadd.f32 %v1894_v2, %v1826_v25  ;;  %v2299_v25 = vmul.f32 %v2298_v31, %v5376_v46 }
 0x2ae   :  { %v1903_v13 = vadd.f32 %v1892_v47, %v1825_v28 }
 0x2b0   :  { %2261 = vrot.lane.b32.xlu1 %v2250_v10, %s2661_s28  ;;  %v1898_v0 = vpop.permute.xlu1 %1897  ;;  %v2376_v10 = vstv %s2592_s2 }
 0x2b1   :  { %2259 = vrot.lane.b32.xlu0 %v2249_v32, %s2661_s28  ;;  %v1896_v1 = vpop.permute.xlu0 %1895  ;;  %v1906_v43 = vadd.f32 %v1898_v0, %v1828_v38  ;;  %v2378_v32 = vmul.f32 %v2376_v10, %v5385_v50  ;;  %v2380_v0 = vmul.f32 %v2376_v10, %v5372_v4 }
 0x2b2   :  { %v1905_v53 = vadd.f32 %v1896_v1, %v1827_v56  ;;  %v2379_v1 = vmul.f32 %v2376_v10, %v5374_v16 }
 0x2b4   :  { %2283 = vrot.lane.b32.xlu1 %v2274_v5, %s2661_s28  ;;  %v1920_v37 = vpop.permute.xlu1 %1919 }
 0x2b5   :  { %2281 = vrot.lane.b32.xlu0 %v2273_v42, %s2661_s28  ;;  %v1918_v35 = vpop.permute.xlu0 %1917  ;;  %v1930_v19 = vadd.f32 %v1920_v37, %v1852_v23 }
 0x2b6   :  { %v1929_v12 = vadd.f32 %v1918_v35, %v1851_v40 }
 0x2b8   :  { %2287 = vrot.lane.b32.xlu1 %v2276_v48, %s2661_s28  ;;  %v1924_v18 = vpop.permute.xlu1 %1923 }
 0x2b9   :  { %2285 = vrot.lane.b32.xlu0 %v2275_v21, %s2661_s28  ;;  %v1922_v39 = vpop.permute.xlu0 %1921  ;;  %v1932_v28 = vadd.f32 %v1924_v18, %v1854_v41 }
 0x2ba   :  { %v1931_v29 = vadd.f32 %v1922_v39, %v1853_v34 }
 0x2bc   :  { %2309 = vrot.lane.b32.xlu1 %v2300_v20, %s2661_s28  ;;  %v1946_v23 = vpop.permute.xlu1 %1945 }
 0x2bd   :  { %2307 = vrot.lane.b32.xlu0 %v2299_v25, %s2661_s28  ;;  %v1944_v40 = vpop.permute.xlu0 %1943  ;;  %v1956_v49 = vadd.f32 %v1946_v23, %v1878_v52 }
 0x2be   :  { %v1955_v14 = vadd.f32 %v1944_v40, %v1877_v8  ;;  %v2352_v8 = vmul.f32 %v2350_v61, %v5375_v45 }
 0x2c0   :  { %2313 = vrot.lane.b32.xlu1 %v2302_v17, %s2661_s28  ;;  %v1950_v9 = vpop.permute.xlu1 %1949 }
 0x2c1   :  { %2311 = vrot.lane.b32.xlu0 %v2301_v63, %s2661_s28  ;;  %v1948_v3 = vpop.permute.xlu0 %1947  ;;  %v1958_v41 = vadd.f32 %v1950_v9, %v1880_v33  ;;  %v2354_v33 = vmul.f32 %v2350_v61, %v4238_v24 }
 0x2c2   :  { %v1957_v34 = vadd.f32 %v1948_v3, %v1879_v22  ;;  %v2353_v22 = vmul.f32 %v2350_v61, %v4240_v60 }
 0x2c4   :  { %2335 = vrot.lane.b32.xlu1 %v2326_v44, %s2661_s28  ;;  %v1972_v38 = vpop.permute.xlu1 %1971 }
 0x2c5   :  { %2333 = vrot.lane.b32.xlu0 %v2325_v15, %s2661_s28  ;;  %v1970_v56 = vpop.permute.xlu0 %1969  ;;  %v1982_v51 = vadd.f32 %v1972_v38, %v1904_v11  ;;  %v2377_v11 = vmul.f32 %v2376_v10, %v5386_v36 }
 0x2c6   :  { %v1981_v26 = vadd.f32 %v1970_v56, %v1903_v13 }
 0x2c8   :  { %2339 = vrot.lane.b32.xlu1 %v2328_v58, %s2661_s28  ;;  %v1976_v59 = vpop.permute.xlu1 %1975 }
 0x2c9   :  { %2337 = vrot.lane.b32.xlu0 %v2327_v62, %s2661_s28  ;;  %v1974_v52 = vpop.permute.xlu0 %1973  ;;  %v1984_v7 = vadd.f32 %v1976_v59, %v1906_v43  ;;  %v2402_v43 = vstv %s2593_s3 }
 0x2ca   :  { %v1983_v57 = vadd.f32 %v1974_v52, %v1905_v53  ;;  %v2404_v35 = vmul.f32 %v2402_v43, %v5385_v50  ;;  %v2403_v48 = vmul.f32 %v2402_v43, %v5386_v36  ;;  %v2406_v18 = vmul.f32 %v2402_v43, %v5372_v4 }
 0x2cb   :  { %v2405_v39 = vmul.f32 %v2402_v43, %v5374_v16 }
 0x2cc   :  { %2361 = vrot.lane.b32.xlu1 %v2352_v8, %s2661_s28  ;;  %v1998_v30 = vpop.permute.xlu1 %1997 }
 0x2cd   :  { %2359 = vrot.lane.b32.xlu0 %v2351_v55, %s2661_s28  ;;  %v1996_v27 = vpop.permute.xlu0 %1995  ;;  %v2008_v2 = vadd.f32 %v1998_v30, %v1930_v19 }
 0x2ce   :  { %v2007_v47 = vadd.f32 %v1996_v27, %v1929_v12 }
 0x2d0   :  { %2365 = vrot.lane.b32.xlu1 %v2354_v33, %s2661_s28  ;;  %v2002_v45 = vpop.permute.xlu1 %2001 }
 0x2d1   :  { %2363 = vrot.lane.b32.xlu0 %v2353_v22, %s2661_s28  ;;  %v2000_v46 = vpop.permute.xlu0 %1999  ;;  %v2010_v13 = vadd.f32 %v2002_v45, %v1932_v28  ;;  %v2428_v28 = vstv %s2594_s24 }
 0x2d2   :  { %v2009_v6 = vadd.f32 %v2000_v46, %v1931_v29  ;;  %v2430_v40 = vmul.f32 %v2428_v28, %v5385_v50  ;;  %v2429_v17 = vmul.f32 %v2428_v28, %v5386_v36  ;;  %v2432_v9 = vmul.f32 %v2428_v28, %v5372_v4 }
 0x2d3   :  { %v2431_v3 = vmul.f32 %v2428_v28, %v5374_v16 }
 0x2d4   :  { %2387 = vrot.lane.b32.xlu1 %v2378_v32, %s2661_s28  ;;  %v2024_v24 = vpop.permute.xlu1 %2023 }
 0x2d5   :  { %2385 = vrot.lane.b32.xlu0 %v2377_v11, %s2661_s28  ;;  %v2022_v60 = vpop.permute.xlu0 %2021  ;;  %v2034_v5 = vadd.f32 %v2024_v24, %v1956_v49 }
 0x2d6   :  { %v2033_v42 = vadd.f32 %v2022_v60, %v1955_v14 }
 0x2d8   :  { %2391 = vrot.lane.b32.xlu1 %v2380_v0, %s2661_s28  ;;  %v2028_v53 = vpop.permute.xlu1 %2027 }
 0x2d9   :  { %2389 = vrot.lane.b32.xlu0 %v2379_v1, %s2661_s28  ;;  %v2026_v37 = vpop.permute.xlu0 %2025  ;;  %v2036_v21 = vadd.f32 %v2028_v53, %v1958_v41 }
 0x2da   :  { %v2035_v19 = vadd.f32 %v2026_v37, %v1957_v34 }
 0x2dc   :  { %2413 = vrot.lane.b32.xlu1 %v2404_v35, %s2661_s28  ;;  %v2050_v12 = vpop.permute.xlu1 %2049 }
 0x2dd   :  { %2411 = vrot.lane.b32.xlu0 %v2403_v48, %s2661_s28  ;;  %v2048_v31 = vpop.permute.xlu0 %2047  ;;  %v2060_v20 = vadd.f32 %v2050_v12, %v1982_v51 }
 0x2de   :  { %v2059_v25 = vadd.f32 %v2048_v31, %v1981_v26 }
 0x2e0   :  { %2417 = vrot.lane.b32.xlu1 %v2406_v18, %s2661_s28  ;;  %v2054_v29 = vpop.permute.xlu1 %2053 }
 0x2e1   :  { %2415 = vrot.lane.b32.xlu0 %v2405_v39, %s2661_s28  ;;  %v2052_v23 = vpop.permute.xlu0 %2051  ;;  %v2062_v63 = vadd.f32 %v2054_v29, %v1984_v7 }
 0x2e2   :  { %v2061_v49 = vadd.f32 %v2052_v23, %v1983_v57 }
 0x2e4   :  { %2439 = vrot.lane.b32.xlu1 %v2430_v40, %s2661_s28  ;;  %v2076_v14 = vpop.permute.xlu1 %2075 }
 0x2e5   :  { %2437 = vrot.lane.b32.xlu0 %v2429_v17, %s2661_s28  ;;  %v2074_v54 = vpop.permute.xlu0 %2073  ;;  %v2086_v44 = vadd.f32 %v2076_v14, %v2008_v2 }
 0x2e6   :  { %v2085_v15 = vadd.f32 %v2074_v54, %v2007_v47 }
 0x2e8   :  { %2443 = vrot.lane.b32.xlu1 %v2432_v9, %s2661_s28  ;;  %v2080_v50 = vpop.permute.xlu1 %2079 }
 0x2e9   :  { %2441 = vrot.lane.b32.xlu0 %v2431_v3, %s2661_s28  ;;  %v2078_v36 = vpop.permute.xlu0 %2077  ;;  %v2088_v41 = vadd.f32 %v2080_v50, %v2010_v13  ;;  %s2662_s28 = smov [#allocation8]  }
 0x2ea   :  { %v2087_v34 = vadd.f32 %v2078_v36, %v2009_v6  ;;  %s2473_s25 = sshll.u32 %s2662_s28, 4  ;;  %s2474_s25 = int_to_ptr.vmem [resolvable:$true] %s2473_s25 }
 0x2eb   :  { %s2628_s0 = scalar_lea.vmem %s2474_s25, 1536  ;;  %p2633_p11 = scmp.lt.s32.totalorder %s2474_s25, %s2474_s25 }
 0x2ec   :  { %v2102_v38 = vpop.permute.xlu1 %2101  ;;  %p2629_p10 = scmp.ne.s32.totalorder %s2474_s25, %s2628_s0  ;;  %p2634_p12 = scmp.lt.s32.totalorder %s2628_s0, %s2628_s0 }
 0x2ed   :  { %v2100_v56 = vpop.permute.xlu0 %2099  ;;  %v2112_v58 = vadd.f32 %v2102_v38, %v2034_v5 }
 0x2ee   :  { %v2111_v62 = vadd.f32 %v2100_v56, %v2033_v42  ;;  %p2635_p13 = por %p2634_p12, %p2633_p11 }
 0x2f0   :  { %p2636_p0 = pnand %p2635_p13, %p2629_p10 }
 0x2f1   :  { %v2106_v51 = vpop.permute.xlu1 %2105  ;;  %v2104_v26 = vpop.permute.xlu0 %2103 }
 0x2f2   :  { %v2114_v61 = vadd.f32 %v2106_v51, %v2036_v21  ;;  %v2113_v4 = vadd.f32 %v2104_v26, %v2035_v19 }
 0x2f5   :  { %v2128_v59 = vpop.permute.xlu1 %2127  ;;  %v2126_v16 = vpop.permute.xlu0 %2125 }
 0x2f6   :  { %v2138_v52 = vadd.f32 %v2128_v59, %v2060_v20  ;;  %v2137_v8 = vadd.f32 %v2126_v16, %v2059_v25 }
 0x2f9   :  { %v2132_v55 = vpop.permute.xlu1 %2131  ;;  %v2130_v7 = vpop.permute.xlu0 %2129 }
 0x2fa   :  { %v2140_v57 = vadd.f32 %v2132_v55, %v2062_v63  ;;  %v2139_v30 = vadd.f32 %v2130_v7, %v2061_v49 }
 0x2fe   :  { %v2154_v27 = vpop.permute.xlu1 %2153  ;;  %v2152_v33 = vpop.permute.xlu0 %2151 }
 0x2ff   :  { %v2164_v22 = vadd.f32 %v2154_v27, %v2086_v44  ;;  %v2163_v2 = vadd.f32 %v2152_v33, %v2085_v15 }
 0x302   :  { %v2158_v47 = vpop.permute.xlu1 %2157  ;;  %v2156_v10 = vpop.permute.xlu0 %2155 }
 0x303   :  { %v2166_v45 = vadd.f32 %v2158_v47, %v2088_v41  ;;  %v2165_v46 = vadd.f32 %v2156_v10, %v2087_v34 }
 0x306   :  { %v2180_v32 = vpop.permute.xlu1 %2179 }
 0x307   :  { %v2178_v11 = vpop.permute.xlu0 %2177  ;;  %v2190_v13 = vadd.f32 %v2180_v32, %v2112_v58 }
 0x308   :  { %v2189_v6 = vadd.f32 %v2178_v11, %v2111_v62 }
 0x30a   :  { %v2184_v24 = vpop.permute.xlu1 %2183 }
 0x30b   :  { %v2182_v60 = vpop.permute.xlu0 %2181  ;;  %v2192_v0 = vadd.f32 %v2184_v24, %v2114_v61 }
 0x30c   :  { %v2191_v1 = vadd.f32 %v2182_v60, %v2113_v4 }
 0x30e   :  { %v2206_v5 = vpop.permute.xlu1 %2205 }
 0x30f   :  { %v2204_v42 = vpop.permute.xlu0 %2203  ;;  %v4858_v43 = vadd.f32 %v2206_v5, %v2138_v52 }
 0x310   :  { %v4860_v53 = vadd.f32 %v2204_v42, %v2137_v8 }
 0x312   :  { %v2210_v37 = vpop.permute.xlu1 %2209 }
 0x313   :  { %v2208_v35 = vpop.permute.xlu0 %2207  ;;  %v4862_v48 = vadd.f32 %v2210_v37, %v2140_v57 }
 0x314   :  { %v4864_v21 = vadd.f32 %v2208_v35, %v2139_v30 }
 0x316   :  { %v2232_v19 = vpop.permute.xlu1 %2231 }
 0x317   :  { %v2230_v12 = vpop.permute.xlu0 %2229  ;;  %v2242_v38 = vadd.f32 %v2232_v19, %v2164_v22 }
 0x318   :  { %v2241_v56 = vadd.f32 %v2230_v12, %v2163_v2 }
 0x31a   :  { %v2236_v31 = vpop.permute.xlu1 %2235 }
 0x31b   :  { %v2234_v18 = vpop.permute.xlu0 %2233  ;;  %v2244_v61 = vadd.f32 %v2236_v31, %v2166_v45 }
 0x31c   :  { %v2243_v4 = vadd.f32 %v2234_v18, %v2165_v46 }
 0x31e   :  { %v2258_v39 = vpop.permute.xlu1 %2257 }
 0x31f   :  { %v2256_v20 = vpop.permute.xlu0 %2255  ;;  %v2268_v57 = vadd.f32 %v2258_v39, %v2190_v13 }
 0x320   :  { %v2267_v30 = vadd.f32 %v2256_v20, %v2189_v6 }
 0x322   :  { %v2262_v25 = vpop.permute.xlu1 %2261 }
 0x323   :  { %v2260_v28 = vpop.permute.xlu0 %2259  ;;  %v2270_v45 = vadd.f32 %v2262_v25, %v2192_v0 }
 0x324   :  { %v2269_v46 = vadd.f32 %v2260_v28, %v2191_v1 }
 0x326   :  { %v2284_v29 = vpop.permute.xlu1 %2283 }
 0x327   :  { %v2282_v23 = vpop.permute.xlu0 %2281  ;;  %v2294_v5 = vadd.f32 %v2284_v29, %v4858_v43 }
 0x328   :  { %v2293_v42 = vadd.f32 %v2282_v23, %v4860_v53 }
 0x32a   :  { %v2288_v40 = vpop.permute.xlu1 %2287 }
 0x32b   :  { %v2286_v17 = vpop.permute.xlu0 %2285  ;;  %v2296_v31 = vadd.f32 %v2288_v40, %v4862_v48 }
 0x32c   :  { %v2295_v18 = vadd.f32 %v2286_v17, %v4864_v21 }
 0x32e   :  { %v2310_v63 = vpop.permute.xlu1 %2309 }
 0x32f   :  { %v2308_v49 = vpop.permute.xlu0 %2307  ;;  %v2320_v58 = vadd.f32 %v2310_v63, %v2242_v38 }
 0x330   :  { %v2319_v62 = vadd.f32 %v2308_v49, %v2241_v56 }
 0x332   :  { %v2314_v14 = vpop.permute.xlu1 %2313 }
 0x333   :  { %v2312_v54 = vpop.permute.xlu0 %2311  ;;  %v2322_v52 = vadd.f32 %v2314_v14, %v2244_v61 }
 0x334   :  { %v2321_v8 = vadd.f32 %v2312_v54, %v2243_v4 }
 0x336   :  { %v2336_v9 = vpop.permute.xlu1 %2335 }
 0x337   :  { %v2334_v3 = vpop.permute.xlu0 %2333  ;;  %v2346_v22 = vadd.f32 %v2336_v9, %v2268_v57 }
 0x338   :  { %v2345_v2 = vadd.f32 %v2334_v3, %v2267_v30 }
 0x33a   :  { %v2340_v44 = vpop.permute.xlu1 %2339 }
 0x33b   :  { %v2338_v15 = vpop.permute.xlu0 %2337  ;;  %v2348_v24 = vadd.f32 %v2340_v44, %v2270_v45 }
 0x33c   :  { %v2347_v60 = vadd.f32 %v2338_v15, %v2269_v46 }
 0x33e   :  { %v2362_v50 = vpop.permute.xlu1 %2361 }
 0x33f   :  { %v2360_v36 = vpop.permute.xlu0 %2359  ;;  %v2372_v19 = vadd.f32 %v2362_v50, %v2294_v5 }
 0x340   :  { %v2371_v12 = vadd.f32 %v2360_v36, %v2293_v42 }
 0x342   :  { %v2366_v41 = vpop.permute.xlu1 %2365 }
 0x343   :  { %v2364_v34 = vpop.permute.xlu0 %2363  ;;  %v2374_v43 = vadd.f32 %v2366_v41, %v2296_v31 }
 0x344   :  { %v2373_v53 = vadd.f32 %v2364_v34, %v2295_v18 }
 0x346   :  { %v2388_v51 = vpop.permute.xlu1 %2387 }
 0x347   :  { %v2386_v26 = vpop.permute.xlu0 %2385  ;;  %v2398_v59 = vadd.f32 %v2388_v51, %v2320_v58 }
 0x348   :  { %v2397_v16 = vadd.f32 %v2386_v26, %v2319_v62 }
 0x349   :  { %2455 = vst.msk [vmem:[#allocation8 + $0x8] sm:$0xff] %vm2453_vm3, %v2398_v59 }
 0x34a   :  { %2454 = vst.msk [vmem:[#allocation8] sm:$0xff] %vm2453_vm3, %v2397_v16  ;;  %v2392_v55 = vpop.permute.xlu1 %2391 }
 0x34b   :  { %v2390_v7 = vpop.permute.xlu0 %2389  ;;  %v2400_v27 = vadd.f32 %v2392_v55, %v2322_v52 }
 0x34c   :  { %v2399_v33 = vadd.f32 %v2390_v7, %v2321_v8 }
 0x34d   :  { %2457 = vst.msk [vmem:[#allocation8 + $0x38] sm:$0xff] %vm2453_vm3, %v2400_v27 }
 0x34e   :  { %2456 = vst.msk [vmem:[#allocation8 + $0x30] sm:$0xff] %vm2453_vm3, %v2399_v33  ;;  %v2414_v47 = vpop.permute.xlu1 %2413 }
 0x34f   :  { %v2412_v10 = vpop.permute.xlu0 %2411  ;;  %v2424_v32 = vadd.f32 %v2414_v47, %v2346_v22 }
 0x350   :  { %v2423_v11 = vadd.f32 %v2412_v10, %v2345_v2 }
 0x351   :  { %2460 = vst.msk [vmem:[#allocation8 + $0x18] sm:$0xff] %vm2453_vm3, %v2424_v32 }
 0x352   :  { %2459 = vst.msk [vmem:[#allocation8 + $0x10] sm:$0xff] %vm2453_vm3, %v2423_v11  ;;  %v2418_v13 = vpop.permute.xlu1 %2417 }
 0x353   :  { %v2416_v6 = vpop.permute.xlu0 %2415  ;;  %v2426_v37 = vadd.f32 %v2418_v13, %v2348_v24 }
 0x354   :  { %v2425_v35 = vadd.f32 %v2416_v6, %v2347_v60 }
 0x355   :  { %2462 = vst.msk [vmem:[#allocation8 + $0x48] sm:$0xff] %vm2453_vm3, %v2426_v37 }
 0x356   :  { %2461 = vst.msk [vmem:[#allocation8 + $0x40] sm:$0xff] %vm2453_vm3, %v2425_v35  ;;  %v2440_v0 = vpop.permute.xlu1 %2439 }
 0x357   :  { %v2438_v1 = vpop.permute.xlu0 %2437  ;;  %v2450_v39 = vadd.f32 %v2440_v0, %v2372_v19 }
 0x358   :  { %v2449_v20 = vadd.f32 %v2438_v1, %v2371_v12 }
 0x359   :  { %2465 = vst.msk [vmem:[#allocation8 + $0x28] sm:$0xff] %vm2453_vm3, %v2450_v39 }
 0x35a   :  { %2464 = vst.msk [vmem:[#allocation8 + $0x20] sm:$0xff] %vm2453_vm3, %v2449_v20  ;;  %v2444_v25 = vpop.permute.xlu1 %2443 }
 0x35b   :  { %v2442_v28 = vpop.permute.xlu0 %2441  ;;  %v2452_v29 = vadd.f32 %v2444_v25, %v2374_v43 }
 0x35c   :  { %v2451_v23 = vadd.f32 %v2442_v28, %v2373_v53 }
 0x35d   :  { %2467 = vst.msk [vmem:[#allocation8 + $0x58] sm:$0xff] %vm2453_vm3, %v2452_v29 }
 0x35e   :  { %2466 = vst.msk [vmem:[#allocation8 + $0x50] sm:$0xff] %vm2453_vm3, %v2451_v23 }
 0x35f   :  { %2639 = shalt.err (!%p2636_p0)
}
 0x360   :  { %s2640_s30 = scalar_lea.hbm %s4898_s4, 1536 }
 0x361   :  { %p2641_p1 = scmp.ne.s32.totalorder %s4898_s4, %s2640_s30  ;;  %p2644_p2 = scmp.lt.u32.totalorder %s2640_s30, %s4898_s4 }
 0x363   :  { %p2646_p3 = pnand %p2644_p2, %p2641_p1 }
 0x365   :  { %2649 = shalt.err (!%p2646_p3)
}
 0x366   :  { %s2663_s7 = smov 128   ;;  %s2664_s9 = smov 8  }
 0x367   :  { %2479 = dma.vmem_to_hbm [thread:$0]  %s2474_s25, 1536, %s4898_s4, [#allocation4], %s2663_s7, %s2663_s7, %s2664_s9  }
 0x368   :  { %2654 = dma.done.wait [#allocation4], 1536  }
 0x369   :  { %2655 = vsyncadd [#allocation4], 4294965760 }
 0x36a   :  { %2483 = vsyncpa [#allocation4], 1 }
 0x36b   :  { %2484 = vsyncpa [#allocation5], 1 }
 0x36c   :  { %2485 = vsyncpa [#allocation7], 1 }

</bundles_post_ra>
